<compile_context>
chip_gen: v5e
topology: v5e:2x2
jax: 0.10.0
libtpu: 0.0.40
codegen_flags: <defaults>
</compile_context>

<pallas_src>
import functools

import jax
import jax.numpy as jnp
from jax.experimental import pallas as pl
from jax.experimental.pallas import tpu as pltpu

_LANE = 128
_BN_EPS = 1e-5


# ----------------------------- in-kernel math ------------------------------

def _mish(x):
    # Mish(x) = x * tanh(softplus(x)) = x * (1 - 2 / ((1 + e^x)^2 + 1)).
    # One EUP exp + one EUP approx reciprocal; saturates to x (e^x -> inf)
    # and to 0 (e^x -> 0), matching the reference at the extremes.
    u = 1.0 + jnp.exp(x)
    return x * (1.0 - 2.0 * pl.reciprocal(u * u + 1.0, approx=True))


def _mapping_kernel(p_ref, w1_ref, bn1_ref, wa_ref, wb_ref, bnr_ref,
                    bn2_ref, wf_ref, bf_ref, o_ref, *, num_res):
    f32 = jnp.float32
    bf16 = jnp.bfloat16

    # conv_1 (im2col matmul) + shared BN (conv bias folded into shift) + Mish
    bn1 = bn1_ref[...]
    h = jnp.dot(p_ref[...].astype(bf16), w1_ref[...],
                preferred_element_type=f32)
    h = _mish(h * bn1[0:1, :] + bn1[1:2, :])

    # Residual point-wise blocks; activation tile stays resident as the loop
    # carry (VMEM/vregs), weights are dynamically indexed from the stacks.
    def body(i, h):
        ss = bnr_ref[i]                      # [4, C] = s1, t1', s2, t2' (biases folded)
        y = jnp.dot(h.astype(bf16), wa_ref[i], preferred_element_type=f32)
        y = _mish(y * ss[0:1, :] + ss[1:2, :])
        z = jnp.dot(y.astype(bf16), wb_ref[i], preferred_element_type=f32)
        z = z * ss[2:3, :] + ss[3:4, :]
        return _mish(z + h)

    if num_res > 0:
        h = jax.lax.fori_loop(0, num_res, body, h, unroll=True)

    # shared BN (second application) + Mish + final 1x1 conv (out padded to 128 lanes)
    bn2 = bn2_ref[...]
    h = _mish(h * bn2[0:1, :] + bn2[1:2, :])
    y = jnp.dot(h.astype(bf16), wf_ref[...], preferred_element_type=f32)
    y = y + bf_ref[...]
    o_ref[...] = y.astype(o_ref.dtype)


# ----------------------------- pallas wrapper -------------------------------

def mapping_forward(kparams, x_nchw, tm=256):
    """Fused Mapping forward: [N, Cin, H, W] -> [N, out_c, H-2, W-2]."""
    N, Cin, H, W = x_nchw.shape
    Ho, Wo = H - 2, W - 2
    M = N * Ho * Wo

    # NCHW -> NHWC, then im2col for the 3x3 'valid' conv (cheap XLA glue here).
    x = jnp.transpose(x_nchw, (0, 2, 3, 1))
    taps = [x[:, dy:dy + Ho, dx:dx + Wo, :] for dy in range(3) for dx in range(3)]
    patches = jnp.concatenate(taps, axis=-1).reshape(M, 9 * Cin)

    tm = max(8, min(tm, ((M + 7) // 8) * 8))       # don't over-tile tiny inputs
    Mp = ((M + tm - 1) // tm) * tm
    if Mp != M:
        patches = jnp.pad(patches, ((0, Mp - M), (0, 0)))

    w1, bn1, wa, wb = kparams["w1"], kparams["bn1"], kparams["wa"], kparams["wb"]
    bnr, bn2, wf, bf = kparams["bnr"], kparams["bn2"], kparams["wf"], kparams["bf"]
    num_res, out_c = kparams["num_res"], kparams["out_c"]
    K1 = patches.shape[1]
    out_cp = wf.shape[1]

    def full(a):  # whole array as one resident block (weights / BN vectors)
        return pl.BlockSpec(a.shape, lambda *_: (0,) * a.ndim)

    out = pl.pallas_call(
        functools.partial(_mapping_kernel, num_res=num_res),
        grid=(Mp // tm,),
        in_specs=[pl.BlockSpec((tm, K1), lambda i: (i, 0)),
                  full(w1), full(bn1), full(wa), full(wb), full(bnr),
                  full(bn2), full(wf), full(bf)],
        out_specs=pl.BlockSpec((tm, out_cp), lambda i: (i, 0)),
        out_shape=jax.ShapeDtypeStruct((Mp, out_cp), jnp.float32),
        compiler_params=pltpu.CompilerParams(
            dimension_semantics=("parallel",)),
    )(patches, w1, bn1, wa, wb, bnr, bn2, wf, bf)

    y = out[:M, :out_c].reshape(N, Ho, Wo, out_c).transpose(0, 3, 1, 2)
    return y


# ----------------------------- parameter setup ------------------------------

def _fold_bn(gamma, beta, mean, var, eps=_BN_EPS):
    scale = gamma / jnp.sqrt(var + eps)
    return scale, beta - mean * scale


def init_mapping_params(key, in_c, mid_c, out_c, num_res):
    """Raw (PyTorch-like) parameters: conv weights as (kh, kw, cin, cout)."""
    keys = iter(jax.random.split(key, 8 + 12 * num_res))

    def nrm(shape, scale=0.1):
        return scale * jax.random.normal(next(keys), shape, jnp.float32)

    def bn_stats(c):
        return (1.0 + nrm((c,)), nrm((c,)), nrm((c,)), jnp.abs(nrm((c,))) + 1.0)

    return {
        "conv1_w": nrm((3, 3, in_c, mid_c)),
        "conv1_b": nrm((mid_c,)),
        "bn": bn_stats(mid_c),                       # shared BatchNorm2d(mid_c)
        "res_blocks": [
            {"w1": nrm((mid_c, mid_c)), "b1": nrm((mid_c,)), "bn1": bn_stats(mid_c),
             "w2": nrm((mid_c, mid_c)), "b2": nrm((mid_c,)), "bn2": bn_stats(mid_c)}
            for _ in range(num_res)],
        "final_w": nrm((mid_c, out_c)),
        "final_b": nrm((out_c,)),
    }


def prepare_mapping_params(params, lane=_LANE):
    """Fold BN + conv biases, stack res-block weights, lane-pad the final conv."""
    bf16 = jnp.bfloat16
    Cin, mid = params["conv1_w"].shape[2], params["conv1_w"].shape[3]
    out_c = params["final_w"].shape[1]
    s, t = _fold_bn(*params["bn"])

    kp = {
        "w1": params["conv1_w"].reshape(9 * Cin, mid).astype(bf16),
        # shared BN, 1st use: conv_1 bias folded into the shift
        "bn1": jnp.stack([s, params["conv1_b"] * s + t]).astype(jnp.float32),
        # shared BN, 2nd use (applied to residues output): raw shift
        "bn2": jnp.stack([s, t]).astype(jnp.float32),
    }

    blocks = params["res_blocks"]
    if blocks:
        kp["wa"] = jnp.stack([b["w1"] for b in blocks]).astype(bf16)
        kp["wb"] = jnp.stack([b["w2"] for b in blocks]).astype(bf16)
        rows = []
        for b in blocks:
            s1, t1 = _fold_bn(*b["bn1"])
            s2, t2 = _fold_bn(*b["bn2"])
            rows.append(jnp.stack([s1, b["b1"] * s1 + t1,
                                   s2, b["b2"] * s2 + t2]))
        kp["bnr"] = jnp.stack(rows).astype(jnp.float32)
    else:  # dummy stacks so BlockSpecs stay valid; kernel loops 0 times
        kp["wa"] = jnp.zeros((1, mid, mid), bf16)
        kp["wb"] = jnp.zeros((1, mid, mid), bf16)
        kp["bnr"] = jnp.zeros((1, 4, mid), jnp.float32)

    out_cp = ((out_c + lane - 1) // lane) * lane     # lane-dense output width
    wf = jnp.zeros((mid, out_cp), jnp.float32).at[:, :out_c].set(params["final_w"])
    bf_ = jnp.zeros((1, out_cp), jnp.float32).at[0, :out_c].set(params["final_b"])
    kp["wf"] = wf.astype(bf16)
    kp["bf"] = bf_
    kp["num_res"] = len(blocks)
    kp["out_c"] = out_c
    return kp


# ----------------------------- pure-JAX reference ---------------------------

def _ref_mish(x):
    return x * jnp.tanh(jax.nn.softplus(x))


def mapping_reference(params, x_nchw):
    """f32 reference mirroring the PyTorch Mapping forward (NCHW throughout)."""
    def bn(x, stats):
        g, b, m, v = stats
        s = g / jnp.sqrt(v + _BN_EPS)
        return x * s[None, :, None, None] + (b - m * s)[None, :, None, None]

    w1 = jnp.transpose(params["conv1_w"], (3, 2, 0, 1))          # -> OIHW
    h = jax.lax.conv_general_dilated(
        x_nchw, w1, window_strides=(1, 1), padding="VALID",
        dimension_numbers=("NCHW", "OIHW", "NCHW"))
    h = h + params["conv1_b"][None, :, None, None]
    h = _ref_mish(bn(h, params["bn"]))

    for blk in params["res_blocks"]:
        y = jnp.einsum("nchw,cd->ndhw", h, blk["w1"]) + blk["b1"][None, :, None, None]
        y = _ref_mish(bn(y, blk["bn1"]))
        z = jnp.einsum("nchw,cd->ndhw", y, blk["w2"]) + blk["b2"][None, :, None, None]
        z = bn(z, blk["bn2"])
        h = _ref_mish(z + h)

    h = _ref_mish(bn(h, params["bn"]))
    y = jnp.einsum("nchw,cd->ndhw", h, params["final_w"])
    return y + params["final_b"][None, :, None, None]


# ----------------------------------- main -----------------------------------

if __name__ == "__main__":
    in_channel, middle_channel, out_channel, num_res_point_wise = 4, 32, 8, 2
    N, H, W = 2, 16, 16

    key = jax.random.PRNGKey(0)
    k_params, k_x = jax.random.split(key)
    raw_params = init_mapping_params(k_params, in_channel, middle_channel,
                                     out_channel, num_res_point_wise)
    kparams = prepare_mapping_params(raw_params)
    x = jax.random.normal(k_x, (N, in_channel, H, W), jnp.float32)

    fwd = jax.jit(lambda xx: mapping_forward(kparams, xx))
    y = fwd(x)
    jax.block_until_ready(y)

    assert y.shape == (N, out_channel, H - 2, W - 2), y.shape
    assert bool(jnp.all(jnp.isfinite(y)))

    # Loose check vs the f32 reference (kernel uses bf16 matmul operands and an
    # approx-reciprocal Mish, so allow a generous tolerance).
    y_ref = mapping_reference(raw_params, x)
    max_diff = float(jnp.max(jnp.abs(y - y_ref)))
    assert max_diff < 0.1, f"max |pallas - ref| = {max_diff}"

    print("KERNEL_OK")
</pallas_src>

<mosaic_0001>
module attributes {stable_mosaic.version = 11 : i64} {
  func.func @_mapping_kernel(%arg0: i32, %arg1: memref<256x36xf32, #tpu.memory_space<vmem>>, %arg2: memref<36x32xbf16, #tpu.memory_space<vmem>>, %arg3: memref<2x32xf32, #tpu.memory_space<vmem>>, %arg4: memref<2x32x32xbf16, #tpu.memory_space<vmem>>, %arg5: memref<2x32x32xbf16, #tpu.memory_space<vmem>>, %arg6: memref<2x4x32xf32, #tpu.memory_space<vmem>>, %arg7: memref<2x32xf32, #tpu.memory_space<vmem>>, %arg8: memref<32x128xbf16, #tpu.memory_space<vmem>>, %arg9: memref<1x128xf32, #tpu.memory_space<vmem>>, %arg10: memref<256x128xf32, #tpu.memory_space<vmem>>) attributes {dimension_semantics = [#tpu.dimension_semantics<parallel>], iteration_bounds = array<i64: 2>, scalar_prefetch = 0 : i64, scratch_operands = 0 : i64, tpu.core_type = #tpu.core_type<tc>, window_params = [{transform_indices = @transform_0, window_bounds = array<i64: 256, 36>}, {pipeline_mode = #tpu.pipeline_mode<synchronous>, transform_indices = @transform_1, window_bounds = array<i64: 36, 32>}, {pipeline_mode = #tpu.pipeline_mode<synchronous>, transform_indices = @transform_2, window_bounds = array<i64: 2, 32>}, {pipeline_mode = #tpu.pipeline_mode<synchronous>, transform_indices = @transform_3, window_bounds = array<i64: 2, 32, 32>}, {pipeline_mode = #tpu.pipeline_mode<synchronous>, transform_indices = @transform_4, window_bounds = array<i64: 2, 32, 32>}, {pipeline_mode = #tpu.pipeline_mode<synchronous>, transform_indices = @transform_5, window_bounds = array<i64: 2, 4, 32>}, {pipeline_mode = #tpu.pipeline_mode<synchronous>, transform_indices = @transform_6, window_bounds = array<i64: 2, 32>}, {pipeline_mode = #tpu.pipeline_mode<synchronous>, transform_indices = @transform_7, window_bounds = array<i64: 32, 128>}, {pipeline_mode = #tpu.pipeline_mode<synchronous>, transform_indices = @transform_8, window_bounds = array<i64: 1, 128>}, {transform_indices = @transform_9, window_bounds = array<i64: 256, 128>}]} {
    %c0 = arith.constant 0 : index
    %c0_0 = arith.constant 0 : index
    %0 = vector.load %arg3[%c0, %c0_0] : memref<2x32xf32, #tpu.memory_space<vmem>>, vector<2x32xf32>
    %c0_1 = arith.constant 0 : index
    %c0_2 = arith.constant 0 : index
    %1 = vector.load %arg1[%c0_1, %c0_2] : memref<256x36xf32, #tpu.memory_space<vmem>>, vector<256x36xf32>
    %2 = arith.truncf %1 : vector<256x36xf32> to vector<256x36xbf16>
    %c0_3 = arith.constant 0 : index
    %c0_4 = arith.constant 0 : index
    %3 = vector.load %arg2[%c0_3, %c0_4] : memref<36x32xbf16, #tpu.memory_space<vmem>>, vector<36x32xbf16>
    %cst = arith.constant dense<0.000000e+00> : vector<256x32xf32>
    %4 = tpu.matmul %2, %3, %cst {dimension_numbers = #tpu.dot_dimension_numbers<[1], [0], [0], [1], [0, 0, 1, 1], [], []>} : vector<256x36xbf16>, vector<36x32xbf16>, vector<256x32xf32> -> vector<256x32xf32>
    %5 = vector.extract_strided_slice %0 {offsets = [0, 0], sizes = [1, 32], strides = [1, 1]} : vector<2x32xf32> to vector<1x32xf32>
    %6 = vector.broadcast %5 : vector<1x32xf32> to vector<256x32xf32>
    %7 = arith.mulf %4, %6 : vector<256x32xf32>
    %8 = vector.extract_strided_slice %0 {offsets = [1, 0], sizes = [1, 32], strides = [1, 1]} : vector<2x32xf32> to vector<1x32xf32>
    %9 = vector.broadcast %8 : vector<1x32xf32> to vector<256x32xf32>
    %10 = arith.addf %7, %9 : vector<256x32xf32>
    %11 = math.exp %10 : vector<256x32xf32>
    %cst_5 = arith.constant 1.000000e+00 : f32
    %12 = vector.broadcast %cst_5 : f32 to vector<256x32xf32>
    %13 = arith.addf %12, %11 : vector<256x32xf32>
    %14 = arith.mulf %13, %13 : vector<256x32xf32>
    %cst_6 = arith.constant 1.000000e+00 : f32
    %15 = vector.broadcast %cst_6 : f32 to vector<256x32xf32>
    %16 = arith.addf %14, %15 : vector<256x32xf32>
    %17 = tpu.reciprocal %16 {approx = true} : vector<256x32xf32> -> vector<256x32xf32>
    %cst_7 = arith.constant 2.000000e+00 : f32
    %18 = vector.broadcast %cst_7 : f32 to vector<256x32xf32>
    %19 = arith.mulf %18, %17 : vector<256x32xf32>
    %cst_8 = arith.constant 1.000000e+00 : f32
    %20 = vector.broadcast %cst_8 : f32 to vector<256x32xf32>
    %21 = arith.subf %20, %19 : vector<256x32xf32>
    %22 = arith.mulf %10, %21 : vector<256x32xf32>
    %c0_i32 = arith.constant 0 : i32
    %23 = arith.index_cast %c0_i32 : i32 to index
    %c0_9 = arith.constant 0 : index
    %c0_10 = arith.constant 0 : index
    %24 = vector.load %arg6[%23, %c0_9, %c0_10] : memref<2x4x32xf32, #tpu.memory_space<vmem>>, vector<1x4x32xf32>
    %25 = vector.shape_cast %24 : vector<1x4x32xf32> to vector<4x32xf32>
    %26 = arith.truncf %22 : vector<256x32xf32> to vector<256x32xbf16>
    %27 = arith.index_cast %c0_i32 : i32 to index
    %c0_11 = arith.constant 0 : index
    %c0_12 = arith.constant 0 : index
    %28 = vector.load %arg4[%27, %c0_11, %c0_12] : memref<2x32x32xbf16, #tpu.memory_space<vmem>>, vector<1x32x32xbf16>
    %29 = vector.shape_cast %28 : vector<1x32x32xbf16> to vector<32x32xbf16>
    %cst_13 = arith.constant dense<0.000000e+00> : vector<256x32xf32>
    %30 = tpu.matmul %26, %29, %cst_13 {dimension_numbers = #tpu.dot_dimension_numbers<[1], [0], [0], [1], [0, 0, 1, 1], [], []>} : vector<256x32xbf16>, vector<32x32xbf16>, vector<256x32xf32> -> vector<256x32xf32>
    %31 = vector.extract_strided_slice %25 {offsets = [0, 0], sizes = [1, 32], strides = [1, 1]} : vector<4x32xf32> to vector<1x32xf32>
    %32 = vector.broadcast %31 : vector<1x32xf32> to vector<256x32xf32>
    %33 = arith.mulf %30, %32 : vector<256x32xf32>
    %34 = vector.extract_strided_slice %25 {offsets = [1, 0], sizes = [1, 32], strides = [1, 1]} : vector<4x32xf32> to vector<1x32xf32>
    %35 = vector.broadcast %34 : vector<1x32xf32> to vector<256x32xf32>
    %36 = arith.addf %33, %35 : vector<256x32xf32>
    %37 = math.exp %36 : vector<256x32xf32>
    %cst_14 = arith.constant 1.000000e+00 : f32
    %38 = vector.broadcast %cst_14 : f32 to vector<256x32xf32>
    %39 = arith.addf %38, %37 : vector<256x32xf32>
    %40 = arith.mulf %39, %39 : vector<256x32xf32>
    %cst_15 = arith.constant 1.000000e+00 : f32
    %41 = vector.broadcast %cst_15 : f32 to vector<256x32xf32>
    %42 = arith.addf %40, %41 : vector<256x32xf32>
    %43 = tpu.reciprocal %42 {approx = true} : vector<256x32xf32> -> vector<256x32xf32>
    %cst_16 = arith.constant 2.000000e+00 : f32
    %44 = vector.broadcast %cst_16 : f32 to vector<256x32xf32>
    %45 = arith.mulf %44, %43 : vector<256x32xf32>
    %cst_17 = arith.constant 1.000000e+00 : f32
    %46 = vector.broadcast %cst_17 : f32 to vector<256x32xf32>
    %47 = arith.subf %46, %45 : vector<256x32xf32>
    %48 = arith.mulf %36, %47 : vector<256x32xf32>
    %49 = arith.truncf %48 : vector<256x32xf32> to vector<256x32xbf16>
    %50 = arith.index_cast %c0_i32 : i32 to index
    %c0_18 = arith.constant 0 : index
    %c0_19 = arith.constant 0 : index
    %51 = vector.load %arg5[%50, %c0_18, %c0_19] : memref<2x32x32xbf16, #tpu.memory_space<vmem>>, vector<1x32x32xbf16>
    %52 = vector.shape_cast %51 : vector<1x32x32xbf16> to vector<32x32xbf16>
    %cst_20 = arith.constant dense<0.000000e+00> : vector<256x32xf32>
    %53 = tpu.matmul %49, %52, %cst_20 {dimension_numbers = #tpu.dot_dimension_numbers<[1], [0], [0], [1], [0, 0, 1, 1], [], []>} : vector<256x32xbf16>, vector<32x32xbf16>, vector<256x32xf32> -> vector<256x32xf32>
    %54 = vector.extract_strided_slice %25 {offsets = [2, 0], sizes = [1, 32], strides = [1, 1]} : vector<4x32xf32> to vector<1x32xf32>
    %55 = vector.broadcast %54 : vector<1x32xf32> to vector<256x32xf32>
    %56 = arith.mulf %53, %55 : vector<256x32xf32>
    %57 = vector.extract_strided_slice %25 {offsets = [3, 0], sizes = [1, 32], strides = [1, 1]} : vector<4x32xf32> to vector<1x32xf32>
    %58 = vector.broadcast %57 : vector<1x32xf32> to vector<256x32xf32>
    %59 = arith.addf %56, %58 : vector<256x32xf32>
    %60 = arith.addf %59, %22 : vector<256x32xf32>
    %61 = math.exp %60 : vector<256x32xf32>
    %cst_21 = arith.constant 1.000000e+00 : f32
    %62 = vector.broadcast %cst_21 : f32 to vector<256x32xf32>
    %63 = arith.addf %62, %61 : vector<256x32xf32>
    %64 = arith.mulf %63, %63 : vector<256x32xf32>
    %cst_22 = arith.constant 1.000000e+00 : f32
    %65 = vector.broadcast %cst_22 : f32 to vector<256x32xf32>
    %66 = arith.addf %64, %65 : vector<256x32xf32>
    %67 = tpu.reciprocal %66 {approx = true} : vector<256x32xf32> -> vector<256x32xf32>
    %cst_23 = arith.constant 2.000000e+00 : f32
    %68 = vector.broadcast %cst_23 : f32 to vector<256x32xf32>
    %69 = arith.mulf %68, %67 : vector<256x32xf32>
    %cst_24 = arith.constant 1.000000e+00 : f32
    %70 = vector.broadcast %cst_24 : f32 to vector<256x32xf32>
    %71 = arith.subf %70, %69 : vector<256x32xf32>
    %72 = arith.mulf %60, %71 : vector<256x32xf32>
    %c1_i32 = arith.constant 1 : i32
    %73 = arith.index_cast %c1_i32 : i32 to index
    %c0_25 = arith.constant 0 : index
    %c0_26 = arith.constant 0 : index
    %74 = vector.load %arg6[%73, %c0_25, %c0_26] : memref<2x4x32xf32, #tpu.memory_space<vmem>>, vector<1x4x32xf32>
    %75 = vector.shape_cast %74 : vector<1x4x32xf32> to vector<4x32xf32>
    %76 = arith.truncf %72 : vector<256x32xf32> to vector<256x32xbf16>
    %77 = arith.index_cast %c1_i32 : i32 to index
    %c0_27 = arith.constant 0 : index
    %c0_28 = arith.constant 0 : index
    %78 = vector.load %arg4[%77, %c0_27, %c0_28] : memref<2x32x32xbf16, #tpu.memory_space<vmem>>, vector<1x32x32xbf16>
    %79 = vector.shape_cast %78 : vector<1x32x32xbf16> to vector<32x32xbf16>
    %cst_29 = arith.constant dense<0.000000e+00> : vector<256x32xf32>
    %80 = tpu.matmul %76, %79, %cst_29 {dimension_numbers = #tpu.dot_dimension_numbers<[1], [0], [0], [1], [0, 0, 1, 1], [], []>} : vector<256x32xbf16>, vector<32x32xbf16>, vector<256x32xf32> -> vector<256x32xf32>
    %81 = vector.extract_strided_slice %75 {offsets = [0, 0], sizes = [1, 32], strides = [1, 1]} : vector<4x32xf32> to vector<1x32xf32>
    %82 = vector.broadcast %81 : vector<1x32xf32> to vector<256x32xf32>
    %83 = arith.mulf %80, %82 : vector<256x32xf32>
    %84 = vector.extract_strided_slice %75 {offsets = [1, 0], sizes = [1, 32], strides = [1, 1]} : vector<4x32xf32> to vector<1x32xf32>
    %85 = vector.broadcast %84 : vector<1x32xf32> to vector<256x32xf32>
    %86 = arith.addf %83, %85 : vector<256x32xf32>
    %87 = math.exp %86 : vector<256x32xf32>
    %cst_30 = arith.constant 1.000000e+00 : f32
    %88 = vector.broadcast %cst_30 : f32 to vector<256x32xf32>
    %89 = arith.addf %88, %87 : vector<256x32xf32>
    %90 = arith.mulf %89, %89 : vector<256x32xf32>
    %cst_31 = arith.constant 1.000000e+00 : f32
    %91 = vector.broadcast %cst_31 : f32 to vector<256x32xf32>
    %92 = arith.addf %90, %91 : vector<256x32xf32>
    %93 = tpu.reciprocal %92 {approx = true} : vector<256x32xf32> -> vector<256x32xf32>
    %cst_32 = arith.constant 2.000000e+00 : f32
    %94 = vector.broadcast %cst_32 : f32 to vector<256x32xf32>
    %95 = arith.mulf %94, %93 : vector<256x32xf32>
    %cst_33 = arith.constant 1.000000e+00 : f32
    %96 = vector.broadcast %cst_33 : f32 to vector<256x32xf32>
    %97 = arith.subf %96, %95 : vector<256x32xf32>
    %98 = arith.mulf %86, %97 : vector<256x32xf32>
    %99 = arith.truncf %98 : vector<256x32xf32> to vector<256x32xbf16>
    %100 = arith.index_cast %c1_i32 : i32 to index
    %c0_34 = arith.constant 0 : index
    %c0_35 = arith.constant 0 : index
    %101 = vector.load %arg5[%100, %c0_34, %c0_35] : memref<2x32x32xbf16, #tpu.memory_space<vmem>>, vector<1x32x32xbf16>
    %102 = vector.shape_cast %101 : vector<1x32x32xbf16> to vector<32x32xbf16>
    %cst_36 = arith.constant dense<0.000000e+00> : vector<256x32xf32>
    %103 = tpu.matmul %99, %102, %cst_36 {dimension_numbers = #tpu.dot_dimension_numbers<[1], [0], [0], [1], [0, 0, 1, 1], [], []>} : vector<256x32xbf16>, vector<32x32xbf16>, vector<256x32xf32> -> vector<256x32xf32>
    %104 = vector.extract_strided_slice %75 {offsets = [2, 0], sizes = [1, 32], strides = [1, 1]} : vector<4x32xf32> to vector<1x32xf32>
    %105 = vector.broadcast %104 : vector<1x32xf32> to vector<256x32xf32>
    %106 = arith.mulf %103, %105 : vector<256x32xf32>
    %107 = vector.extract_strided_slice %75 {offsets = [3, 0], sizes = [1, 32], strides = [1, 1]} : vector<4x32xf32> to vector<1x32xf32>
    %108 = vector.broadcast %107 : vector<1x32xf32> to vector<256x32xf32>
    %109 = arith.addf %106, %108 : vector<256x32xf32>
    %110 = arith.addf %109, %72 : vector<256x32xf32>
    %111 = math.exp %110 : vector<256x32xf32>
    %cst_37 = arith.constant 1.000000e+00 : f32
    %112 = vector.broadcast %cst_37 : f32 to vector<256x32xf32>
    %113 = arith.addf %112, %111 : vector<256x32xf32>
    %114 = arith.mulf %113, %113 : vector<256x32xf32>
    %cst_38 = arith.constant 1.000000e+00 : f32
    %115 = vector.broadcast %cst_38 : f32 to vector<256x32xf32>
    %116 = arith.addf %114, %115 : vector<256x32xf32>
    %117 = tpu.reciprocal %116 {approx = true} : vector<256x32xf32> -> vector<256x32xf32>
    %cst_39 = arith.constant 2.000000e+00 : f32
    %118 = vector.broadcast %cst_39 : f32 to vector<256x32xf32>
    %119 = arith.mulf %118, %117 : vector<256x32xf32>
    %cst_40 = arith.constant 1.000000e+00 : f32
    %120 = vector.broadcast %cst_40 : f32 to vector<256x32xf32>
    %121 = arith.subf %120, %119 : vector<256x32xf32>
    %122 = arith.mulf %110, %121 : vector<256x32xf32>
    %c2_i32 = arith.constant 2 : i32
    %c0_41 = arith.constant 0 : index
    %c0_42 = arith.constant 0 : index
    %123 = vector.load %arg7[%c0_41, %c0_42] : memref<2x32xf32, #tpu.memory_space<vmem>>, vector<2x32xf32>
    %124 = vector.extract_strided_slice %123 {offsets = [0, 0], sizes = [1, 32], strides = [1, 1]} : vector<2x32xf32> to vector<1x32xf32>
    %125 = vector.broadcast %124 : vector<1x32xf32> to vector<256x32xf32>
    %126 = arith.mulf %122, %125 : vector<256x32xf32>
    %127 = vector.extract_strided_slice %123 {offsets = [1, 0], sizes = [1, 32], strides = [1, 1]} : vector<2x32xf32> to vector<1x32xf32>
    %128 = vector.broadcast %127 : vector<1x32xf32> to vector<256x32xf32>
    %129 = arith.addf %126, %128 : vector<256x32xf32>
    %130 = math.exp %129 : vector<256x32xf32>
    %cst_43 = arith.constant 1.000000e+00 : f32
    %131 = vector.broadcast %cst_43 : f32 to vector<256x32xf32>
    %132 = arith.addf %131, %130 : vector<256x32xf32>
    %133 = arith.mulf %132, %132 : vector<256x32xf32>
    %cst_44 = arith.constant 1.000000e+00 : f32
    %134 = vector.broadcast %cst_44 : f32 to vector<256x32xf32>
    %135 = arith.addf %133, %134 : vector<256x32xf32>
    %136 = tpu.reciprocal %135 {approx = true} : vector<256x32xf32> -> vector<256x32xf32>
    %cst_45 = arith.constant 2.000000e+00 : f32
    %137 = vector.broadcast %cst_45 : f32 to vector<256x32xf32>
    %138 = arith.mulf %137, %136 : vector<256x32xf32>
    %cst_46 = arith.constant 1.000000e+00 : f32
    %139 = vector.broadcast %cst_46 : f32 to vector<256x32xf32>
    %140 = arith.subf %139, %138 : vector<256x32xf32>
    %141 = arith.mulf %129, %140 : vector<256x32xf32>
    %142 = arith.truncf %141 : vector<256x32xf32> to vector<256x32xbf16>
    %c0_47 = arith.constant 0 : index
    %c0_48 = arith.constant 0 : index
    %143 = vector.load %arg8[%c0_47, %c0_48] : memref<32x128xbf16, #tpu.memory_space<vmem>>, vector<32x128xbf16>
    %cst_49 = arith.constant dense<0.000000e+00> : vector<256x128xf32>
    %144 = tpu.matmul %142, %143, %cst_49 {dimension_numbers = #tpu.dot_dimension_numbers<[1], [0], [0], [1], [0, 0, 1, 1], [], []>} : vector<256x32xbf16>, vector<32x128xbf16>, vector<256x128xf32> -> vector<256x128xf32>
    %c0_50 = arith.constant 0 : index
    %c0_51 = arith.constant 0 : index
    %145 = vector.load %arg9[%c0_50, %c0_51] : memref<1x128xf32, #tpu.memory_space<vmem>>, vector<1x128xf32>
    %146 = vector.broadcast %145 : vector<1x128xf32> to vector<256x128xf32>
    %147 = arith.addf %144, %146 : vector<256x128xf32>
    %c0_52 = arith.constant 0 : index
    %c0_53 = arith.constant 0 : index
    %148 = vector.load %arg10[%c0_52, %c0_53] : memref<256x128xf32, #tpu.memory_space<vmem>>, vector<256x128xf32>
    tpu.vector_store %arg10[%c0_52, %c0_53], %147 {strides = array<i32>} : memref<256x128xf32, #tpu.memory_space<vmem>>, vector<256x128xf32>,
    return
  }
  func.func @transform_0(%arg0: i32) -> (i32, i32) {
    %c0_i32 = arith.constant 0 : i32
    %c0_i32_0 = arith.constant 0 : i32
    return %arg0, %c0_i32 : i32, i32
  }
  func.func @transform_1(%arg0: i32) -> (i32, i32) {
    %c0_i32 = arith.constant 0 : i32
    %c0_i32_0 = arith.constant 0 : i32
    %c0_i32_1 = arith.constant 0 : i32
    return %c0_i32, %c0_i32_0 : i32, i32
  }
  func.func @transform_2(%arg0: i32) -> (i32, i32) {
    %c0_i32 = arith.constant 0 : i32
    %c0_i32_0 = arith.constant 0 : i32
    %c0_i32_1 = arith.constant 0 : i32
    return %c0_i32, %c0_i32_0 : i32, i32
  }
  func.func @transform_3(%arg0: i32) -> (i32, i32, i32) {
    %c0_i32 = arith.constant 0 : i32
    %c0_i32_0 = arith.constant 0 : i32
    %c0_i32_1 = arith.constant 0 : i32
    %c0_i32_2 = arith.constant 0 : i32
    return %c0_i32, %c0_i32_0, %c0_i32_1 : i32, i32, i32
  }
  func.func @transform_4(%arg0: i32) -> (i32, i32, i32) {
    %c0_i32 = arith.constant 0 : i32
    %c0_i32_0 = arith.constant 0 : i32
    %c0_i32_1 = arith.constant 0 : i32
    %c0_i32_2 = arith.constant 0 : i32
    return %c0_i32, %c0_i32_0, %c0_i32_1 : i32, i32, i32
  }
  func.func @transform_5(%arg0: i32) -> (i32, i32, i32) {
    %c0_i32 = arith.constant 0 : i32
    %c0_i32_0 = arith.constant 0 : i32
    %c0_i32_1 = arith.constant 0 : i32
    %c0_i32_2 = arith.constant 0 : i32
    return %c0_i32, %c0_i32_0, %c0_i32_1 : i32, i32, i32
  }
  func.func @transform_6(%arg0: i32) -> (i32, i32) {
    %c0_i32 = arith.constant 0 : i32
    %c0_i32_0 = arith.constant 0 : i32
    %c0_i32_1 = arith.constant 0 : i32
    return %c0_i32, %c0_i32_0 : i32, i32
  }
  func.func @transform_7(%arg0: i32) -> (i32, i32) {
    %c0_i32 = arith.constant 0 : i32
    %c0_i32_0 = arith.constant 0 : i32
    %c0_i32_1 = arith.constant 0 : i32
    return %c0_i32, %c0_i32_0 : i32, i32
  }
  func.func @transform_8(%arg0: i32) -> (i32, i32) {
    %c0_i32 = arith.constant 0 : i32
    %c0_i32_0 = arith.constant 0 : i32
    %c0_i32_1 = arith.constant 0 : i32
    return %c0_i32, %c0_i32_0 : i32, i32
  }
  func.func @transform_9(%arg0: i32) -> (i32, i32) {
    %c0_i32 = arith.constant 0 : i32
    %c0_i32_0 = arith.constant 0 : i32
    return %arg0, %c0_i32 : i32, i32
  }
}

</mosaic_0001>

<bundles_post_ra>
// kernel: _lambda_.1
= control target key start
LH: loop header
LB: loop body
LE: loop exit
PB: predicated region body
PF: predicated region fallthrough
CT: control target
= control target key end

     0   :  { %s4695_s30 = smov 0   ;;  %s6326_s0 = inlined_call_operand.vmem [shape: f32[512,36], index: 0, kind: input, shape index: {}]   ;;  %s6327_s1 = inlined_call_operand.vmem [shape: bf16[36,32], index: 1, kind: input, shape index: {}]   ;;  %s6328_s2 = inlined_call_operand.vmem [shape: f32[2,32], index: 2, kind: input, shape index: {}]   ;;  %s6329_s3 = inlined_call_operand.vmem [shape: bf16[2,32,32], index: 3, kind: input, shape index: {}]   ;;  %s6330_s4 = inlined_call_operand.vmem [shape: bf16[2,32,32], index: 4, kind: input, shape index: {}]   ;;  %s6331_s5 = inlined_call_operand.vmem [shape: f32[2,4,32], index: 5, kind: input, shape index: {}]   ;;  %s6332_s6 = inlined_call_operand.vmem [shape: f32[2,32], index: 6, kind: input, shape index: {}]   ;;  %s6333_s7 = inlined_call_operand.vmem [shape: bf16[32,128], index: 7, kind: input, shape index: {}]   ;;  %s6334_s8 = inlined_call_operand.vmem [shape: f32[1,128], index: 8, kind: input, shape index: {}]   ;;  %s6335_s9 = inlined_call_operand.vmem [shape: f32[512,128], index: 9, kind: output, shape index: {}]  }
   0x1 LB: > { %s3680_s10 = sadd.s32 4294967295, %s4643_s30   ;;  %p3684_p0 = scmp.ge.s32.totalorder %s4643_s30, 1  ;;  %s4643_s30 = sphi %s4695_s30, %s19_s30  }
   0x2   : > { %p288_p1 = scmp.lt.s32.totalorder %s4643_s30, 3 }
   0x4   : > { %p289_p2 = pnand %p3684_p0, %p288_p1 }
   0x6   : > { %292 = sbr.rel (%p289_p2) target bundleno = 1313 (0x521), region = 56 }
   0xb   : > { %v390_v0 = vld [vmem:[%s6327_s1 + $0x10] sm:$0x3]  ;;  %s3685_s13 = sshll.u32 %s3680_s10, 5  ;;  %vm455_vm0 = vcmask 1041408   ;;  %v3845_v4 = vld [vmem:[%s6327_s1 + $0x8] sm:$0xff]  ;;  %v3844_v5 = vld [vmem:[%s6327_s1] sm:$0xff] }
   0xc   : > { %v400_v1 = vunpack.c.l.b16 %v390_v0  ;;  %p325_p3 = scmp.lt.s32.totalorder %s3685_s13, 63  ;;  %vm406_vm1 = vcmask 293888   ;;  %v3849_v18 = vld [vmem:[%s6330_s4 + $0x8] sm:$0xff]  ;;  %v337_v31 = vld [vmem:[%s6328_s2] sm:$0x3]  ;;  %vm935_vm2 = vcmask 261120  }
   0xd   : > { %3858 = vmatpush.bf16.msra.mxu2 %v3849_v18  ;;  %v4754_v34 = vperm.slane %v337_v31, 0  ;;  %v4756_v35 = vperm.slane %v337_v31, 1  ;;  %v3847_v39 = vld [vmem:[%s6329_s3 + $0x8] sm:$0xff]  ;;  %v3846_v42 = vld [vmem:[%s6329_s3] sm:$0xff] }
   0xe   : > { %v403_v2 = vpack.c.b16 %v400_v1, %v400_v1  ;;  %s6340_s13 = smov (!%p325_p3, %s3685_s13), 63  ;;  %990 = vmatpush.bf16.msra.mxu1 %v3847_v39  ;;  %3856 = vmatpush.bf16.msra.mxu3 %v3847_v39 }
   0xf   : > { %s3686_s14 = sshll.u32 %s6340_s13, 3 }
  0x10   : > { %v457_v3 = vsel %vm455_vm0, %v403_v2, 0  ;;  %s4717_s19 = scalar_lea.vmem %s6326_s0, %s3686_s14  ;;  %s6129_s18 = scalar_lea.vmem %s6335_s9, %s3686_s14 }
  0x11   : > { %464 = vmatpush.bf16.msra.mxu0 %v457_v3  ;;  %v338_v6 = vld [vmem:[%s4717_s19] sm:$0xff]  ;;  %v339_v7 = vld [vmem:[%s4717_s19 + $0x8] sm:$0xff]  ;;  %v340_v9 = vld [vmem:[%s4717_s19 + $0x10] sm:$0xff] }
  0x12   : > { %v370_v8 = vpack.c.bf16 %v339_v7, %v338_v6  ;;  %v341_v10 = vld [vmem:[%s4717_s19 + $0x18] sm:$0xff]  ;;  %v342_v12 = vld [vmem:[%s4717_s19 + $0x20] sm:$0xff]  ;;  %v343_v13 = vld [vmem:[%s4717_s19 + $0x28] sm:$0xff]  ;;  %991 = vmatpush.bf16.msra.mxu1 %v3846_v42  ;;  %3857 = vmatpush.bf16.msra.mxu3 %v3846_v42 }
  0x13   : > { %v371_v11 = vpack.c.bf16 %v341_v10, %v340_v9  ;;  %v372_v14 = vpack.c.bf16 %v343_v13, %v342_v12  ;;  %v344_v15 = vld [vmem:[%s4717_s19 + $0x30] sm:$0xff]  ;;  %v345_v16 = vld [vmem:[%s4717_s19 + $0x38] sm:$0xff]  ;;  %v346_v19 = vld [vmem:[%s4717_s19 + $0x40] sm:$0xff] }
  0x14   : > { %v373_v17 = vpack.c.bf16 %v345_v16, %v344_v15  ;;  %v347_v20 = vld [vmem:[%s4717_s19 + $0x48] sm:$0xff]  ;;  %v348_v22 = vld [vmem:[%s4717_s19 + $0x50] sm:$0xff]  ;;  %v349_v23 = vld [vmem:[%s4717_s19 + $0x58] sm:$0xff] }
  0x15   : > { %465 = vmatpush.bf16.msra.mxu0 %v3845_v4  ;;  %v374_v21 = vpack.c.bf16 %v347_v20, %v346_v19  ;;  %v375_v24 = vpack.c.bf16 %v349_v23, %v348_v22  ;;  %v350_v25 = vld [vmem:[%s4717_s19 + $0x60] sm:$0xff]  ;;  %v351_v26 = vld [vmem:[%s4717_s19 + $0x68] sm:$0xff]  ;;  %v352_v28 = vld [vmem:[%s4717_s19 + $0x70] sm:$0xff] }
  0x16   : > { %v376_v27 = vpack.c.bf16 %v351_v26, %v350_v25  ;;  %v353_v29 = vld [vmem:[%s4717_s19 + $0x78] sm:$0xff]  ;;  %v354_v32 = vld [vmem:[%s4717_s19 + $0x80] sm:$0xff]  ;;  %v355_v33 = vld [vmem:[%s4717_s19 + $0x88] sm:$0xff] }
  0x17   : > { %v377_v30 = vpack.c.bf16 %v353_v29, %v352_v28  ;;  %v378_v36 = vpack.c.bf16 %v355_v33, %v354_v32  ;;  %v356_v46 = vld [vmem:[%s4717_s19 + $0x90] sm:$0xff]  ;;  %v357_v47 = vld [vmem:[%s4717_s19 + $0x98] sm:$0xff]  ;;  %v358_v2 = vld [vmem:[%s4717_s19 + $0xa0] sm:$0xff] }
  0x18   : > { %v379_v51 = vpack.c.bf16 %v357_v47, %v356_v46  ;;  %v359_v3 = vld [vmem:[%s4717_s19 + $0xa8] sm:$0xff]  ;;  %v361_v31 = vld [vmem:[%s4717_s19 + $0xb8] sm:$0xff] }
  0x19   : > { %466 = vmatpush.bf16.msra.mxu0 %v3844_v5 }
  0x1c   : > { %3697 = vmatmul.msk.bf16.vlgmr.msra.gmra.mxu0 %vm406_vm1, %v370_v8  ;;  %v380_v8 = vpack.c.bf16 %v359_v3, %v358_v2 }
  0x1d   : > { %1513 = vmatpush.bf16.msrb.mxu0 %v3849_v18 }
  0x2c   : > { %3698 = vmatmul.msk.bf16.gmra.mxu0 %vm406_vm1, %v371_v11 }
  0x3c   : > { %3699 = vmatmul.msk.bf16.gmra.mxu0 %vm406_vm1, %v372_v14 }
  0x4c   : > { %3700 = vmatmul.msk.bf16.gmra.mxu0 %vm406_vm1, %v373_v17 }
  0x5c   : > { %3701 = vmatmul.msk.bf16.gmra.mxu0 %vm406_vm1, %v374_v21 }
  0x6c   : > { %3702 = vmatmul.msk.bf16.gmra.mxu0 %vm406_vm1, %v375_v24 }
  0x7c   : > { %3703 = vmatmul.msk.bf16.gmra.mxu0 %vm406_vm1, %v376_v27 }
  0x8c   : > { %3704 = vmatmul.msk.bf16.gmra.mxu0 %vm406_vm1, %v377_v30  ;;  %v360_v30 = vld [vmem:[%s4717_s19 + $0xb0] sm:$0xff] }
  0x99   : > { %v468_v37 = vpop.f32.mrf.mxu0 }
  0x9a   : > { %v549_v38 = vmul.f32 %v4754_v34, %v468_v37 }
  0x9c   : > { %v582_v40 = vadd.f32 %v4756_v35, %v549_v38  ;;  %3705 = vmatmul.msk.bf16.gmra.mxu0 %vm406_vm1, %v378_v36  ;;  %v381_v38 = vpack.c.bf16 %v361_v31, %v360_v30 }
  0x9e   : > { %v614_v41 = vmul.f32 1.442695, %v582_v40 }
  0xa0   : > { %3869 = vpow2.f32 %v614_v41 }
  0xa1   : > { %v470_v43 = vpop.f32.mrf.mxu0 }
  0xa2   : > { %v550_v44 = vmul.f32 %v4754_v34, %v470_v43 }
  0xa4   : > { %v583_v45 = vadd.f32 %v4756_v35, %v550_v44 }
  0xa6   : > { %v3870_v48 = vpop.eup %3869  ;;  %v616_v49 = vmul.f32 1.442695, %v583_v45 }
  0xa7   : > { %v678_v50 = vadd.f32 1.0, %v3870_v48 }
  0xa8   : > { %3871 = vpow2.f32 %v616_v49 }
  0xa9   : > { %v710_v52 = vmul.f32 %v678_v50, %v678_v50  ;;  %v473_v53 = vpop.f32.mrf.mxu0 }
  0xaa   : > { %v551_v54 = vmul.f32 %v4754_v34, %v473_v53 }
  0xab   : > { %v742_v55 = vadd.f32 1.0, %v710_v52 }
  0xac   : > { %v4773_v56 = vadd.f32 %v4756_v35, %v551_v54  ;;  %3706 = vmatmul.msk.bf16.gmra.mxu0 %vm406_vm1, %v379_v51 }
  0xad   : > { %3873 = vrcp.f32 %v742_v55 }
  0xae   : > { %v3872_v57 = vpop.eup %3871  ;;  %v618_v58 = vmul.f32 1.442695, %v4773_v56 }
  0xaf   : > { %v679_v59 = vadd.f32 1.0, %v3872_v57 }
  0xb0   : > { %3875 = vpow2.f32 %v618_v58 }
  0xb1   : > { %v711_v60 = vmul.f32 %v679_v59, %v679_v59  ;;  %v475_v61 = vpop.f32.mrf.mxu0 }
  0xb2   : > { %v552_v62 = vmul.f32 %v4754_v34, %v475_v61  ;;  %v362_v61 = vld [vmem:[%s4717_s19 + $0xc0] sm:$0xff] }
  0xb3   : > { %v743_v63 = vadd.f32 1.0, %v711_v60  ;;  %v3874_v1 = vpop.eup %3873 }
  0xb4   : > { %v585_v0 = vadd.f32 %v4756_v35, %v552_v62  ;;  %v806_v7 = vmul.f32 2.0, %v3874_v1 }
  0xb5   : > { %3877 = vrcp.f32 %v743_v63 }
  0xb6   : > { %v3876_v4 = vpop.eup %3875  ;;  %v620_v5 = vmul.f32 1.442695, %v585_v0  ;;  %v838_v14 = vsub.f32 1.0, %v806_v7 }
  0xb7   : > { %v680_v6 = vadd.f32 1.0, %v3876_v4 }
  0xb8   : > { %3879 = vpow2.f32 %v620_v5  ;;  %v4787_v21 = vmul.f32 %v838_v14, %v582_v40 }
  0xb9   : > { %v712_v9 = vmul.f32 %v680_v6, %v680_v6  ;;  %v478_v10 = vpop.f32.mrf.mxu0 }
  0xba   : > { %v553_v11 = vmul.f32 %v4754_v34, %v478_v10 }
  0xbb   : > { %v3878_v12 = vpop.eup %3877  ;;  %v744_v13 = vadd.f32 1.0, %v712_v9 }
  0xbc   : > { %v807_v15 = vmul.f32 2.0, %v3878_v12  ;;  %v4783_v16 = vadd.f32 %v4756_v35, %v553_v11  ;;  %3707 = vmatmul.msk.bf16.gmra.mxu0 %vm406_vm1, %v380_v8 }
  0xbd   : > { %3881 = vrcp.f32 %v744_v13 }
  0xbe   : > { %v3880_v17 = vpop.eup %3879  ;;  %v839_v18 = vsub.f32 1.0, %v807_v15  ;;  %v622_v19 = vmul.f32 1.442695, %v4783_v16 }
  0xbf   : > { %v681_v20 = vadd.f32 1.0, %v3880_v17 }
  0xc0   : > { %v4789_v22 = vmul.f32 %v839_v18, %v583_v45  ;;  %3883 = vpow2.f32 %v622_v19 }
  0xc1   : > { %v713_v23 = vmul.f32 %v681_v20, %v681_v20  ;;  %v480_v24 = vpop.f32.mrf.mxu0 }
  0xc2   : > { %v554_v25 = vmul.f32 %v4754_v34, %v480_v24  ;;  %v903_v26 = vpack.c.bf16 %v4789_v22, %v4787_v21 }
  0xc3   : > { %v745_v27 = vadd.f32 1.0, %v713_v23  ;;  %v3882_v29 = vpop.eup %3881 }
  0xc4   : > { %v587_v28 = vadd.f32 %v4756_v35, %v554_v25  ;;  %3721 = vmatmul.msk.bf16.vlgmr.msra.gmra.mxu1 %vm935_vm2, %v903_v26  ;;  %v808_v37 = vmul.f32 2.0, %v3882_v29 }
  0xc5   : > { %3885 = vrcp.f32 %v745_v27  ;;  %v365_v27 = vld [vmem:[%s4717_s19 + $0xd8] sm:$0xff] }
  0xc6   : > { %v3884_v32 = vpop.eup %3883  ;;  %v624_v33 = vmul.f32 1.442695, %v587_v28  ;;  %v840_v44 = vsub.f32 1.0, %v808_v37 }
  0xc7   : > { %v682_v36 = vadd.f32 1.0, %v3884_v32 }
  0xc8   : > { %3887 = vpow2.f32 %v624_v33  ;;  %v4805_v51 = vmul.f32 %v840_v44, %v4773_v56  ;;  %v363_v56 = vld [vmem:[%s4717_s19 + $0xc8] sm:$0xff] }
  0xc9   : > { %v714_v39 = vmul.f32 %v682_v36, %v682_v36  ;;  %v483_v40 = vpop.f32.mrf.mxu0  ;;  %v382_v2 = vpack.c.bf16 %v363_v56, %v362_v61  ;;  %v367_v61 = vld [vmem:[%s4717_s19 + $0xe8] sm:$0xff] }
  0xca   : > { %v555_v41 = vmul.f32 %v4754_v34, %v483_v40 }
  0xcb   : > { %v3886_v42 = vpop.eup %3885  ;;  %v746_v43 = vadd.f32 1.0, %v714_v39 }
  0xcc   : > { %v809_v45 = vmul.f32 2.0, %v3886_v42  ;;  %v4800_v46 = vadd.f32 %v4756_v35, %v555_v41  ;;  %3708 = vmatmul.msk.bf16.gmra.mxu0 %vm406_vm1, %v381_v38 }
  0xcd   : > { %3889 = vrcp.f32 %v746_v43 }
  0xce   : > { %v3888_v47 = vpop.eup %3887  ;;  %v841_v48 = vsub.f32 1.0, %v809_v45  ;;  %v626_v49 = vmul.f32 1.442695, %v4800_v46 }
  0xcf   : > { %v683_v50 = vadd.f32 1.0, %v3888_v47 }
  0xd0   : > { %v4807_v52 = vmul.f32 %v841_v48, %v585_v0  ;;  %3891 = vpow2.f32 %v626_v49 }
  0xd1   : > { %v715_v53 = vmul.f32 %v683_v50, %v683_v50  ;;  %v485_v54 = vpop.f32.mrf.mxu0  ;;  %v3848_v50 = vld [vmem:[%s6330_s4] sm:$0xff] }
  0xd2   : > { %v556_v55 = vmul.f32 %v4754_v34, %v485_v54  ;;  %v904_v57 = vpack.c.bf16 %v4807_v52, %v4805_v51  ;;  %1514 = vmatpush.bf16.msrb.mxu0 %v3848_v50  ;;  %3859 = vmatpush.bf16.msra.mxu2 %v3848_v50 }
  0xd3   : > { %v747_v58 = vadd.f32 1.0, %v715_v53  ;;  %v3890_v60 = vpop.eup %3889 }
  0xd4   : > { %v589_v59 = vadd.f32 %v4756_v35, %v556_v55  ;;  %3722 = vmatmul.msk.bf16.gmra.mxu1 %vm935_vm2, %v904_v57  ;;  %v810_v1 = vmul.f32 2.0, %v3890_v60  ;;  %v366_v60 = vld [vmem:[%s4717_s19 + $0xe0] sm:$0xff] }
  0xd5   : > { %3893 = vrcp.f32 %v747_v58 }
  0xd6   : > { %v3892_v62 = vpop.eup %3891  ;;  %v628_v63 = vmul.f32 1.442695, %v589_v59  ;;  %v842_v8 = vsub.f32 1.0, %v810_v1  ;;  %v384_v1 = vpack.c.bf16 %v367_v61, %v366_v60 }
  0xd7   : > { %v684_v0 = vadd.f32 1.0, %v3892_v62 }
  0xd8   : > { %3895 = vpow2.f32 %v628_v63  ;;  %v4823_v15 = vmul.f32 %v842_v8, %v4783_v16  ;;  %v364_v16 = vld [vmem:[%s4717_s19 + $0xd0] sm:$0xff] }
  0xd9   : > { %v716_v3 = vmul.f32 %v684_v0, %v684_v0  ;;  %v488_v4 = vpop.f32.mrf.mxu0  ;;  %v383_v32 = vpack.c.bf16 %v365_v27, %v364_v16 }
  0xda   : > { %v557_v5 = vmul.f32 %v4754_v34, %v488_v4 }
  0xdb   : > { %v3894_v6 = vpop.eup %3893  ;;  %v748_v7 = vadd.f32 1.0, %v716_v3 }
  0xdc   : > { %v811_v9 = vmul.f32 2.0, %v3894_v6  ;;  %v4818_v10 = vadd.f32 %v4756_v35, %v557_v5  ;;  %3709 = vmatmul.msk.bf16.gmra.mxu0 %vm406_vm1, %v382_v2 }
  0xdd   : > { %3897 = vrcp.f32 %v748_v7 }
  0xde   : > { %v3896_v11 = vpop.eup %3895  ;;  %v843_v12 = vsub.f32 1.0, %v811_v9  ;;  %v630_v13 = vmul.f32 1.442695, %v4818_v10 }
  0xdf   : > { %v685_v14 = vadd.f32 1.0, %v3896_v11 }
  0xe0   : > { %v4825_v17 = vmul.f32 %v843_v12, %v587_v28  ;;  %3899 = vpow2.f32 %v630_v13 }
  0xe1   : > { %v717_v18 = vmul.f32 %v685_v14, %v685_v14  ;;  %v490_v19 = vpop.f32.mrf.mxu0 }
  0xe2   : > { %v558_v20 = vmul.f32 %v4754_v34, %v490_v19  ;;  %v905_v23 = vpack.c.bf16 %v4825_v17, %v4823_v15 }
  0xe3   : > { %v749_v24 = vadd.f32 1.0, %v717_v18  ;;  %v3898_v26 = vpop.eup %3897 }
  0xe4   : > { %v4831_v25 = vadd.f32 %v4756_v35, %v558_v20  ;;  %3723 = vmatmul.msk.bf16.gmra.mxu1 %vm935_vm2, %v905_v23  ;;  %v812_v31 = vmul.f32 2.0, %v3898_v26 }
  0xe5   : > { %3901 = vrcp.f32 %v749_v24 }
  0xe6   : > { %v3900_v28 = vpop.eup %3899  ;;  %v632_v29 = vmul.f32 1.442695, %v4831_v25  ;;  %v844_v40 = vsub.f32 1.0, %v812_v31 }
  0xe7   : > { %v686_v30 = vadd.f32 1.0, %v3900_v28 }
  0xe8   : > { %3903 = vpow2.f32 %v632_v29  ;;  %v4844_v48 = vmul.f32 %v844_v40, %v4800_v46  ;;  %v369_v29 = vld [vmem:[%s4717_s19 + $0xf8] sm:$0xff] }
  0xe9   : > { %v718_v33 = vmul.f32 %v686_v30, %v686_v30  ;;  %v493_v36 = vpop.f32.mrf.mxu0 }
  0xea   : > { %v559_v37 = vmul.f32 %v4754_v34, %v493_v36 }
  0xeb   : > { %v3902_v38 = vpop.eup %3901  ;;  %v750_v39 = vadd.f32 1.0, %v718_v33 }
  0xec   : > { %v813_v41 = vmul.f32 2.0, %v3902_v38  ;;  %v4839_v42 = vadd.f32 %v4756_v35, %v559_v37  ;;  %3710 = vmatmul.msk.bf16.gmra.mxu0 %vm406_vm1, %v383_v32 }
  0xed   : > { %3905 = vrcp.f32 %v750_v39 }
  0xee   : > { %v3904_v43 = vpop.eup %3903  ;;  %v845_v44 = vsub.f32 1.0, %v813_v41  ;;  %v634_v45 = vmul.f32 1.442695, %v4839_v42 }
  0xef   : > { %v687_v47 = vadd.f32 1.0, %v3904_v43 }
  0xf0   : > { %v4846_v49 = vmul.f32 %v845_v44, %v589_v59  ;;  %3907 = vpow2.f32 %v634_v45 }
  0xf1   : > { %v719_v53 = vmul.f32 %v687_v47, %v687_v47  ;;  %v495_v54 = vpop.f32.mrf.mxu0 }
  0xf2   : > { %v560_v55 = vmul.f32 %v4754_v34, %v495_v54  ;;  %v906_v57 = vpack.c.bf16 %v4846_v49, %v4844_v48 }
  0xf3   : > { %v751_v58 = vadd.f32 1.0, %v719_v53  ;;  %v3906_v59 = vpop.eup %3905 }
  0xf4   : > { %v593_v46 = vadd.f32 %v4756_v35, %v560_v55  ;;  %3724 = vmatmul.msk.bf16.gmra.mxu1 %vm935_vm2, %v906_v57  ;;  %v814_v0 = vmul.f32 2.0, %v3906_v59 }
  0xf5   : > { %3909 = vrcp.f32 %v751_v58 }
  0xf6   : > { %v3908_v56 = vpop.eup %3907  ;;  %v636_v62 = vmul.f32 1.442695, %v593_v46  ;;  %v846_v7 = vsub.f32 1.0, %v814_v0 }
  0xf7   : > { %v688_v63 = vadd.f32 1.0, %v3908_v56 }
  0xf8   : > { %3911 = vpow2.f32 %v636_v62  ;;  %v4865_v18 = vmul.f32 %v846_v7, %v4818_v10  ;;  %v368_v10 = vld [vmem:[%s4717_s19 + $0xf0] sm:$0xff] }
  0xf9   : > { %v720_v2 = vmul.f32 %v688_v63, %v688_v63  ;;  %v498_v3 = vpop.f32.mrf.mxu0  ;;  %v385_v33 = vpack.c.bf16 %v369_v29, %v368_v10 }
  0xfa   : > { %v561_v4 = vmul.f32 %v4754_v34, %v498_v3 }
  0xfb   : > { %v3910_v5 = vpop.eup %3909  ;;  %v752_v6 = vadd.f32 1.0, %v720_v2 }
  0xfc   : > { %v815_v8 = vmul.f32 2.0, %v3910_v5  ;;  %v4860_v9 = vadd.f32 %v4756_v35, %v561_v4  ;;  %3711 = vmatmul.msk.bf16.gmra.mxu0 %vm406_vm1, %v384_v1 }
  0xfd   : > { %3913 = vrcp.f32 %v752_v6 }
  0xfe   : > { %v3912_v11 = vpop.eup %3911  ;;  %v847_v12 = vsub.f32 1.0, %v815_v8  ;;  %v638_v13 = vmul.f32 1.442695, %v4860_v9 }
  0xff   : > { %v689_v14 = vadd.f32 1.0, %v3912_v11 }
 0x100   : > { %v4868_v19 = vmul.f32 %v847_v12, %v4831_v25  ;;  %3915 = vpow2.f32 %v638_v13 }
 0x101   : > { %v721_v20 = vmul.f32 %v689_v14, %v689_v14  ;;  %v500_v23 = vpop.f32.mrf.mxu0 }
 0x102   : > { %v562_v24 = vmul.f32 %v4754_v34, %v500_v23  ;;  %v907_v26 = vpack.c.bf16 %v4868_v19, %v4865_v18 }
 0x103   : > { %v753_v16 = vadd.f32 1.0, %v721_v20  ;;  %v3914_v28 = vpop.eup %3913 }
 0x104   : > { %v595_v27 = vadd.f32 %v4756_v35, %v562_v24  ;;  %3725 = vmatmul.msk.bf16.gmra.mxu1 %vm935_vm2, %v907_v26  ;;  %v816_v32 = vmul.f32 2.0, %v3914_v28 }
 0x105   : > { %3917 = vrcp.f32 %v753_v16 }
 0x106   : > { %v3916_v30 = vpop.eup %3915  ;;  %v640_v25 = vmul.f32 1.442695, %v595_v27  ;;  %v848_v41 = vsub.f32 1.0, %v816_v32 }
 0x107   : > { %v690_v31 = vadd.f32 1.0, %v3916_v30 }
 0x108   : > { %3919 = vpow2.f32 %v640_v25  ;;  %v4884_v54 = vmul.f32 %v848_v41, %v4839_v42 }
 0x109   : > { %v722_v36 = vmul.f32 %v690_v31, %v690_v31  ;;  %v503_v37 = vpop.f32.mrf.mxu0 }
 0x10a   : > { %v563_v38 = vmul.f32 %v4754_v34, %v503_v37 }
 0x10b   : > { %v3918_v39 = vpop.eup %3917  ;;  %v754_v40 = vadd.f32 1.0, %v722_v36 }
 0x10c   : > { %v817_v43 = vmul.f32 2.0, %v3918_v39  ;;  %v4879_v44 = vadd.f32 %v4756_v35, %v563_v38  ;;  %3712 = vmatmul.msk.bf16.gmra.mxu0 %vm406_vm1, %v385_v33 }
 0x10d   : > { %3921 = vrcp.f32 %v754_v40 }
 0x10e   : > { %v3920_v45 = vpop.eup %3919  ;;  %v849_v47 = vsub.f32 1.0, %v817_v43  ;;  %v642_v50 = vmul.f32 1.442695, %v4879_v44 }
 0x10f   : > { %v691_v53 = vadd.f32 1.0, %v3920_v45 }
 0x110   : > { %v4886_v55 = vmul.f32 %v849_v47, %v593_v46  ;;  %3923 = vpow2.f32 %v642_v50 }
 0x111   : > { %v723_v57 = vmul.f32 %v691_v53, %v691_v53  ;;  %v505_v58 = vpop.f32.mrf.mxu0 }
 0x112   : > { %v564_v59 = vmul.f32 %v4754_v34, %v505_v58  ;;  %v908_v60 = vpack.c.bf16 %v4886_v55, %v4884_v54 }
 0x113   : > { %v755_v61 = vadd.f32 1.0, %v723_v57  ;;  %v3922_v62 = vpop.eup %3921 }
 0x114   : > { %v597_v56 = vadd.f32 %v4756_v35, %v564_v59  ;;  %3726 = vmatmul.msk.bf16.gmra.mxu1 %vm935_vm2, %v908_v60  ;;  %v818_v46 = vmul.f32 2.0, %v3922_v62 }
 0x115   : > { %3925 = vrcp.f32 %v755_v61 }
 0x116   : > { %v3924_v63 = vpop.eup %3923  ;;  %v644_v42 = vmul.f32 1.442695, %v597_v56  ;;  %v850_v6 = vsub.f32 1.0, %v818_v46 }
 0x117   : > { %v692_v0 = vadd.f32 1.0, %v3924_v63 }
 0x118   : > { %3927 = vpow2.f32 %v644_v42  ;;  %v4899_v20 = vmul.f32 %v850_v6, %v4860_v9  ;;  %v4930_v6 = vld [vmem:[%s6331_s5] sm:$0xf] }
 0x119   : > { %v724_v1 = vmul.f32 %v692_v0, %v692_v0  ;;  %v508_v2 = vpop.f32.mrf.mxu0 }
 0x11a   : > { %v565_v3 = vmul.f32 %v4754_v34, %v508_v2 }
 0x11b   : > { %v3926_v4 = vpop.eup %3925  ;;  %v756_v5 = vadd.f32 1.0, %v724_v1 }
 0x11c   : > { %v819_v7 = vmul.f32 2.0, %v3926_v4  ;;  %v4895_v8 = vadd.f32 %v4756_v35, %v565_v3 }
 0x11d   : > { %3929 = vrcp.f32 %v756_v5 }
 0x11e   : > { %v3928_v11 = vpop.eup %3927  ;;  %v851_v12 = vsub.f32 1.0, %v819_v7  ;;  %v646_v13 = vmul.f32 1.442695, %v4895_v8 }
 0x11f   : > { %v693_v14 = vadd.f32 1.0, %v3928_v11 }
 0x120   : > { %v4901_v23 = vmul.f32 %v851_v12, %v595_v27  ;;  %3931 = vpow2.f32 %v646_v13 }
 0x121   : > { %v725_v24 = vmul.f32 %v693_v14, %v693_v14  ;;  %v510_v26 = vpop.f32.mrf.mxu0 }
 0x122   : > { %v566_v16 = vmul.f32 %v4754_v34, %v510_v26  ;;  %v909_v28 = vpack.c.bf16 %v4901_v23, %v4899_v20  ;;  %v4937_v26 = vperm.slane %v4930_v6, 0 }
 0x123   : > { %v757_v10 = vadd.f32 1.0, %v725_v24  ;;  %v3930_v30 = vpop.eup %3929 }
 0x124   : > { %v599_v29 = vadd.f32 %v4756_v35, %v566_v16  ;;  %3727 = vmatmul.msk.bf16.gmra.mxu1 %vm935_vm2, %v909_v28  ;;  %v820_v27 = vmul.f32 2.0, %v3930_v30  ;;  %v4945_v30 = vperm.slane %v4930_v6, 1 }
 0x125   : > { %3933 = vrcp.f32 %v757_v10 }
 0x126   : > { %v3932_v25 = vpop.eup %3931  ;;  %v648_v9 = vmul.f32 1.442695, %v599_v29  ;;  %v852_v39 = vsub.f32 1.0, %v820_v27 }
 0x127   : > { %v694_v31 = vadd.f32 1.0, %v3932_v25 }
 0x128   : > { %3935 = vpow2.f32 %v648_v9  ;;  %v4914_v53 = vmul.f32 %v852_v39, %v4879_v44 }
 0x129   : > { %v726_v32 = vmul.f32 %v694_v31, %v694_v31  ;;  %v513_v33 = vpop.f32.mrf.mxu0 }
 0x12a   : > { %v567_v36 = vmul.f32 %v4754_v34, %v513_v33 }
 0x12b   : > { %v3934_v37 = vpop.eup %3933  ;;  %v758_v38 = vadd.f32 1.0, %v726_v32 }
 0x12c   : > { %v821_v40 = vmul.f32 2.0, %v3934_v37  ;;  %v4910_v41 = vadd.f32 %v4756_v35, %v567_v36 }
 0x12d   : > { %3937 = vrcp.f32 %v758_v38 }
 0x12e   : > { %v3936_v43 = vpop.eup %3935  ;;  %v853_v45 = vsub.f32 1.0, %v821_v40  ;;  %v650_v47 = vmul.f32 1.442695, %v4910_v41 }
 0x12f   : > { %v695_v50 = vadd.f32 1.0, %v3936_v43 }
 0x130   : > { %v4916_v57 = vmul.f32 %v853_v45, %v597_v56  ;;  %3939 = vpow2.f32 %v650_v47 }
 0x131   : > { %v727_v58 = vmul.f32 %v695_v50, %v695_v50  ;;  %v515_v59 = vpop.f32.mrf.mxu0 }
 0x132   : > { %v568_v60 = vmul.f32 %v4754_v34, %v515_v59  ;;  %v910_v61 = vpack.c.bf16 %v4916_v57, %v4914_v53 }
 0x133   : > { %v759_v62 = vadd.f32 1.0, %v727_v58  ;;  %v3938_v42 = vpop.eup %3937 }
 0x134   : > { %v4922_v63 = vadd.f32 %v4756_v35, %v568_v60  ;;  %3728 = vmatmul.msk.bf16.gmra.mxu1 %vm935_vm2, %v910_v61  ;;  %v822_v46 = vmul.f32 2.0, %v3938_v42 }
 0x135   : > { %3941 = vrcp.f32 %v759_v62 }
 0x136   : > { %v3940_v44 = vpop.eup %3939  ;;  %v652_v56 = vmul.f32 1.442695, %v4922_v63  ;;  %v854_v7 = vsub.f32 1.0, %v822_v46 }
 0x137   : > { %v696_v0 = vadd.f32 1.0, %v3940_v44 }
 0x138   : > { %3943 = vpow2.f32 %v652_v56  ;;  %v4940_v28 = vmul.f32 %v854_v7, %v4895_v8 }
 0x139   : > { %v728_v1 = vmul.f32 %v696_v0, %v696_v0  ;;  %v518_v2 = vpop.f32.mrf.mxu0 }
 0x13a   : > { %v569_v3 = vmul.f32 %v4754_v34, %v518_v2 }
 0x13b   : > { %v3942_v4 = vpop.eup %3941  ;;  %v760_v5 = vadd.f32 1.0, %v728_v1 }
 0x13c   : > { %v823_v11 = vmul.f32 2.0, %v3942_v4  ;;  %v4933_v12 = vadd.f32 %v4756_v35, %v569_v3 }
 0x13d   : > { %3945 = vrcp.f32 %v760_v5 }
 0x13e   : > { %v3944_v13 = vpop.eup %3943  ;;  %v855_v14 = vsub.f32 1.0, %v823_v11  ;;  %v654_v24 = vmul.f32 1.442695, %v4933_v12 }
 0x13f   : > { %v697_v16 = vadd.f32 1.0, %v3944_v13 }
 0x140   : > { %v4942_v10 = vmul.f32 %v855_v14, %v599_v29  ;;  %3947 = vpow2.f32 %v654_v24 }
 0x141   : > { %v729_v25 = vmul.f32 %v697_v16, %v697_v16  ;;  %v520_v9 = vpop.f32.mrf.mxu0  ;;  %v993_v31 = vpop.f32.mrf.mxu1 }
 0x142   : > { %v570_v27 = vmul.f32 %v4754_v34, %v520_v9  ;;  %v1074_v32 = vmul.f32 %v4937_v26, %v993_v31  ;;  %v911_v33 = vpack.c.bf16 %v4942_v10, %v4940_v28 }
 0x143   : > { %v761_v36 = vadd.f32 1.0, %v729_v25  ;;  %v3946_v37 = vpop.eup %3945 }
 0x144   : > { %v4952_v8 = vadd.f32 %v4756_v35, %v570_v27  ;;  %v4955_v29 = vadd.f32 %v4945_v30, %v1074_v32  ;;  %3729 = vmatmul.msk.bf16.gmra.mxu1 %vm935_vm2, %v911_v33  ;;  %v824_v45 = vmul.f32 2.0, %v3946_v37 }
 0x145   : > { %3949 = vrcp.f32 %v761_v36 }
 0x146   : > { %v3948_v38 = vpop.eup %3947  ;;  %v656_v39 = vmul.f32 1.442695, %v4952_v8  ;;  %v1139_v40 = vmul.f32 1.442695, %v4955_v29  ;;  %v856_v42 = vsub.f32 1.0, %v824_v45 }
 0x147   : > { %v698_v43 = vadd.f32 1.0, %v3948_v38 }
 0x148   : > { %3951 = vpow2.f32 %v656_v39  ;;  %v4971_v7 = vmul.f32 %v856_v42, %v4910_v41 }
 0x149   : > { %v730_v47 = vmul.f32 %v698_v43, %v698_v43  ;;  %3953 = vpow2.f32 %v1139_v40  ;;  %v523_v50 = vpop.f32.mrf.mxu0  ;;  %v995_v58 = vpop.f32.mrf.mxu1 }
 0x14a   : > { %v571_v59 = vmul.f32 %v4754_v34, %v523_v50  ;;  %v1075_v60 = vmul.f32 %v4937_v26, %v995_v58 }
 0x14b   : > { %v3950_v61 = vpop.eup %3949  ;;  %v762_v62 = vadd.f32 1.0, %v730_v47 }
 0x14c   : > { %v825_v44 = vmul.f32 2.0, %v3950_v61  ;;  %v4963_v56 = vadd.f32 %v4756_v35, %v571_v59  ;;  %v4966_v0 = vadd.f32 %v4945_v30, %v1075_v60 }
 0x14d   : > { %3955 = vrcp.f32 %v762_v62 }
 0x14e   : > { %v3952_v46 = vpop.eup %3951  ;;  %v857_v1 = vsub.f32 1.0, %v825_v44  ;;  %v658_v2 = vmul.f32 1.442695, %v4963_v56  ;;  %v1141_v3 = vmul.f32 1.442695, %v4966_v0 }
 0x14f   : > { %v3954_v4 = vpop.eup %3953  ;;  %v699_v5 = vadd.f32 1.0, %v3952_v46 }
 0x150   : > { %v4974_v11 = vmul.f32 %v857_v1, %v4922_v63  ;;  %v1203_v13 = vadd.f32 1.0, %v3954_v4  ;;  %3957 = vpow2.f32 %v658_v2 }
 0x151   : > { %v731_v14 = vmul.f32 %v699_v5, %v699_v5  ;;  %3959 = vpow2.f32 %v1141_v3  ;;  %v525_v24 = vpop.f32.mrf.mxu0  ;;  %v998_v16 = vpop.f32.mrf.mxu1 }
 0x152   : > { %v1235_v25 = vmul.f32 %v1203_v13, %v1203_v13  ;;  %v572_v9 = vmul.f32 %v4754_v34, %v525_v24  ;;  %v1076_v31 = vmul.f32 %v4937_v26, %v998_v16  ;;  %v912_v27 = vpack.c.bf16 %v4974_v11, %v4971_v7 }
 0x153   : > { %v763_v32 = vadd.f32 1.0, %v731_v14  ;;  %v3956_v41 = vpop.eup %3955 }
 0x154   : > { %v1267_v33 = vadd.f32 1.0, %v1235_v25  ;;  %v4981_v63 = vadd.f32 %v4756_v35, %v572_v9  ;;  %v4984_v36 = vadd.f32 %v4945_v30, %v1076_v31  ;;  %3730 = vmatmul.msk.bf16.vlgmr.msra.gmra.mxu3 %vm935_vm2, %v912_v27  ;;  %v826_v43 = vmul.f32 2.0, %v3956_v41 }
 0x155   : > { %3961 = vrcp.f32 %v763_v32 }
 0x156   : > { %v3958_v37 = vpop.eup %3957  ;;  %v660_v38 = vmul.f32 1.442695, %v4981_v63  ;;  %v1143_v39 = vmul.f32 1.442695, %v4984_v36  ;;  %3963 = vrcp.f32 %v1267_v33  ;;  %v858_v44 = vsub.f32 1.0, %v826_v43 }
 0x157   : > { %v3960_v40 = vpop.eup %3959  ;;  %v700_v45 = vadd.f32 1.0, %v3958_v37 }
 0x158   : > { %v1204_v47 = vadd.f32 1.0, %v3960_v40  ;;  %3965 = vpow2.f32 %v660_v38  ;;  %v5000_v31 = vmul.f32 %v858_v44, %v4933_v12 }
 0x159   : > { %v732_v50 = vmul.f32 %v700_v45, %v700_v45  ;;  %3967 = vpow2.f32 %v1143_v39  ;;  %v528_v58 = vpop.f32.mrf.mxu0  ;;  %v1000_v59 = vpop.f32.mrf.mxu1 }
 0x15a   : > { %v1236_v60 = vmul.f32 %v1204_v47, %v1204_v47  ;;  %v573_v61 = vmul.f32 %v4754_v34, %v528_v58  ;;  %v1077_v62 = vmul.f32 %v4937_v26, %v1000_v59 }
 0x15b   : > { %v3962_v42 = vpop.eup %3961  ;;  %v764_v46 = vadd.f32 1.0, %v732_v50 }
 0x15c   : > { %v827_v1 = vmul.f32 2.0, %v3962_v42  ;;  %v1268_v2 = vadd.f32 1.0, %v1236_v60  ;;  %v4992_v3 = vadd.f32 %v4756_v35, %v573_v61  ;;  %v4995_v4 = vadd.f32 %v4945_v30, %v1077_v62  ;;  %v3964_v5 = vpop.eup %3963 }
 0x15d   : > { %3969 = vrcp.f32 %v764_v46  ;;  %v1331_v41 = vmul.f32 2.0, %v3964_v5 }
 0x15e   : > { %v3966_v13 = vpop.eup %3965  ;;  %v859_v14 = vsub.f32 1.0, %v827_v1  ;;  %3971 = vrcp.f32 %v1268_v2  ;;  %v662_v24 = vmul.f32 1.442695, %v4992_v3  ;;  %v1145_v16 = vmul.f32 1.442695, %v4995_v4 }
 0x15f   : > { %v3968_v25 = vpop.eup %3967  ;;  %v701_v9 = vadd.f32 1.0, %v3966_v13  ;;  %v1363_v60 = vsub.f32 1.0, %v1331_v41 }
 0x160   : > { %v5003_v27 = vmul.f32 %v859_v14, %v4952_v8  ;;  %v1205_v32 = vadd.f32 1.0, %v3968_v25  ;;  %3973 = vpow2.f32 %v662_v24 }
 0x161   : > { %v733_v33 = vmul.f32 %v701_v9, %v701_v9  ;;  %3975 = vpow2.f32 %v1145_v16  ;;  %v530_v37 = vpop.f32.mrf.mxu0  ;;  %v1003_v38 = vpop.f32.mrf.mxu1  ;;  %v1395_v14 = vmul.f32 %v1363_v60, %v4955_v29 }
 0x162   : > { %v1237_v39 = vmul.f32 %v1205_v32, %v1205_v32  ;;  %v574_v40 = vmul.f32 %v4754_v34, %v530_v37  ;;  %v1078_v43 = vmul.f32 %v4937_v26, %v1003_v38  ;;  %v913_v45 = vpack.c.bf16 %v5003_v27, %v5000_v31 }
 0x163   : > { %v3970_v12 = vpop.eup %3969  ;;  %v765_v47 = vadd.f32 1.0, %v733_v33 }
 0x164   : > { %v3972_v50 = vpop.eup %3971  ;;  %v1269_v8 = vadd.f32 1.0, %v1237_v39  ;;  %v5010_v58 = vadd.f32 %v4756_v35, %v574_v40  ;;  %v5013_v59 = vadd.f32 %v4945_v30, %v1078_v43  ;;  %3731 = vmatmul.msk.bf16.gmra.mxu3 %vm935_vm2, %v913_v45  ;;  %v828_v1 = vmul.f32 2.0, %v3970_v12 }
 0x165   : > { %v1332_v61 = vmul.f32 2.0, %v3972_v50  ;;  %3977 = vrcp.f32 %v765_v47 }
 0x166   : > { %v3974_v62 = vpop.eup %3973  ;;  %v664_v42 = vmul.f32 1.442695, %v5010_v58  ;;  %v1147_v44 = vmul.f32 1.442695, %v5013_v59  ;;  %3979 = vrcp.f32 %v1269_v8  ;;  %v860_v38 = vsub.f32 1.0, %v828_v1 }
 0x167   : > { %v3976_v46 = vpop.eup %3975  ;;  %v1364_v2 = vsub.f32 1.0, %v1332_v61  ;;  %v702_v5 = vadd.f32 1.0, %v3974_v62 }
 0x168   : > { %v1206_v13 = vadd.f32 1.0, %v3976_v46  ;;  %3981 = vpow2.f32 %v664_v42  ;;  %v5032_v42 = vmul.f32 %v860_v38, %v4963_v56 }
 0x169   : > { %v1396_v24 = vmul.f32 %v1364_v2, %v4966_v0  ;;  %v734_v16 = vmul.f32 %v702_v5, %v702_v5  ;;  %3983 = vpow2.f32 %v1147_v44  ;;  %v533_v25 = vpop.f32.mrf.mxu0  ;;  %v1005_v9 = vpop.f32.mrf.mxu1 }
 0x16a   : > { %v1238_v32 = vmul.f32 %v1206_v13, %v1206_v13  ;;  %v575_v41 = vmul.f32 %v4754_v34, %v533_v25  ;;  %v1079_v33 = vmul.f32 %v4937_v26, %v1005_v9 }
 0x16b   : > { %v3978_v37 = vpop.eup %3977  ;;  %v1427_v39 = vpack.c.bf16 %v1396_v24, %v1395_v14  ;;  %v766_v40 = vadd.f32 1.0, %v734_v16 }
 0x16c   : > { %v829_v43 = vmul.f32 2.0, %v3978_v37  ;;  %v1270_v45 = vadd.f32 1.0, %v1238_v32  ;;  %v5023_v12 = vadd.f32 %v4756_v35, %v575_v41  ;;  %v5026_v29 = vadd.f32 %v4945_v30, %v1079_v33  ;;  %v3980_v0 = vpop.eup %3979 }
 0x16d   : > { %3985 = vrcp.f32 %v766_v40  ;;  %3745 = vmatmul.msk.bf16.vlgmr.msrb.gmra.mxu0 %vm935_vm2, %v1427_v39  ;;  %v1333_v1 = vmul.f32 2.0, %v3980_v0 }
 0x16e   : > { %v3982_v47 = vpop.eup %3981  ;;  %v861_v50 = vsub.f32 1.0, %v829_v43  ;;  %3987 = vrcp.f32 %v1270_v45  ;;  %v666_v8 = vmul.f32 1.442695, %v5023_v12  ;;  %v1149_v60 = vmul.f32 1.442695, %v5026_v29 }
 0x16f   : > { %v3984_v61 = vpop.eup %3983  ;;  %v703_v62 = vadd.f32 1.0, %v3982_v47  ;;  %v1365_v37 = vsub.f32 1.0, %v1333_v1 }
 0x170   : > { %v5035_v44 = vmul.f32 %v861_v50, %v4981_v63  ;;  %v1207_v46 = vadd.f32 1.0, %v3984_v61  ;;  %3989 = vpow2.f32 %v666_v8 }
 0x171   : > { %v735_v2 = vmul.f32 %v703_v62, %v703_v62  ;;  %3991 = vpow2.f32 %v1149_v60  ;;  %v535_v5 = vpop.f32.mrf.mxu0  ;;  %v1008_v13 = vpop.f32.mrf.mxu1  ;;  %v1397_v60 = vmul.f32 %v1365_v37, %v4984_v36 }
 0x172   : > { %v1239_v14 = vmul.f32 %v1207_v46, %v1207_v46  ;;  %v576_v24 = vmul.f32 %v4754_v34, %v535_v5  ;;  %v1080_v16 = vmul.f32 %v4937_v26, %v1008_v13  ;;  %v914_v25 = vpack.c.bf16 %v5035_v44, %v5032_v42 }
 0x173   : > { %v3986_v56 = vpop.eup %3985  ;;  %v767_v9 = vadd.f32 1.0, %v735_v2 }
 0x174   : > { %v3988_v32 = vpop.eup %3987  ;;  %v1271_v63 = vadd.f32 1.0, %v1239_v14  ;;  %v5042_v41 = vadd.f32 %v4756_v35, %v576_v24  ;;  %v5045_v33 = vadd.f32 %v4945_v30, %v1080_v16  ;;  %3732 = vmatmul.msk.bf16.gmra.mxu3 %vm935_vm2, %v914_v25  ;;  %v830_v0 = vmul.f32 2.0, %v3986_v56 }
 0x175   : > { %v1334_v38 = vmul.f32 2.0, %v3988_v32  ;;  %3993 = vrcp.f32 %v767_v9 }
 0x176   : > { %v3990_v39 = vpop.eup %3989  ;;  %v668_v40 = vmul.f32 1.442695, %v5042_v41  ;;  %v1151_v43 = vmul.f32 1.442695, %v5045_v33  ;;  %3995 = vrcp.f32 %v1271_v63  ;;  %v862_v24 = vsub.f32 1.0, %v830_v0 }
 0x177   : > { %v3992_v45 = vpop.eup %3991  ;;  %v1366_v47 = vsub.f32 1.0, %v1334_v38  ;;  %v704_v50 = vadd.f32 1.0, %v3990_v39 }
 0x178   : > { %v1208_v8 = vadd.f32 1.0, %v3992_v45  ;;  %3997 = vpow2.f32 %v668_v40  ;;  %v5064_v45 = vmul.f32 %v862_v24, %v4992_v3 }
 0x179   : > { %v1398_v61 = vmul.f32 %v1366_v47, %v4995_v4  ;;  %v736_v62 = vmul.f32 %v704_v50, %v704_v50  ;;  %3999 = vpow2.f32 %v1151_v43  ;;  %v538_v46 = vpop.f32.mrf.mxu0  ;;  %v1010_v1 = vpop.f32.mrf.mxu1 }
 0x17a   : > { %v1240_v2 = vmul.f32 %v1208_v8, %v1208_v8  ;;  %v577_v5 = vmul.f32 %v4754_v34, %v538_v46  ;;  %v1081_v13 = vmul.f32 %v4937_v26, %v1010_v1 }
 0x17b   : > { %v3994_v14 = vpop.eup %3993  ;;  %v768_v16 = vadd.f32 1.0, %v736_v62  ;;  %v1428_v25 = vpack.c.bf16 %v1398_v61, %v1397_v60 }
 0x17c   : > { %v831_v56 = vmul.f32 2.0, %v3994_v14  ;;  %v1272_v9 = vadd.f32 1.0, %v1240_v2  ;;  %v5055_v32 = vadd.f32 %v4756_v35, %v577_v5  ;;  %v5058_v36 = vadd.f32 %v4945_v30, %v1081_v13  ;;  %v3996_v4 = vpop.eup %3995 }
 0x17d   : > { %4001 = vrcp.f32 %v768_v16  ;;  %3746 = vmatmul.msk.bf16.gmra.mxu0 %vm935_vm2, %v1428_v25  ;;  %v1335_v50 = vmul.f32 2.0, %v3996_v4 }
 0x17e   : > { %v3998_v63 = vpop.eup %3997  ;;  %v863_v37 = vsub.f32 1.0, %v831_v56  ;;  %4003 = vrcp.f32 %v1272_v9  ;;  %v670_v38 = vmul.f32 1.442695, %v5055_v32  ;;  %v1153_v39 = vmul.f32 1.442695, %v5058_v36 }
 0x17f   : > { %v4000_v40 = vpop.eup %3999  ;;  %v705_v43 = vadd.f32 1.0, %v3998_v63  ;;  %v1367_v16 = vsub.f32 1.0, %v1335_v50 }
 0x180   : > { %v5067_v0 = vmul.f32 %v863_v37, %v5010_v58  ;;  %v1209_v47 = vadd.f32 1.0, %v4000_v40  ;;  %4005 = vpow2.f32 %v670_v38 }
 0x181   : > { %v737_v8 = vmul.f32 %v705_v43, %v705_v43  ;;  %4007 = vpow2.f32 %v1153_v39  ;;  %v540_v60 = vpop.f32.mrf.mxu0  ;;  %v1013_v61 = vpop.f32.mrf.mxu1  ;;  %v1399_v43 = vmul.f32 %v1367_v16, %v5013_v59 }
 0x182   : > { %v1241_v62 = vmul.f32 %v1209_v47, %v1209_v47  ;;  %v578_v46 = vmul.f32 %v4754_v34, %v540_v60  ;;  %v1082_v1 = vmul.f32 %v4937_v26, %v1013_v61  ;;  %v915_v2 = vpack.c.bf16 %v5067_v0, %v5064_v45 }
 0x183   : > { %v4002_v3 = vpop.eup %4001  ;;  %v769_v5 = vadd.f32 1.0, %v737_v8 }
 0x184   : > { %v4004_v13 = vpop.eup %4003  ;;  %v1273_v58 = vadd.f32 1.0, %v1241_v62  ;;  %v5074_v14 = vadd.f32 %v4756_v35, %v578_v46  ;;  %v5077_v24 = vadd.f32 %v4945_v30, %v1082_v1  ;;  %3733 = vmatmul.msk.bf16.gmra.mxu3 %vm935_vm2, %v915_v2  ;;  %v832_v37 = vmul.f32 2.0, %v4002_v3 }
 0x185   : > { %v1336_v25 = vmul.f32 2.0, %v4004_v13  ;;  %4009 = vrcp.f32 %v769_v5 }
 0x186   : > { %v4006_v56 = vpop.eup %4005  ;;  %v672_v9 = vmul.f32 1.442695, %v5074_v14  ;;  %v1155_v4 = vmul.f32 1.442695, %v5077_v24  ;;  %4011 = vrcp.f32 %v1273_v58  ;;  %v864_v2 = vsub.f32 1.0, %v832_v37 }
 0x187   : > { %v4008_v63 = vpop.eup %4007  ;;  %v1368_v38 = vsub.f32 1.0, %v1336_v25  ;;  %v706_v39 = vadd.f32 1.0, %v4006_v56 }
 0x188   : > { %v1210_v40 = vadd.f32 1.0, %v4008_v63  ;;  %4013 = vpow2.f32 %v672_v9 }
 0x189   : > { %v1400_v47 = vmul.f32 %v1368_v38, %v5026_v29  ;;  %v738_v8 = vmul.f32 %v706_v39, %v706_v39  ;;  %4015 = vpow2.f32 %v1155_v4  ;;  %v543_v50 = vpop.f32.mrf.mxu0  ;;  %v1015_v60 = vpop.f32.mrf.mxu1  ;;  %v5096_v38 = vmul.f32 %v864_v2, %v5023_v12 }
 0x18a   : > { %v1242_v61 = vmul.f32 %v1210_v40, %v1210_v40  ;;  %v579_v62 = vmul.f32 %v4754_v34, %v543_v50  ;;  %v1083_v46 = vmul.f32 %v4937_v26, %v1015_v60 }
 0x18b   : > { %v4010_v1 = vpop.eup %4009  ;;  %v770_v3 = vadd.f32 1.0, %v738_v8  ;;  %v1429_v5 = vpack.c.bf16 %v1400_v47, %v1399_v43 }
 0x18c   : > { %v833_v13 = vmul.f32 2.0, %v4010_v1  ;;  %v1274_v58 = vadd.f32 1.0, %v1242_v61  ;;  %v5087_v25 = vadd.f32 %v4756_v35, %v579_v62  ;;  %v5090_v59 = vadd.f32 %v4945_v30, %v1083_v46  ;;  %v4012_v29 = vpop.eup %4011 }
 0x18d   : > { %3747 = vmatmul.msk.bf16.gmra.mxu0 %vm935_vm2, %v1429_v5  ;;  %v1337_v43 = vmul.f32 2.0, %v4012_v29 }
 0x18e   : > { %v4014_v16 = vpop.eup %4013  ;;  %v865_v56 = vsub.f32 1.0, %v833_v13  ;;  %4017 = vrcp.f32 %v1274_v58  ;;  %v674_v9 = vmul.f32 1.442695, %v5087_v25  ;;  %v1157_v4 = vmul.f32 1.442695, %v5090_v59 }
 0x18f   : > { %v4016_v63 = vpop.eup %4015  ;;  %4019 = vrcp.f32 %v770_v3  ;;  %v707_v37 = vadd.f32 1.0, %v4014_v16  ;;  %v1369_v13 = vsub.f32 1.0, %v1337_v43 }
 0x190   : > { %v5099_v39 = vmul.f32 %v865_v56, %v5042_v41  ;;  %v1211_v40 = vadd.f32 1.0, %v4016_v63  ;;  %4021 = vpow2.f32 %v674_v9 }
 0x191   : > { %v739_v47 = vmul.f32 %v707_v37, %v707_v37  ;;  %4023 = vpow2.f32 %v1157_v4  ;;  %v545_v8 = vpop.f32.mrf.mxu0  ;;  %v1018_v50 = vpop.f32.mrf.mxu1  ;;  %v1401_v37 = vmul.f32 %v1369_v13, %v5045_v33 }
 0x192   : > { %v1243_v60 = vmul.f32 %v1211_v40, %v1211_v40  ;;  %v580_v61 = vmul.f32 %v4754_v34, %v545_v8  ;;  %v1084_v62 = vmul.f32 %v4937_v26, %v1018_v50  ;;  %v916_v46 = vpack.c.bf16 %v5099_v39, %v5096_v38 }
 0x193   : > { %v771_v12 = vadd.f32 1.0, %v739_v47 }
 0x194   : > { %v4018_v1 = vpop.eup %4017  ;;  %v1275_v2 = vadd.f32 1.0, %v1243_v60  ;;  %v5106_v41 = vadd.f32 %v4756_v35, %v580_v61  ;;  %v5109_v3 = vadd.f32 %v4945_v30, %v1084_v62  ;;  %3734 = vmatmul.msk.bf16.gmra.mxu3 %vm935_vm2, %v916_v46 }
 0x195   : > { %v4020_v5 = vpop.eup %4019  ;;  %v1338_v58 = vmul.f32 2.0, %v4018_v1  ;;  %4025 = vrcp.f32 %v771_v12 }
 0x196   : > { %v4022_v34 = vpop.eup %4021  ;;  %v676_v29 = vmul.f32 1.442695, %v5106_v41  ;;  %v1159_v16 = vmul.f32 1.442695, %v5109_v3  ;;  %4027 = vrcp.f32 %v1275_v2  ;;  %v834_v35 = vmul.f32 2.0, %v4020_v5 }
 0x197   : > { %v4024_v56 = vpop.eup %4023  ;;  %v1370_v9 = vsub.f32 1.0, %v1338_v58  ;;  %v708_v4 = vadd.f32 1.0, %v4022_v34 }
 0x198   : > { %v1212_v63 = vadd.f32 1.0, %v4024_v56  ;;  %4029 = vpow2.f32 %v676_v29  ;;  %v866_v46 = vsub.f32 1.0, %v834_v35 }
 0x199   : > { %v1402_v40 = vmul.f32 %v1370_v9, %v5058_v36  ;;  %v740_v47 = vmul.f32 %v708_v4, %v708_v4  ;;  %4031 = vpow2.f32 %v1159_v16  ;;  %v1020_v43 = vpop.f32.mrf.mxu1 }
 0x19a   : > { %v1244_v8 = vmul.f32 %v1212_v63, %v1212_v63  ;;  %v1085_v50 = vmul.f32 %v4937_v26, %v1020_v43  ;;  %v5123_v29 = vmul.f32 %v866_v46, %v5055_v32 }
 0x19b   : > { %v4026_v60 = vpop.eup %4025  ;;  %v772_v61 = vadd.f32 1.0, %v740_v47  ;;  %v1430_v62 = vpack.c.bf16 %v1402_v40, %v1401_v37 }
 0x19c   : > { %v835_v12 = vmul.f32 2.0, %v4026_v60  ;;  %v1276_v1 = vadd.f32 1.0, %v1244_v8  ;;  %v5118_v2 = vadd.f32 %v4945_v30, %v1085_v50  ;;  %v4028_v5 = vpop.eup %4027 }
 0x19d   : > { %3748 = vmatmul.msk.bf16.gmra.mxu0 %vm935_vm2, %v1430_v62  ;;  %v1339_v9 = vmul.f32 2.0, %v4028_v5 }
 0x19e   : > { %v4030_v33 = vpop.eup %4029  ;;  %v867_v36 = vsub.f32 1.0, %v835_v12  ;;  %4033 = vrcp.f32 %v1276_v1  ;;  %v1161_v13 = vmul.f32 1.442695, %v5118_v2 }
 0x19f   : > { %v4032_v58 = vpop.eup %4031  ;;  %4035 = vrcp.f32 %v772_v61  ;;  %v709_v34 = vadd.f32 1.0, %v4030_v33  ;;  %v1371_v50 = vsub.f32 1.0, %v1339_v9 }
 0x1a0   : > { %v5126_v16 = vmul.f32 %v867_v36, %v5074_v14  ;;  %v1213_v56 = vadd.f32 1.0, %v4032_v58  ;;  %4037 = vpow2.f32 %v1161_v13 }
 0x1a1   : > { %v741_v4 = vmul.f32 %v709_v34, %v709_v34  ;;  %v1023_v35 = vpop.f32.mrf.mxu1  ;;  %v1403_v5 = vmul.f32 %v1371_v50, %v5077_v24  ;;  %v3851_v50 = vld [vmem:[%s6329_s3 + $0x18] sm:$0xff] }
 0x1a2   : > { %v1245_v63 = vmul.f32 %v1213_v56, %v1213_v56  ;;  %v1086_v37 = vmul.f32 %v4937_v26, %v1023_v35  ;;  %v917_v40 = vpack.c.bf16 %v5126_v16, %v5123_v29  ;;  %2071 = vmatpush.bf16.msrb.mxu3 %v3851_v50 }
 0x1a3   : > { %v773_v47 = vadd.f32 1.0, %v741_v4 }
 0x1a4   : > { %v4034_v43 = vpop.eup %4033  ;;  %v1277_v8 = vadd.f32 1.0, %v1245_v63  ;;  %v5132_v32 = vadd.f32 %v4945_v30, %v1086_v37  ;;  %3735 = vmatmul.msk.bf16.gmra.mxu3 %vm935_vm2, %v917_v40 }
 0x1a5   : > { %v4036_v14 = vpop.eup %4035  ;;  %v1340_v60 = vmul.f32 2.0, %v4034_v43  ;;  %4039 = vrcp.f32 %v773_v47 }
 0x1a6   : > { %v4038_v61 = vpop.eup %4037  ;;  %v1163_v62 = vmul.f32 1.442695, %v5132_v32  ;;  %4041 = vrcp.f32 %v1277_v8  ;;  %v836_v1 = vmul.f32 2.0, %v4036_v14 }
 0x1a7   : > { %v1372_v46 = vsub.f32 1.0, %v1340_v60  ;;  %v1214_v12 = vadd.f32 1.0, %v4038_v61 }
 0x1a8   : > { %4043 = vpow2.f32 %v1163_v62  ;;  %v868_v4 = vsub.f32 1.0, %v836_v1 }
 0x1a9   : > { %v1404_v33 = vmul.f32 %v1372_v46, %v5090_v59  ;;  %v1246_v36 = vmul.f32 %v1214_v12, %v1214_v12  ;;  %v1025_v13 = vpop.f32.mrf.mxu1 }
 0x1aa   : > { %v1087_v58 = vmul.f32 %v4937_v26, %v1025_v13  ;;  %v5142_v59 = vmul.f32 %v868_v4, %v5087_v25 }
 0x1ab   : > { %v4040_v34 = vpop.eup %4039  ;;  %v1278_v56 = vadd.f32 1.0, %v1246_v36  ;;  %v1431_v9 = vpack.c.bf16 %v1404_v33, %v1403_v5 }
 0x1ac   : > { %v837_v35 = vmul.f32 2.0, %v4040_v34  ;;  %v1120_v63 = vadd.f32 %v4945_v30, %v1087_v58  ;;  %v4042_v37 = vpop.eup %4041 }
 0x1ad   : > { %4045 = vrcp.f32 %v1278_v56  ;;  %3749 = vmatmul.msk.bf16.gmra.mxu0 %vm935_vm2, %v1431_v9  ;;  %v1341_v14 = vmul.f32 2.0, %v4042_v37 }
 0x1ae   : > { %v4044_v40 = vpop.eup %4043  ;;  %v869_v47 = vsub.f32 1.0, %v837_v35  ;;  %v1165_v24 = vmul.f32 1.442695, %v1120_v63 }
 0x1af   : > { %v1215_v43 = vadd.f32 1.0, %v4044_v40  ;;  %v1373_v1 = vsub.f32 1.0, %v1341_v14 }
 0x1b0   : > { %v5145_v8 = vmul.f32 %v869_v47, %v5106_v41  ;;  %4047 = vpow2.f32 %v1165_v24 }
 0x1b1   : > { %v1247_v60 = vmul.f32 %v1215_v43, %v1215_v43  ;;  %v1028_v61 = vpop.f32.mrf.mxu1  ;;  %v1405_v34 = vmul.f32 %v1373_v1, %v5109_v3 }
 0x1b2   : > { %v1088_v62 = vmul.f32 %v4937_v26, %v1028_v61  ;;  %v918_v46 = vpack.c.bf16 %v5145_v8, %v5142_v59 }
 0x1b3   : > { %v4046_v12 = vpop.eup %4045  ;;  %v1279_v25 = vadd.f32 1.0, %v1247_v60 }
 0x1b4   : > { %v1342_v5 = vmul.f32 2.0, %v4046_v12  ;;  %v5154_v41 = vadd.f32 %v4945_v30, %v1088_v62  ;;  %3736 = vmatmul.msk.bf16.gmra.mxu3 %vm935_vm2, %v918_v46 }
 0x1b5   : > { %4049 = vrcp.f32 %v1279_v25 }
 0x1b6   : > { %v4048_v33 = vpop.eup %4047  ;;  %v1374_v36 = vsub.f32 1.0, %v1342_v5  ;;  %v1167_v13 = vmul.f32 1.442695, %v5154_v41 }
 0x1b7   : > { %v1216_v58 = vadd.f32 1.0, %v4048_v33 }
 0x1b8   : > { %v1406_v56 = vmul.f32 %v1374_v36, %v5118_v2  ;;  %4051 = vpow2.f32 %v1167_v13 }
 0x1b9   : > { %v1248_v9 = vmul.f32 %v1216_v58, %v1216_v58  ;;  %v1030_v4 = vpop.f32.mrf.mxu1 }
 0x1ba   : > { %v1089_v35 = vmul.f32 %v4937_v26, %v1030_v4  ;;  %v1432_v37 = vpack.c.bf16 %v1406_v56, %v1405_v34 }
 0x1bb   : > { %v1280_v40 = vadd.f32 1.0, %v1248_v9  ;;  %v4050_v24 = vpop.eup %4049 }
 0x1bc   : > { %v1122_v47 = vadd.f32 %v4945_v30, %v1089_v35  ;;  %v1343_v60 = vmul.f32 2.0, %v4050_v24 }
 0x1bd   : > { %4053 = vrcp.f32 %v1280_v40  ;;  %3750 = vmatmul.msk.bf16.gmra.mxu0 %vm935_vm2, %v1432_v37 }
 0x1be   : > { %v4052_v43 = vpop.eup %4051  ;;  %v1169_v14 = vmul.f32 1.442695, %v1122_v47  ;;  %v1375_v12 = vsub.f32 1.0, %v1343_v60 }
 0x1bf   : > { %v1217_v50 = vadd.f32 1.0, %v4052_v43 }
 0x1c0   : > { %4055 = vpow2.f32 %v1169_v14  ;;  %v1407_v58 = vmul.f32 %v1375_v12, %v5132_v32 }
 0x1c1   : > { %v1249_v3 = vmul.f32 %v1217_v50, %v1217_v50  ;;  %v1033_v2 = vpop.f32.mrf.mxu1 }
 0x1c2   : > { %v1090_v61 = vmul.f32 %v4937_v26, %v1033_v2 }
 0x1c3   : > { %v4054_v62 = vpop.eup %4053  ;;  %v1281_v46 = vadd.f32 1.0, %v1249_v3 }
 0x1c4   : > { %v1344_v25 = vmul.f32 2.0, %v4054_v62  ;;  %v1123_v1 = vadd.f32 %v4945_v30, %v1090_v61 }
 0x1c5   : > { %4057 = vrcp.f32 %v1281_v46 }
 0x1c6   : > { %v4056_v5 = vpop.eup %4055  ;;  %v1376_v33 = vsub.f32 1.0, %v1344_v25  ;;  %v1171_v36 = vmul.f32 1.442695, %v1123_v1 }
 0x1c7   : > { %v1218_v13 = vadd.f32 1.0, %v4056_v5 }
 0x1c8   : > { %v1408_v34 = vmul.f32 %v1376_v33, %v1120_v63  ;;  %4059 = vpow2.f32 %v1171_v36 }
 0x1c9   : > { %v1250_v56 = vmul.f32 %v1218_v13, %v1218_v13  ;;  %v1035_v9 = vpop.f32.mrf.mxu1 }
 0x1ca   : > { %v1091_v4 = vmul.f32 %v4937_v26, %v1035_v9  ;;  %v1433_v35 = vpack.c.bf16 %v1408_v34, %v1407_v58 }
 0x1cb   : > { %v1282_v37 = vadd.f32 1.0, %v1250_v56  ;;  %v4058_v24 = vpop.eup %4057 }
 0x1cc   : > { %v1124_v40 = vadd.f32 %v4945_v30, %v1091_v4  ;;  %v1345_v60 = vmul.f32 2.0, %v4058_v24 }
 0x1cd   : > { %4061 = vrcp.f32 %v1282_v37  ;;  %3751 = vmatmul.msk.bf16.gmra.mxu0 %vm935_vm2, %v1433_v35 }
 0x1ce   : > { %v4060_v43 = vpop.eup %4059  ;;  %v1173_v14 = vmul.f32 1.442695, %v1124_v40  ;;  %v1377_v2 = vsub.f32 1.0, %v1345_v60 }
 0x1cf   : > { %v1219_v50 = vadd.f32 1.0, %v4060_v43 }
 0x1d0   : > { %4063 = vpow2.f32 %v1173_v14  ;;  %v1409_v5 = vmul.f32 %v1377_v2, %v5154_v41 }
 0x1d1   : > { %v1251_v32 = vmul.f32 %v1219_v50, %v1219_v50 }
 0x1d3   : > { %v4062_v63 = vpop.eup %4061  ;;  %v1283_v3 = vadd.f32 1.0, %v1251_v32 }
 0x1d4   : > { %v1346_v61 = vmul.f32 2.0, %v4062_v63 }
 0x1d5   : > { %4065 = vrcp.f32 %v1283_v3 }
 0x1d6   : > { %v4064_v62 = vpop.eup %4063  ;;  %v1378_v46 = vsub.f32 1.0, %v1346_v61  ;;  %v5182_v61 = vperm.slane %v4930_v6, 2 }
 0x1d7   : > { %v1220_v12 = vadd.f32 1.0, %v4064_v62  ;;  %v1038_v25 = vpop.f32.mrf.mxu3 }
 0x1d8   : > { %v1410_v33 = vmul.f32 %v1378_v46, %v1122_v47  ;;  %v1092_v36 = vmul.f32 %v4937_v26, %v1038_v25 }
 0x1d9   : > { %v1252_v13 = vmul.f32 %v1220_v12, %v1220_v12 }
 0x1da   : > { %v5172_v58 = vadd.f32 %v4945_v30, %v1092_v36  ;;  %v1434_v34 = vpack.c.bf16 %v1410_v33, %v1409_v5  ;;  %v5186_v5 = vperm.slane %v4930_v6, 3 }
 0x1db   : > { %v1284_v56 = vadd.f32 1.0, %v1252_v13  ;;  %v4066_v4 = vpop.eup %4065 }
 0x1dc   : > { %v1175_v9 = vmul.f32 1.442695, %v5172_v58  ;;  %3752 = vmatmul.msk.bf16.vlgmr.msra.gmra.mxu2 %vm935_vm2, %v1434_v34  ;;  %v1347_v37 = vmul.f32 2.0, %v4066_v4 }
 0x1dd   : > { %4067 = vrcp.f32 %v1284_v56 }
 0x1de   : > { %4069 = vpow2.f32 %v1175_v9  ;;  %v1379_v14 = vsub.f32 1.0, %v1347_v37 }
 0x1df   : > { %v1040_v35 = vpop.f32.mrf.mxu3 }
 0x1e0   : > { %v1093_v41 = vmul.f32 %v4937_v26, %v1040_v35  ;;  %v1411_v62 = vmul.f32 %v1379_v14, %v1123_v1  ;;  %v3850_v1 = vld [vmem:[%s6329_s3 + $0x10] sm:$0xff] }
 0x1e1   : > { %2072 = vmatpush.bf16.msrb.mxu3 %v3850_v1 }
 0x1e2   : > { %v5178_v47 = vadd.f32 %v4945_v30, %v1093_v41 }
 0x1e3   : > { %v4068_v24 = vpop.eup %4067 }
 0x1e4   : > { %v4070_v43 = vpop.eup %4069  ;;  %v1348_v50 = vmul.f32 2.0, %v4068_v24  ;;  %v1177_v60 = vmul.f32 1.442695, %v5178_v47 }
 0x1e5   : > { %v1221_v32 = vadd.f32 1.0, %v4070_v43 }
 0x1e6   : > { %v1380_v63 = vsub.f32 1.0, %v1348_v50  ;;  %4071 = vpow2.f32 %v1177_v60 }
 0x1e7   : > { %v1253_v3 = vmul.f32 %v1221_v32, %v1221_v32  ;;  %v1043_v2 = vpop.f32.mrf.mxu3 }
 0x1e8   : > { %v1412_v46 = vmul.f32 %v1380_v63, %v1124_v40  ;;  %v1094_v12 = vmul.f32 %v4937_v26, %v1043_v2 }
 0x1e9   : > { %v1285_v25 = vadd.f32 1.0, %v1253_v3 }
 0x1ea   : > { %v5189_v33 = vadd.f32 %v4945_v30, %v1094_v12  ;;  %v1516_v36 = vpop.f32.mrf.mxu0  ;;  %v1435_v13 = vpack.c.bf16 %v1412_v46, %v1411_v62 }
 0x1eb   : > { %v1597_v34 = vmul.f32 %v5182_v61, %v1516_v36  ;;  %4073 = vrcp.f32 %v1285_v25 }
 0x1ec   : > { %v4072_v56 = vpop.eup %4071  ;;  %v1179_v9 = vmul.f32 1.442695, %v5189_v33  ;;  %3753 = vmatmul.msk.bf16.gmra.mxu2 %vm935_vm2, %v1435_v13 }
 0x1ed   : > { %v1222_v40 = vadd.f32 1.0, %v4072_v56  ;;  %v1630_v6 = vadd.f32 %v5186_v5, %v1597_v34 }
 0x1ee   : > { %4075 = vpow2.f32 %v1179_v9 }
 0x1ef   : > { %v1254_v4 = vmul.f32 %v1222_v40, %v1222_v40  ;;  %v5199_v35 = vadd.f32 %v1630_v6, %v4787_v21  ;;  %v1045_v37 = vpop.f32.mrf.mxu3 }
 0x1f0   : > { %v1095_v41 = vmul.f32 %v4937_v26, %v1045_v37 }
 0x1f1   : > { %v1286_v24 = vadd.f32 1.0, %v1254_v4  ;;  %v1694_v43 = vmul.f32 1.442695, %v5199_v35  ;;  %v4074_v60 = vpop.eup %4073 }
 0x1f2   : > { %v5204_v14 = vadd.f32 %v4945_v30, %v1095_v41  ;;  %v1518_v50 = vpop.f32.mrf.mxu0  ;;  %v1349_v62 = vmul.f32 2.0, %v4074_v60 }
 0x1f3   : > { %4077 = vrcp.f32 %v1286_v24  ;;  %v1598_v32 = vmul.f32 %v5182_v61, %v1518_v50 }
 0x1f4   : > { %v4076_v63 = vpop.eup %4075  ;;  %4079 = vpow2.f32 %v1694_v43  ;;  %v1181_v3 = vmul.f32 1.442695, %v5204_v14  ;;  %v1381_v1 = vsub.f32 1.0, %v1349_v62 }
 0x1f5   : > { %v1223_v21 = vadd.f32 1.0, %v4076_v63  ;;  %v1631_v2 = vadd.f32 %v5186_v5, %v1598_v32 }
 0x1f6   : > { %4081 = vpow2.f32 %v1181_v3  ;;  %v1413_v63 = vmul.f32 %v1381_v1, %v5172_v58 }
 0x1f7   : > { %v1255_v46 = vmul.f32 %v1223_v21, %v1223_v21  ;;  %v5210_v12 = vadd.f32 %v1631_v2, %v4789_v22  ;;  %v1048_v25 = vpop.f32.mrf.mxu3 }
 0x1f8   : > { %v1096_v36 = vmul.f32 %v4937_v26, %v1048_v25 }
 0x1f9   : > { %v4078_v13 = vpop.eup %4077  ;;  %v1287_v34 = vadd.f32 1.0, %v1255_v46  ;;  %v1696_v56 = vmul.f32 1.442695, %v5210_v12 }
 0x1fa   : > { %v4080_v9 = vpop.eup %4079  ;;  %v1350_v40 = vmul.f32 2.0, %v4078_v13  ;;  %v5215_v6 = vadd.f32 %v4945_v30, %v1096_v36  ;;  %v1521_v4 = vpop.f32.mrf.mxu0 }
 0x1fb   : > { %v1758_v37 = vadd.f32 1.0, %v4080_v9  ;;  %v1599_v41 = vmul.f32 %v5182_v61, %v1521_v4  ;;  %4083 = vpow2.f32 %v1696_v56 }
 0x1fc   : > { %v4082_v24 = vpop.eup %4081  ;;  %v1382_v22 = vsub.f32 1.0, %v1350_v40  ;;  %v1183_v43 = vmul.f32 1.442695, %v5215_v6  ;;  %4085 = vrcp.f32 %v1287_v34 }
 0x1fd   : > { %v1790_v50 = vmul.f32 %v1758_v37, %v1758_v37  ;;  %v1224_v60 = vadd.f32 1.0, %v4082_v24  ;;  %v1632_v32 = vadd.f32 %v5186_v5, %v1599_v41 }
 0x1fe   : > { %v1414_v3 = vmul.f32 %v1382_v22, %v5178_v47  ;;  %4087 = vpow2.f32 %v1183_v43 }
 0x1ff   : > { %v1822_v21 = vadd.f32 1.0, %v1790_v50  ;;  %v1256_v2 = vmul.f32 %v1224_v60, %v1224_v60  ;;  %v5223_v62 = vadd.f32 %v1632_v32, %v4805_v51  ;;  %v1050_v46 = vpop.f32.mrf.mxu3 }
 0x200   : > { %v1097_v25 = vmul.f32 %v4937_v26, %v1050_v46  ;;  %v1436_v36 = vpack.c.bf16 %v1414_v3, %v1413_v63 }
 0x201   : > { %v1288_v13 = vadd.f32 1.0, %v1256_v2  ;;  %v1698_v34 = vmul.f32 1.442695, %v5223_v62  ;;  %v4084_v56 = vpop.eup %4083  ;;  %4089 = vrcp.f32 %v1822_v21 }
 0x202   : > { %v5228_v9 = vadd.f32 %v4945_v30, %v1097_v25  ;;  %v1523_v58 = vpop.f32.mrf.mxu0  ;;  %3754 = vmatmul.msk.bf16.gmra.mxu2 %vm935_vm2, %v1436_v36  ;;  %v4086_v47 = vpop.eup %4085  ;;  %v1759_v1 = vadd.f32 1.0, %v4084_v56 }
 0x203   : > { %4091 = vrcp.f32 %v1288_v13  ;;  %v1600_v51 = vmul.f32 %v5182_v61, %v1523_v58  ;;  %v1351_v22 = vmul.f32 2.0, %v4086_v47 }
 0x204   : > { %v4088_v40 = vpop.eup %4087  ;;  %4093 = vpow2.f32 %v1698_v34  ;;  %v1185_v4 = vmul.f32 1.442695, %v5228_v9  ;;  %v1791_v37 = vmul.f32 %v1759_v1, %v1759_v1 }
 0x205   : > { %v1225_v41 = vadd.f32 1.0, %v4088_v40  ;;  %v1633_v24 = vadd.f32 %v5186_v5, %v1600_v51  ;;  %v1383_v36 = vsub.f32 1.0, %v1351_v22 }
 0x206   : > { %4095 = vpow2.f32 %v1185_v4  ;;  %v1823_v43 = vadd.f32 1.0, %v1791_v37 }
 0x207   : > { %v1257_v50 = vmul.f32 %v1225_v41, %v1225_v41  ;;  %v5235_v60 = vadd.f32 %v1633_v24, %v4807_v52  ;;  %v1053_v32 = vpop.f32.mrf.mxu3  ;;  %v4090_v63 = vpop.eup %4089  ;;  %v1415_v24 = vmul.f32 %v1383_v36, %v5189_v33 }
 0x208   : > { %v1098_v3 = vmul.f32 %v4937_v26, %v1053_v32  ;;  %4097 = vrcp.f32 %v1823_v43  ;;  %v1886_v1 = vmul.f32 2.0, %v4090_v63 }
 0x209   : > { %v4092_v21 = vpop.eup %4091  ;;  %v1289_v2 = vadd.f32 1.0, %v1257_v50  ;;  %v1700_v46 = vmul.f32 1.442695, %v5235_v60 }
 0x20a   : > { %v4094_v25 = vpop.eup %4093  ;;  %v1352_v13 = vmul.f32 2.0, %v4092_v21  ;;  %v5240_v34 = vadd.f32 %v4945_v30, %v1098_v3  ;;  %v1526_v56 = vpop.f32.mrf.mxu0  ;;  %v1918_v21 = vsub.f32 1.0, %v1886_v1 }
 0x20b   : > { %v1760_v58 = vadd.f32 1.0, %v4094_v25  ;;  %v1601_v52 = vmul.f32 %v5182_v61, %v1526_v56  ;;  %4099 = vpow2.f32 %v1700_v46 }
 0x20c   : > { %v4096_v47 = vpop.eup %4095  ;;  %v1384_v51 = vsub.f32 1.0, %v1352_v13  ;;  %v1187_v40 = vmul.f32 1.442695, %v5240_v34  ;;  %4101 = vrcp.f32 %v1289_v2 }
 0x20d   : > { %v1792_v4 = vmul.f32 %v1760_v58, %v1760_v58  ;;  %v1226_v37 = vadd.f32 1.0, %v4096_v47  ;;  %v1634_v41 = vadd.f32 %v5186_v5, %v1601_v52 }
 0x20e   : > { %v1416_v22 = vmul.f32 %v1384_v51, %v5204_v14  ;;  %4103 = vpow2.f32 %v1187_v40  ;;  %v4098_v43 = vpop.eup %4097  ;;  %v5258_v51 = vmul.f32 %v1918_v21, %v5199_v35 }
 0x20f   : > { %v1824_v50 = vadd.f32 1.0, %v1792_v4  ;;  %v1258_v32 = vmul.f32 %v1226_v37, %v1226_v37  ;;  %v5248_v3 = vadd.f32 %v1634_v41, %v4823_v15  ;;  %v1055_v63 = vpop.f32.mrf.mxu3  ;;  %v1887_v46 = vmul.f32 2.0, %v4098_v43 }
 0x210   : > { %v1099_v2 = vmul.f32 %v4937_v26, %v1055_v63  ;;  %v1437_v25 = vpack.c.bf16 %v1416_v22, %v1415_v24 }
 0x211   : > { %v1290_v13 = vadd.f32 1.0, %v1258_v32  ;;  %v1702_v56 = vmul.f32 1.442695, %v5248_v3  ;;  %v4100_v58 = vpop.eup %4099  ;;  %v1919_v33 = vsub.f32 1.0, %v1887_v46  ;;  %4105 = vrcp.f32 %v1824_v50 }
 0x212   : > { %v5253_v14 = vadd.f32 %v4945_v30, %v1099_v2  ;;  %v1528_v36 = vpop.f32.mrf.mxu0  ;;  %3755 = vmatmul.msk.bf16.gmra.mxu2 %vm935_vm2, %v1437_v25  ;;  %v4102_v15 = vpop.eup %4101  ;;  %v1761_v52 = vadd.f32 1.0, %v4100_v58 }
 0x213   : > { %4107 = vrcp.f32 %v1290_v13  ;;  %v1602_v47 = vmul.f32 %v5182_v61, %v1528_v36  ;;  %v5261_v40 = vmul.f32 %v1919_v33, %v5210_v12  ;;  %v1353_v22 = vmul.f32 2.0, %v4102_v15 }
 0x214   : > { %v4104_v1 = vpop.eup %4103  ;;  %4109 = vpow2.f32 %v1702_v56  ;;  %v1189_v4 = vmul.f32 1.442695, %v5253_v14  ;;  %v1793_v37 = vmul.f32 %v1761_v52, %v1761_v52 }
 0x215   : > { %v1227_v41 = vadd.f32 1.0, %v4104_v1  ;;  %v1635_v24 = vadd.f32 %v5186_v5, %v1602_v47  ;;  %v1984_v43 = vpack.c.bf16 %v5261_v40, %v5258_v51  ;;  %v1385_v56 = vsub.f32 1.0, %v1353_v22 }
 0x216   : > { %4111 = vpow2.f32 %v1189_v4  ;;  %v1825_v50 = vadd.f32 1.0, %v1793_v37 }
 0x217   : > { %v1259_v32 = vmul.f32 %v1227_v41, %v1227_v41  ;;  %v5268_v35 = vadd.f32 %v1635_v24, %v4825_v17  ;;  %v1058_v63 = vpop.f32.mrf.mxu3  ;;  %v4106_v12 = vpop.eup %4105  ;;  %3774 = vmatmul.msk.bf16.vlgmr.msrb.gmra.mxu3 %vm935_vm2, %v1984_v43  ;;  %v1417_v22 = vmul.f32 %v1385_v56, %v5215_v6 }
 0x218   : > { %v1100_v21 = vmul.f32 %v4937_v26, %v1058_v63  ;;  %4113 = vrcp.f32 %v1825_v50  ;;  %v1888_v4 = vmul.f32 2.0, %v4106_v12 }
 0x219   : > { %v4108_v46 = vpop.eup %4107  ;;  %v1291_v2 = vadd.f32 1.0, %v1259_v32  ;;  %v1704_v25 = vmul.f32 1.442695, %v5268_v35 }
 0x21a   : > { %v4110_v13 = vpop.eup %4109  ;;  %v1354_v58 = vmul.f32 2.0, %v4108_v46  ;;  %v5274_v33 = vadd.f32 %v4945_v30, %v1100_v21  ;;  %v1531_v36 = vpop.f32.mrf.mxu0 }
 0x21b   : > { %v1762_v17 = vadd.f32 1.0, %v4110_v13  ;;  %v1603_v15 = vmul.f32 %v5182_v61, %v1531_v36  ;;  %4115 = vpow2.f32 %v1704_v25  ;;  %v1920_v13 = vsub.f32 1.0, %v1888_v4 }
 0x21c   : > { %v4112_v52 = vpop.eup %4111  ;;  %v1386_v47 = vsub.f32 1.0, %v1354_v58  ;;  %v1191_v1 = vmul.f32 1.442695, %v5274_v33  ;;  %4117 = vrcp.f32 %v1291_v2 }
 0x21d   : > { %v1794_v37 = vmul.f32 %v1762_v17, %v1762_v17  ;;  %v1228_v41 = vadd.f32 1.0, %v4112_v52  ;;  %v1636_v24 = vadd.f32 %v5186_v5, %v1603_v15  ;;  %v5293_v4 = vmul.f32 %v1920_v13, %v5223_v62 }
 0x21e   : > { %v1418_v43 = vmul.f32 %v1386_v47, %v5228_v9  ;;  %4119 = vpow2.f32 %v1191_v1  ;;  %v4114_v50 = vpop.eup %4113 }
 0x21f   : > { %v1826_v32 = vadd.f32 1.0, %v1794_v37  ;;  %v1260_v63 = vmul.f32 %v1228_v41, %v1228_v41  ;;  %v5282_v21 = vadd.f32 %v1636_v24, %v4844_v48  ;;  %v1060_v46 = vpop.f32.mrf.mxu3  ;;  %v1889_v2 = vmul.f32 2.0, %v4114_v50 }
 0x220   : > { %v1101_v25 = vmul.f32 %v4937_v26, %v1060_v46  ;;  %v1438_v12 = vpack.c.bf16 %v1418_v43, %v1417_v22 }
 0x221   : > { %v1292_v58 = vadd.f32 1.0, %v1260_v63  ;;  %v1706_v36 = vmul.f32 1.442695, %v5282_v21  ;;  %v4116_v17 = vpop.eup %4115  ;;  %v1921_v56 = vsub.f32 1.0, %v1889_v2  ;;  %4121 = vrcp.f32 %v1826_v32 }
 0x222   : > { %v5287_v6 = vadd.f32 %v4945_v30, %v1101_v25  ;;  %v1533_v9 = vpop.f32.mrf.mxu0  ;;  %3756 = vmatmul.msk.bf16.gmra.mxu2 %vm935_vm2, %v1438_v12  ;;  %v4118_v48 = vpop.eup %4117  ;;  %v1763_v15 = vadd.f32 1.0, %v4116_v17 }
 0x223   : > { %4123 = vrcp.f32 %v1292_v58  ;;  %v1604_v52 = vmul.f32 %v5182_v61, %v1533_v9  ;;  %v5296_v37 = vmul.f32 %v1921_v56, %v5235_v60  ;;  %v1355_v43 = vmul.f32 2.0, %v4118_v48 }
 0x224   : > { %v4120_v47 = vpop.eup %4119  ;;  %4125 = vpow2.f32 %v1706_v36  ;;  %v1193_v1 = vmul.f32 1.442695, %v5287_v6  ;;  %v1795_v41 = vmul.f32 %v1763_v15, %v1763_v15 }
 0x225   : > { %v1229_v24 = vadd.f32 1.0, %v4120_v47  ;;  %v1637_v22 = vadd.f32 %v5186_v5, %v1604_v52  ;;  %v1985_v50 = vpack.c.bf16 %v5296_v37, %v5293_v4  ;;  %v1387_v36 = vsub.f32 1.0, %v1355_v43 }
 0x226   : > { %4127 = vpow2.f32 %v1193_v1  ;;  %v1827_v32 = vadd.f32 1.0, %v1795_v41 }
 0x227   : > { %v1261_v63 = vmul.f32 %v1229_v24, %v1229_v24  ;;  %v5302_v46 = vadd.f32 %v1637_v22, %v4846_v49  ;;  %v1063_v25 = vpop.f32.mrf.mxu3  ;;  %v4122_v62 = vpop.eup %4121  ;;  %3775 = vmatmul.msk.bf16.gmra.mxu3 %vm935_vm2, %v1985_v50  ;;  %v1419_v43 = vmul.f32 %v1387_v36, %v5240_v34 }
 0x228   : > { %v1102_v60 = vmul.f32 %v4937_v26, %v1063_v25  ;;  %4129 = vrcp.f32 %v1827_v32  ;;  %v1890_v1 = vmul.f32 2.0, %v4122_v62 }
 0x229   : > { %v4124_v12 = vpop.eup %4123  ;;  %v1293_v2 = vadd.f32 1.0, %v1261_v63  ;;  %v1708_v13 = vmul.f32 1.442695, %v5302_v46 }
 0x22a   : > { %v4126_v58 = vpop.eup %4125  ;;  %v1356_v17 = vmul.f32 2.0, %v4124_v12  ;;  %v5308_v9 = vadd.f32 %v4945_v30, %v1102_v60  ;;  %v1536_v56 = vpop.f32.mrf.mxu0 }
 0x22b   : > { %v1764_v49 = vadd.f32 1.0, %v4126_v58  ;;  %v1605_v48 = vmul.f32 %v5182_v61, %v1536_v56  ;;  %4131 = vpow2.f32 %v1708_v13  ;;  %v1922_v58 = vsub.f32 1.0, %v1890_v1 }
 0x22c   : > { %v4128_v15 = vpop.eup %4127  ;;  %v1388_v52 = vsub.f32 1.0, %v1356_v17  ;;  %v1195_v47 = vmul.f32 1.442695, %v5308_v9  ;;  %4133 = vrcp.f32 %v1293_v2 }
 0x22d   : > { %v1796_v41 = vmul.f32 %v1764_v49, %v1764_v49  ;;  %v1230_v24 = vadd.f32 1.0, %v4128_v15  ;;  %v1638_v22 = vadd.f32 %v5186_v5, %v1605_v48  ;;  %v5327_v1 = vmul.f32 %v1922_v58, %v5248_v3 }
 0x22e   : > { %v1420_v50 = vmul.f32 %v1388_v52, %v5253_v14  ;;  %4135 = vpow2.f32 %v1195_v47  ;;  %v4130_v32 = vpop.eup %4129 }
 0x22f   : > { %v1828_v63 = vadd.f32 1.0, %v1796_v41  ;;  %v1262_v25 = vmul.f32 %v1230_v24, %v1230_v24  ;;  %v5316_v60 = vadd.f32 %v1638_v22, %v4865_v18  ;;  %v1065_v12 = vpop.f32.mrf.mxu3  ;;  %v1891_v2 = vmul.f32 2.0, %v4130_v32 }
 0x230   : > { %v1103_v13 = vmul.f32 %v4937_v26, %v1065_v12  ;;  %v1439_v62 = vpack.c.bf16 %v1420_v50, %v1419_v43 }
 0x231   : > { %v1294_v17 = vadd.f32 1.0, %v1262_v25  ;;  %v1710_v56 = vmul.f32 1.442695, %v5316_v60  ;;  %v4132_v49 = vpop.eup %4131  ;;  %v1923_v36 = vsub.f32 1.0, %v1891_v2  ;;  %4137 = vrcp.f32 %v1828_v63 }
 0x232   : > { %v5321_v34 = vadd.f32 %v4945_v30, %v1103_v13  ;;  %v1538_v14 = vpop.f32.mrf.mxu0  ;;  %3757 = vmatmul.msk.bf16.gmra.mxu2 %vm935_vm2, %v1439_v62  ;;  %v4134_v18 = vpop.eup %4133  ;;  %v1765_v48 = vadd.f32 1.0, %v4132_v49 }
 0x233   : > { %4139 = vrcp.f32 %v1294_v17  ;;  %v1606_v15 = vmul.f32 %v5182_v61, %v1538_v14  ;;  %v5330_v41 = vmul.f32 %v1923_v36, %v5268_v35  ;;  %v1357_v50 = vmul.f32 2.0, %v4134_v18 }
 0x234   : > { %v4136_v52 = vpop.eup %4135  ;;  %4141 = vpow2.f32 %v1710_v56  ;;  %v1197_v47 = vmul.f32 1.442695, %v5321_v34  ;;  %v1797_v24 = vmul.f32 %v1765_v48, %v1765_v48 }
 0x235   : > { %v1231_v22 = vadd.f32 1.0, %v4136_v52  ;;  %v1639_v43 = vadd.f32 %v5186_v5, %v1606_v15  ;;  %v1986_v32 = vpack.c.bf16 %v5330_v41, %v5327_v1  ;;  %v1389_v56 = vsub.f32 1.0, %v1357_v50 }
 0x236   : > { %4143 = vpow2.f32 %v1197_v47  ;;  %v1829_v63 = vadd.f32 1.0, %v1797_v24 }
 0x237   : > { %v1263_v25 = vmul.f32 %v1231_v22, %v1231_v22  ;;  %v5336_v12 = vadd.f32 %v1639_v43, %v4868_v19  ;;  %v1068_v13 = vpop.f32.mrf.mxu3  ;;  %v4138_v3 = vpop.eup %4137  ;;  %3776 = vmatmul.msk.bf16.gmra.mxu3 %vm935_vm2, %v1986_v32  ;;  %v1421_v50 = vmul.f32 %v1389_v56, %v5274_v33 }
 0x238   : > { %v1104_v35 = vmul.f32 %v4937_v26, %v1068_v13  ;;  %4145 = vrcp.f32 %v1829_v63  ;;  %v1892_v47 = vmul.f32 2.0, %v4138_v3  ;;  %v3853_v63 = vld [vmem:[%s6330_s4 + $0x18] sm:$0xff] }
 0x239   : > { %v4140_v62 = vpop.eup %4139  ;;  %v1295_v2 = vadd.f32 1.0, %v1263_v25  ;;  %v1712_v58 = vmul.f32 1.442695, %v5336_v12  ;;  %2595 = vmatpush.bf16.msrb.mxu1 %v3853_v63 }
 0x23a   : > { %v4142_v17 = vpop.eup %4141  ;;  %v1358_v49 = vmul.f32 2.0, %v4140_v62  ;;  %v5342_v14 = vadd.f32 %v4945_v30, %v1104_v35  ;;  %v1541_v36 = vpop.f32.mrf.mxu0  ;;  %v1924_v33 = vsub.f32 1.0, %v1892_v47 }
 0x23b   : > { %v1766_v19 = vadd.f32 1.0, %v4142_v17  ;;  %v1607_v18 = vmul.f32 %v5182_v61, %v1541_v36  ;;  %4147 = vpow2.f32 %v1712_v58 }
 0x23c   : > { %v4144_v48 = vpop.eup %4143  ;;  %v1390_v15 = vsub.f32 1.0, %v1358_v49  ;;  %v1199_v52 = vmul.f32 1.442695, %v5342_v14  ;;  %4149 = vrcp.f32 %v1295_v2  ;;  %v5364_v47 = vmul.f32 %v1924_v33, %v5282_v21 }
 0x23d   : > { %v1798_v24 = vmul.f32 %v1766_v19, %v1766_v19  ;;  %v1232_v22 = vadd.f32 1.0, %v4144_v48  ;;  %v1640_v43 = vadd.f32 %v5186_v5, %v1607_v18 }
 0x23e   : > { %v1422_v32 = vmul.f32 %v1390_v15, %v5287_v6  ;;  %4151 = vpow2.f32 %v1199_v52  ;;  %v4146_v25 = vpop.eup %4145 }
 0x23f   : > { %v1830_v13 = vadd.f32 1.0, %v1798_v24  ;;  %v1264_v35 = vmul.f32 %v1232_v22, %v1232_v22  ;;  %v5353_v62 = vadd.f32 %v1640_v43, %v4884_v54  ;;  %v1070_v3 = vpop.f32.mrf.mxu3  ;;  %v1893_v17 = vmul.f32 2.0, %v4146_v25 }
 0x240   : > { %v1105_v2 = vmul.f32 %v4937_v26, %v1070_v3  ;;  %v1440_v58 = vpack.c.bf16 %v1422_v32, %v1421_v50 }
 0x241   : > { %v1296_v56 = vadd.f32 1.0, %v1264_v35  ;;  %v1714_v6 = vmul.f32 1.442695, %v5353_v62  ;;  %v4148_v49 = vpop.eup %4147  ;;  %v1925_v18 = vsub.f32 1.0, %v1893_v17  ;;  %4153 = vrcp.f32 %v1830_v13 }
 0x242   : > { %v5358_v36 = vadd.f32 %v4945_v30, %v1105_v2  ;;  %v1543_v19 = vpop.f32.mrf.mxu0  ;;  %3758 = vmatmul.msk.bf16.gmra.mxu2 %vm935_vm2, %v1440_v58  ;;  %v4150_v54 = vpop.eup %4149  ;;  %v1767_v48 = vadd.f32 1.0, %v4148_v49 }
 0x243   : > { %4155 = vrcp.f32 %v1296_v56  ;;  %v1608_v26 = vmul.f32 %v5182_v61, %v1543_v19  ;;  %v5367_v30 = vmul.f32 %v1925_v18, %v5302_v46  ;;  %v1359_v50 = vmul.f32 2.0, %v4150_v54 }
 0x244   : > { %v4152_v15 = vpop.eup %4151  ;;  %4157 = vpow2.f32 %v1714_v6  ;;  %v1201_v52 = vmul.f32 1.442695, %v5358_v36  ;;  %v1799_v24 = vmul.f32 %v1767_v48, %v1767_v48 }
 0x245   : > { %v1233_v22 = vadd.f32 1.0, %v4152_v15  ;;  %v1641_v43 = vadd.f32 %v5186_v5, %v1608_v26  ;;  %v1987_v32 = vpack.c.bf16 %v5367_v30, %v5364_v47  ;;  %v1391_v58 = vsub.f32 1.0, %v1359_v50 }
 0x246   : > { %4159 = vpow2.f32 %v1201_v52  ;;  %v1831_v63 = vadd.f32 1.0, %v1799_v24 }
 0x247   : > { %v1265_v25 = vmul.f32 %v1233_v22, %v1233_v22  ;;  %v5373_v13 = vadd.f32 %v1641_v43, %v4886_v55  ;;  %v4154_v35 = vpop.eup %4153  ;;  %3777 = vmatmul.msk.bf16.gmra.mxu3 %vm935_vm2, %v1987_v32  ;;  %v1423_v26 = vmul.f32 %v1391_v58, %v5308_v9 }
 0x248   : > { %4161 = vrcp.f32 %v1831_v63  ;;  %v1894_v55 = vmul.f32 2.0, %v4154_v35 }
 0x249   : > { %v4156_v21 = vpop.eup %4155  ;;  %v1297_v46 = vadd.f32 1.0, %v1265_v25  ;;  %v1716_v3 = vmul.f32 1.442695, %v5373_v13 }
 0x24a   : > { %v4158_v2 = vpop.eup %4157  ;;  %v1360_v17 = vmul.f32 2.0, %v4156_v21  ;;  %v1546_v33 = vpop.f32.mrf.mxu0  ;;  %v1926_v63 = vsub.f32 1.0, %v1894_v55 }
 0x24b   : > { %v1768_v56 = vadd.f32 1.0, %v4158_v2  ;;  %v1609_v6 = vmul.f32 %v5182_v61, %v1546_v33  ;;  %4163 = vpow2.f32 %v1716_v3 }
 0x24c   : > { %v4160_v49 = vpop.eup %4159  ;;  %v1392_v19 = vsub.f32 1.0, %v1360_v17  ;;  %4165 = vrcp.f32 %v1297_v46 }
 0x24d   : > { %v1800_v18 = vmul.f32 %v1768_v56, %v1768_v56  ;;  %v1234_v54 = vadd.f32 1.0, %v4160_v49  ;;  %v1642_v48 = vadd.f32 %v5186_v5, %v1609_v6 }
 0x24e   : > { %v1424_v15 = vmul.f32 %v1392_v19, %v5321_v34  ;;  %v4162_v52 = vpop.eup %4161 }
 0x24f   : > { %v1832_v24 = vadd.f32 1.0, %v1800_v18  ;;  %v1266_v22 = vmul.f32 %v1234_v54, %v1234_v54  ;;  %v5382_v43 = vadd.f32 %v1642_v48, %v4899_v20  ;;  %v1895_v32 = vmul.f32 2.0, %v4162_v52 }
 0x250   : > { %v1441_v50 = vpack.c.bf16 %v1424_v15, %v1423_v26  ;;  %v5388_v20 = vmul.f32 %v1926_v63, %v5316_v60 }
 0x251   : > { %v1298_v25 = vadd.f32 1.0, %v1266_v22  ;;  %v1718_v35 = vmul.f32 1.442695, %v5382_v43  ;;  %v4164_v21 = vpop.eup %4163  ;;  %4167 = vrcp.f32 %v1832_v24  ;;  %v1927_v9 = vsub.f32 1.0, %v1895_v32 }
 0x252   : > { %v1548_v46 = vpop.f32.mrf.mxu0  ;;  %3759 = vmatmul.msk.bf16.gmra.mxu2 %vm935_vm2, %v1441_v50  ;;  %v4166_v3 = vpop.eup %4165  ;;  %v1769_v34 = vadd.f32 1.0, %v4164_v21 }
 0x253   : > { %4169 = vrcp.f32 %v1298_v25  ;;  %v1610_v2 = vmul.f32 %v5182_v61, %v1548_v46  ;;  %v5391_v58 = vmul.f32 %v1927_v9, %v5336_v12  ;;  %v1361_v56 = vmul.f32 2.0, %v4166_v3 }
 0x254   : > { %4171 = vpow2.f32 %v1718_v35  ;;  %v1801_v17 = vmul.f32 %v1769_v34, %v1769_v34 }
 0x255   : > { %v1643_v33 = vadd.f32 %v5186_v5, %v1610_v2  ;;  %v1988_v6 = vpack.c.bf16 %v5391_v58, %v5388_v20  ;;  %v1393_v48 = vsub.f32 1.0, %v1361_v56 }
 0x256   : > { %v1833_v49 = vadd.f32 1.0, %v1801_v17 }
 0x257   : > { %v1675_v19 = vadd.f32 %v1643_v33, %v4901_v23  ;;  %v4168_v55 = vpop.eup %4167  ;;  %3778 = vmatmul.msk.bf16.gmra.mxu3 %vm935_vm2, %v1988_v6  ;;  %v1425_v22 = vmul.f32 %v1393_v48, %v5342_v14 }
 0x258   : > { %4173 = vrcp.f32 %v1833_v49  ;;  %v1896_v15 = vmul.f32 2.0, %v4168_v55 }
 0x259   : > { %v4170_v18 = vpop.eup %4169  ;;  %v1720_v60 = vmul.f32 1.442695, %v1675_v19 }
 0x25a   : > { %v4172_v54 = vpop.eup %4171  ;;  %v1362_v12 = vmul.f32 2.0, %v4170_v18  ;;  %v1928_v25 = vsub.f32 1.0, %v1896_v15 }
 0x25b   : > { %v1770_v26 = vadd.f32 1.0, %v4172_v54  ;;  %4175 = vpow2.f32 %v1720_v60 }
 0x25c   : > { %v1394_v52 = vsub.f32 1.0, %v1362_v12  ;;  %v5404_v14 = vmul.f32 %v1928_v25, %v5353_v62 }
 0x25d   : > { %v1802_v24 = vmul.f32 %v1770_v26, %v1770_v26 }
 0x25e   : > { %v1426_v50 = vmul.f32 %v1394_v52, %v5358_v36  ;;  %v4174_v32 = vpop.eup %4173 }
 0x25f   : > { %v1834_v23 = vadd.f32 1.0, %v1802_v24  ;;  %v1551_v63 = vpop.f32.mrf.mxu2  ;;  %v1897_v35 = vmul.f32 2.0, %v4174_v32 }
 0x260   : > { %v1611_v21 = vmul.f32 %v5182_v61, %v1551_v63  ;;  %v1442_v46 = vpack.c.bf16 %v1426_v50, %v1425_v22 }
 0x261   : > { %v4176_v9 = vpop.eup %4175  ;;  %v1929_v3 = vsub.f32 1.0, %v1897_v35  ;;  %4177 = vrcp.f32 %v1834_v23 }
 0x262   : > { %v1771_v34 = vadd.f32 1.0, %v4176_v9  ;;  %v1644_v2 = vadd.f32 %v5186_v5, %v1611_v21  ;;  %3760 = vmatmul.msk.bf16.gmra.mxu2 %vm935_vm2, %v1442_v46 }
 0x263   : > { %v5407_v36 = vmul.f32 %v1929_v3, %v5373_v13 }
 0x264   : > { %v1803_v17 = vmul.f32 %v1771_v34, %v1771_v34  ;;  %v1676_v33 = vadd.f32 %v1644_v2, %v4914_v53 }
 0x265   : > { %v1989_v49 = vpack.c.bf16 %v5407_v36, %v5404_v14 }
 0x266   : > { %v1835_v56 = vadd.f32 1.0, %v1803_v17  ;;  %v1722_v6 = vmul.f32 1.442695, %v1676_v33 }
 0x267   : > { %v1553_v55 = vpop.f32.mrf.mxu2  ;;  %v4178_v18 = vpop.eup %4177  ;;  %3779 = vmatmul.msk.bf16.gmra.mxu3 %vm935_vm2, %v1989_v49 }
 0x268   : > { %4179 = vrcp.f32 %v1835_v56  ;;  %v1612_v60 = vmul.f32 %v5182_v61, %v1553_v55  ;;  %v1898_v13 = vmul.f32 2.0, %v4178_v18 }
 0x269   : > { %4181 = vpow2.f32 %v1722_v6 }
 0x26a   : > { %v1645_v62 = vadd.f32 %v5186_v5, %v1612_v60  ;;  %v1930_v26 = vsub.f32 1.0, %v1898_v13 }
 0x26c   : > { %v1677_v54 = vadd.f32 %v1645_v62, %v4916_v57  ;;  %v5419_v63 = vmul.f32 %v1930_v26, %v5382_v43 }
 0x26e   : > { %v4180_v48 = vpop.eup %4179  ;;  %v1724_v53 = vmul.f32 1.442695, %v1677_v54 }
 0x26f   : > { %v4182_v12 = vpop.eup %4181  ;;  %v1899_v15 = vmul.f32 2.0, %v4180_v48  ;;  %v1556_v52 = vpop.f32.mrf.mxu2 }
 0x270   : > { %v1772_v24 = vadd.f32 1.0, %v4182_v12  ;;  %4183 = vpow2.f32 %v1724_v53  ;;  %v1613_v22 = vmul.f32 %v5182_v61, %v1556_v52 }
 0x271   : > { %v1931_v50 = vsub.f32 1.0, %v1899_v15 }
 0x272   : > { %v1804_v32 = vmul.f32 %v1772_v24, %v1772_v24  ;;  %v1646_v23 = vadd.f32 %v5186_v5, %v1613_v22 }
 0x273   : > { %v5421_v25 = vmul.f32 %v1931_v50, %v1675_v19 }
 0x274   : > { %v1836_v57 = vadd.f32 1.0, %v1804_v32  ;;  %v5424_v35 = vadd.f32 %v1646_v23, %v4940_v28 }
 0x275   : > { %v1990_v21 = vpack.c.bf16 %v5421_v25, %v5419_v63 }
 0x276   : > { %v4184_v46 = vpop.eup %4183  ;;  %v1726_v9 = vmul.f32 1.442695, %v5424_v35  ;;  %4185 = vrcp.f32 %v1836_v57 }
 0x277   : > { %v1773_v3 = vadd.f32 1.0, %v4184_v46  ;;  %v1558_v34 = vpop.f32.mrf.mxu2  ;;  %3780 = vmatmul.msk.bf16.gmra.mxu3 %vm935_vm2, %v1990_v21 }
 0x278   : > { %4187 = vpow2.f32 %v1726_v9  ;;  %v1614_v43 = vmul.f32 %v5182_v61, %v1558_v34 }
 0x279   : > { %v1805_v19 = vmul.f32 %v1773_v3, %v1773_v3 }
 0x27a   : > { %v1647_v2 = vadd.f32 %v5186_v5, %v1614_v43 }
 0x27b   : > { %v1837_v17 = vadd.f32 1.0, %v1805_v19 }
 0x27c   : > { %v1679_v28 = vadd.f32 %v1647_v2, %v4942_v10  ;;  %v4186_v56 = vpop.eup %4185  ;;  %v3852_v10 = vld [vmem:[%s6330_s4 + $0x10] sm:$0xff] }
 0x27d   : > { %4189 = vrcp.f32 %v1837_v17  ;;  %v1900_v18 = vmul.f32 2.0, %v4186_v56  ;;  %2596 = vmatpush.bf16.msrb.mxu1 %v3852_v10 }
 0x27e   : > { %v4188_v6 = vpop.eup %4187  ;;  %v1728_v49 = vmul.f32 1.442695, %v1679_v28 }
 0x27f   : > { %v1774_v55 = vadd.f32 1.0, %v4188_v6  ;;  %v1932_v48 = vsub.f32 1.0, %v1900_v18  ;;  %v5458_v18 = vld [vmem:[%s6331_s5 + $0x4] sm:$0xf] }
 0x280   : > { %4191 = vpow2.f32 %v1728_v49 }
 0x281   : > { %v1806_v60 = vmul.f32 %v1774_v55, %v1774_v55  ;;  %v5437_v22 = vmul.f32 %v1932_v48, %v1676_v33 }
 0x283   : > { %v4190_v62 = vpop.eup %4189  ;;  %v1838_v13 = vadd.f32 1.0, %v1806_v60 }
 0x284   : > { %v1901_v53 = vmul.f32 2.0, %v4190_v62 }
 0x285   : > { %v1561_v12 = vpop.f32.mrf.mxu2  ;;  %4193 = vrcp.f32 %v1838_v13 }
 0x286   : > { %v4192_v26 = vpop.eup %4191  ;;  %v1933_v15 = vsub.f32 1.0, %v1901_v53  ;;  %v1615_v52 = vmul.f32 %v5182_v61, %v1561_v12  ;;  %v5468_v12 = vperm.slane %v5458_v18, 0 }
 0x287   : > { %v1775_v24 = vadd.f32 1.0, %v4192_v26 }
 0x288   : > { %v5439_v50 = vmul.f32 %v1933_v15, %v1677_v54  ;;  %v1648_v32 = vadd.f32 %v5186_v5, %v1615_v52  ;;  %v5474_v52 = vperm.slane %v5458_v18, 1 }
 0x289   : > { %v1807_v23 = vmul.f32 %v1775_v24, %v1775_v24 }
 0x28a   : > { %v5443_v57 = vadd.f32 %v1648_v32, %v4971_v7  ;;  %v1991_v21 = vpack.c.bf16 %v5439_v50, %v5437_v22 }
 0x28b   : > { %v1839_v46 = vadd.f32 1.0, %v1807_v23  ;;  %v4194_v3 = vpop.eup %4193 }
 0x28c   : > { %v1730_v9 = vmul.f32 1.442695, %v5443_v57  ;;  %3781 = vmatmul.msk.bf16.gmra.mxu3 %vm935_vm2, %v1991_v21  ;;  %v1902_v34 = vmul.f32 2.0, %v4194_v3 }
 0x28d   : > { %4195 = vrcp.f32 %v1839_v46  ;;  %v1563_v33 = vpop.f32.mrf.mxu2 }
 0x28e   : > { %4197 = vpow2.f32 %v1730_v9  ;;  %v1616_v54 = vmul.f32 %v5182_v61, %v1563_v33  ;;  %v1934_v17 = vsub.f32 1.0, %v1902_v34 }
 0x290   : > { %v1649_v43 = vadd.f32 %v5186_v5, %v1616_v54 }
 0x292   : > { %v5452_v7 = vadd.f32 %v1649_v43, %v4974_v11  ;;  %v5462_v11 = vmul.f32 %v1934_v17, %v5424_v35 }
 0x293   : > { %v4196_v19 = vpop.eup %4195 }
 0x294   : > { %v4198_v2 = vpop.eup %4197  ;;  %v1903_v56 = vmul.f32 2.0, %v4196_v19  ;;  %v1732_v6 = vmul.f32 1.442695, %v5452_v7 }
 0x295   : > { %v1776_v49 = vadd.f32 1.0, %v4198_v2  ;;  %v1566_v55 = vpop.f32.mrf.mxu2 }
 0x296   : > { %v1935_v60 = vsub.f32 1.0, %v1903_v56  ;;  %4199 = vpow2.f32 %v1732_v6  ;;  %v1617_v62 = vmul.f32 %v5182_v61, %v1566_v55 }
 0x297   : > { %v1808_v13 = vmul.f32 %v1776_v49, %v1776_v49 }
 0x298   : > { %v5464_v48 = vmul.f32 %v1935_v60, %v1679_v28  ;;  %v1650_v53 = vadd.f32 %v5186_v5, %v1617_v62 }
 0x299   : > { %v1840_v26 = vadd.f32 1.0, %v1808_v13 }
 0x29a   : > { %v5471_v15 = vadd.f32 %v1650_v53, %v5000_v31  ;;  %v1992_v10 = vpack.c.bf16 %v5464_v48, %v5462_v11  ;;  %v2074_v24 = vpop.f32.mrf.mxu3 }
 0x29b   : > { %4201 = vrcp.f32 %v1840_v26  ;;  %v2155_v32 = vmul.f32 %v5468_v12, %v2074_v24 }
 0x29c   : > { %v4200_v35 = vpop.eup %4199  ;;  %v1734_v28 = vmul.f32 1.442695, %v5471_v15  ;;  %3782 = vmatmul.msk.bf16.gmra.mxu3 %vm935_vm2, %v1992_v10 }
 0x29d   : > { %v1777_v23 = vadd.f32 1.0, %v4200_v35  ;;  %v1568_v21 = vpop.f32.mrf.mxu2  ;;  %v5482_v31 = vadd.f32 %v5474_v52, %v2155_v32 }
 0x29e   : > { %4203 = vpow2.f32 %v1734_v28  ;;  %v1618_v46 = vmul.f32 %v5182_v61, %v1568_v21 }
 0x29f   : > { %v1809_v9 = vmul.f32 %v1777_v23, %v1777_v23  ;;  %v2220_v3 = vmul.f32 1.442695, %v5482_v31 }
 0x2a0   : > { %v1651_v33 = vadd.f32 %v5186_v5, %v1618_v46 }
 0x2a1   : > { %v1841_v54 = vadd.f32 1.0, %v1809_v9  ;;  %v4202_v34 = vpop.eup %4201  ;;  %4205 = vpow2.f32 %v2220_v3 }
 0x2a2   : > { %v5488_v43 = vadd.f32 %v1651_v33, %v5003_v27  ;;  %v2076_v19 = vpop.f32.mrf.mxu3  ;;  %v1904_v6 = vmul.f32 2.0, %v4202_v34 }
 0x2a3   : > { %4207 = vrcp.f32 %v1841_v54  ;;  %v2156_v56 = vmul.f32 %v5468_v12, %v2076_v19 }
 0x2a4   : > { %v4204_v2 = vpop.eup %4203  ;;  %v1736_v17 = vmul.f32 1.442695, %v5488_v43  ;;  %v1936_v24 = vsub.f32 1.0, %v1904_v6 }
 0x2a5   : > { %v1778_v49 = vadd.f32 1.0, %v4204_v2  ;;  %v1571_v55 = vpop.f32.mrf.mxu2  ;;  %v5493_v60 = vadd.f32 %v5474_v52, %v2156_v56 }
 0x2a6   : > { %4209 = vpow2.f32 %v1736_v17  ;;  %v1619_v62 = vmul.f32 %v5182_v61, %v1571_v55  ;;  %v5504_v34 = vmul.f32 %v1936_v24, %v5443_v57 }
 0x2a7   : > { %v1810_v13 = vmul.f32 %v1778_v49, %v1778_v49  ;;  %v4206_v53 = vpop.eup %4205  ;;  %v2222_v27 = vmul.f32 1.442695, %v5493_v60 }
 0x2a8   : > { %v1652_v26 = vadd.f32 %v5186_v5, %v1619_v62  ;;  %v2284_v28 = vadd.f32 1.0, %v4206_v53 }
 0x2a9   : > { %v4208_v10 = vpop.eup %4207  ;;  %v1842_v35 = vadd.f32 1.0, %v1810_v13  ;;  %4211 = vpow2.f32 %v2222_v27 }
 0x2aa   : > { %v1905_v32 = vmul.f32 2.0, %v4208_v10  ;;  %v5499_v23 = vadd.f32 %v1652_v26, %v5032_v42  ;;  %v2316_v21 = vmul.f32 %v2284_v28, %v2284_v28  ;;  %v2079_v46 = vpop.f32.mrf.mxu3 }
 0x2ab   : > { %v2157_v54 = vmul.f32 %v5468_v12, %v2079_v46  ;;  %4213 = vrcp.f32 %v1842_v35 }
 0x2ac   : > { %v4210_v9 = vpop.eup %4209  ;;  %v1937_v3 = vsub.f32 1.0, %v1905_v32  ;;  %v1738_v33 = vmul.f32 1.442695, %v5499_v23  ;;  %v2348_v19 = vadd.f32 1.0, %v2316_v21 }
 0x2ad   : > { %v1779_v2 = vadd.f32 1.0, %v4210_v9  ;;  %v1573_v17 = vpop.f32.mrf.mxu2  ;;  %v5510_v42 = vadd.f32 %v5474_v52, %v2157_v54 }
 0x2ae   : > { %v5507_v56 = vmul.f32 %v1937_v3, %v5452_v7  ;;  %4215 = vpow2.f32 %v1738_v33  ;;  %v1620_v6 = vmul.f32 %v5182_v61, %v1573_v17 }
 0x2af   : > { %4217 = vrcp.f32 %v2348_v19  ;;  %v1811_v49 = vmul.f32 %v1779_v2, %v1779_v2  ;;  %v4212_v55 = vpop.eup %4211  ;;  %v2224_v62 = vmul.f32 1.442695, %v5510_v42 }
 0x2b0   : > { %v1653_v57 = vadd.f32 %v5186_v5, %v1620_v6  ;;  %v1993_v13 = vpack.c.bf16 %v5507_v56, %v5504_v34  ;;  %v2285_v27 = vadd.f32 1.0, %v4212_v55 }
 0x2b1   : > { %v1843_v53 = vadd.f32 1.0, %v1811_v49  ;;  %4219 = vpow2.f32 %v2224_v62  ;;  %v4214_v26 = vpop.eup %4213 }
 0x2b2   : > { %v5518_v7 = vadd.f32 %v1653_v57, %v5035_v44  ;;  %3783 = vmatmul.msk.bf16.gmra.mxu3 %vm935_vm2, %v1993_v13  ;;  %v2317_v10 = vmul.f32 %v2285_v27, %v2285_v27  ;;  %v2081_v24 = vpop.f32.mrf.mxu3  ;;  %v1906_v44 = vmul.f32 2.0, %v4214_v26 }
 0x2b3   : > { %4221 = vrcp.f32 %v1843_v53  ;;  %v2158_v32 = vmul.f32 %v5468_v12, %v2081_v24 }
 0x2b4   : > { %v4216_v35 = vpop.eup %4215  ;;  %v1740_v28 = vmul.f32 1.442695, %v5518_v7  ;;  %v2349_v46 = vadd.f32 1.0, %v2317_v10  ;;  %v1938_v53 = vsub.f32 1.0, %v1906_v44 }
 0x2b5   : > { %v4218_v21 = vpop.eup %4217  ;;  %v1780_v9 = vadd.f32 1.0, %v4216_v35  ;;  %v1576_v3 = vpop.f32.mrf.mxu2  ;;  %v5524_v33 = vadd.f32 %v5474_v52, %v2158_v32 }
 0x2b6   : > { %4223 = vpow2.f32 %v1740_v28  ;;  %v1621_v19 = vmul.f32 %v5182_v61, %v1576_v3  ;;  %v2412_v17 = vmul.f32 2.0, %v4218_v21 }
 0x2b7   : > { %4225 = vrcp.f32 %v2349_v46  ;;  %v1812_v54 = vmul.f32 %v1780_v9, %v1780_v9  ;;  %v4220_v2 = vpop.eup %4219  ;;  %v2226_v6 = vmul.f32 1.442695, %v5524_v33 }
 0x2b8   : > { %v2286_v62 = vadd.f32 1.0, %v4220_v2  ;;  %v1654_v57 = vadd.f32 %v5186_v5, %v1621_v19  ;;  %v2444_v35 = vsub.f32 1.0, %v2412_v17  ;;  %v5542_v17 = vmul.f32 %v1938_v53, %v5471_v15 }
 0x2b9   : > { %v4222_v49 = vpop.eup %4221  ;;  %v1844_v55 = vadd.f32 1.0, %v1812_v54  ;;  %4227 = vpow2.f32 %v2226_v6 }
 0x2ba   : > { %v1907_v13 = vmul.f32 2.0, %v4222_v49  ;;  %v2318_v27 = vmul.f32 %v2286_v62, %v2286_v62  ;;  %v5530_v10 = vadd.f32 %v1654_v57, %v5064_v45  ;;  %v2084_v26 = vpop.f32.mrf.mxu3 }
 0x2bb   : > { %v2159_v32 = vmul.f32 %v5468_v12, %v2084_v26  ;;  %4229 = vrcp.f32 %v1844_v55  ;;  %v2476_v26 = vmul.f32 %v2444_v35, %v5482_v31 }
 0x2bc   : > { %v4224_v24 = vpop.eup %4223  ;;  %v1939_v28 = vsub.f32 1.0, %v1907_v13  ;;  %v2350_v46 = vadd.f32 1.0, %v2318_v27  ;;  %v1742_v3 = vmul.f32 1.442695, %v5530_v10 }
 0x2bd   : > { %v4226_v21 = vpop.eup %4225  ;;  %v1781_v9 = vadd.f32 1.0, %v4224_v24  ;;  %v1578_v54 = vpop.f32.mrf.mxu2  ;;  %v5538_v45 = vadd.f32 %v5474_v52, %v2159_v32 }
 0x2be   : > { %v5535_v19 = vmul.f32 %v1939_v28, %v5488_v43  ;;  %v2413_v44 = vmul.f32 2.0, %v4226_v21  ;;  %v1622_v2 = vmul.f32 %v5182_v61, %v1578_v54  ;;  %4231 = vrcp.f32 %v2350_v46 }
 0x2bf   : > { %v1813_v6 = vmul.f32 %v1781_v9, %v1781_v9  ;;  %v4228_v49 = vpop.eup %4227  ;;  %4233 = vpow2.f32 %v1742_v3  ;;  %v2228_v62 = vmul.f32 1.442695, %v5538_v45 }
 0x2c0   : > { %v2445_v55 = vsub.f32 1.0, %v2413_v44  ;;  %v1655_v57 = vadd.f32 %v5186_v5, %v1622_v2  ;;  %v2287_v13 = vadd.f32 1.0, %v4228_v49  ;;  %v1994_v27 = vpack.c.bf16 %v5535_v19, %v5542_v17 }
 0x2c1   : > { %v1845_v43 = vadd.f32 1.0, %v1813_v6  ;;  %4235 = vpow2.f32 %v2228_v62  ;;  %v4230_v53 = vpop.eup %4229 }
 0x2c2   : > { %v2477_v24 = vmul.f32 %v2445_v55, %v5493_v60  ;;  %v5551_v15 = vadd.f32 %v1655_v57, %v5067_v0  ;;  %v2319_v28 = vmul.f32 %v2287_v13, %v2287_v13  ;;  %v2086_v32 = vpop.f32.mrf.mxu3  ;;  %3784 = vmatmul.msk.bf16.gmra.mxu3 %vm935_vm2, %v1994_v27  ;;  %v1908_v0 = vmul.f32 2.0, %v4230_v53 }
 0x2c3   : > { %4237 = vrcp.f32 %v1845_v43  ;;  %v2160_v46 = vmul.f32 %v5468_v12, %v2086_v32 }
 0x2c4   : > { %v1744_v21 = vmul.f32 1.442695, %v5551_v15  ;;  %v2508_v9 = vpack.c.bf16 %v2477_v24, %v2476_v26  ;;  %v4232_v3 = vpop.eup %4231  ;;  %v2351_v54 = vadd.f32 1.0, %v2319_v28  ;;  %v1940_v26 = vsub.f32 1.0, %v1908_v0 }
 0x2c5   : > { %v1581_v31 = vpop.f32.mrf.mxu2  ;;  %v4234_v35 = vpop.eup %4233  ;;  %v5557_v60 = vadd.f32 %v5474_v52, %v2160_v46  ;;  %v2414_v49 = vmul.f32 2.0, %v4232_v3 }
 0x2c6   : > { %4239 = vpow2.f32 %v1744_v21  ;;  %3802 = vmatmul.msk.bf16.vlgmr.msrb.gmra.mxu1 %vm935_vm2, %v2508_v9  ;;  %v1782_v44 = vadd.f32 1.0, %v4234_v35  ;;  %v1623_v2 = vmul.f32 %v5182_v61, %v1581_v31 }
 0x2c7   : > { %4241 = vrcp.f32 %v2351_v54  ;;  %v4236_v6 = vpop.eup %4235  ;;  %v2230_v55 = vmul.f32 1.442695, %v5557_v60  ;;  %v2446_v46 = vsub.f32 1.0, %v2414_v49  ;;  %v5576_v49 = vmul.f32 %v1940_v26, %v5499_v23 }
 0x2c8   : > { %v1814_v57 = vmul.f32 %v1782_v44, %v1782_v44  ;;  %v2288_v43 = vadd.f32 1.0, %v4236_v6  ;;  %v1656_v13 = vadd.f32 %v5186_v5, %v1623_v2 }
 0x2c9   : > { %v4238_v62 = vpop.eup %4237  ;;  %4243 = vpow2.f32 %v2230_v55 }
 0x2ca   : > { %v1909_v27 = vmul.f32 2.0, %v4238_v62  ;;  %v1846_v24 = vadd.f32 1.0, %v1814_v57  ;;  %v2320_v28 = vmul.f32 %v2288_v43, %v2288_v43  ;;  %v5564_v53 = vadd.f32 %v1656_v13, %v5096_v38  ;;  %v2089_v32 = vpop.f32.mrf.mxu3 }
 0x2cb   : > { %v2161_v3 = vmul.f32 %v5468_v12, %v2089_v32  ;;  %v2478_v32 = vmul.f32 %v2446_v46, %v5510_v42 }
 0x2cc   : > { %v4240_v21 = vpop.eup %4239  ;;  %v1941_v9 = vsub.f32 1.0, %v1909_v27  ;;  %4245 = vrcp.f32 %v1846_v24  ;;  %v2352_v31 = vadd.f32 1.0, %v2320_v28  ;;  %v1746_v44 = vmul.f32 1.442695, %v5564_v53 }
 0x2cd   : > { %v4242_v54 = vpop.eup %4241  ;;  %v1783_v35 = vadd.f32 1.0, %v4240_v21  ;;  %v1583_v2 = vpop.f32.mrf.mxu2  ;;  %v5572_v38 = vadd.f32 %v5474_v52, %v2161_v3 }
 0x2ce   : > { %v5569_v0 = vmul.f32 %v1941_v9, %v5518_v7  ;;  %v2415_v6 = vmul.f32 2.0, %v4242_v54  ;;  %v1624_v55 = vmul.f32 %v5182_v61, %v1583_v2  ;;  %4247 = vrcp.f32 %v2352_v31 }
 0x2cf   : > { %v1815_v62 = vmul.f32 %v1783_v35, %v1783_v35  ;;  %v4244_v57 = vpop.eup %4243  ;;  %4249 = vpow2.f32 %v1746_v44  ;;  %v2232_v13 = vmul.f32 1.442695, %v5572_v38 }
 0x2d0   : > { %v2447_v43 = vsub.f32 1.0, %v2415_v6  ;;  %v1657_v27 = vadd.f32 %v5186_v5, %v1624_v55  ;;  %v2289_v24 = vadd.f32 1.0, %v4244_v57  ;;  %v1995_v28 = vpack.c.bf16 %v5569_v0, %v5576_v49 }
 0x2d1   : > { %v1847_v7 = vadd.f32 1.0, %v1815_v62  ;;  %4251 = vpow2.f32 %v2232_v13 }
 0x2d2   : > { %v2479_v21 = vmul.f32 %v2447_v43, %v5524_v33  ;;  %v5585_v23 = vadd.f32 %v1657_v27, %v5099_v39  ;;  %v4246_v26 = vpop.eup %4245  ;;  %v2321_v9 = vmul.f32 %v2289_v24, %v2289_v24  ;;  %v2091_v3 = vpop.f32.mrf.mxu3  ;;  %3785 = vmatmul.msk.bf16.gmra.mxu3 %vm935_vm2, %v1995_v28 }
 0x2d3   : > { %4253 = vrcp.f32 %v1847_v7  ;;  %v2162_v31 = vmul.f32 %v5468_v12, %v2091_v3  ;;  %v1910_v39 = vmul.f32 2.0, %v4246_v26 }
 0x2d4   : > { %v1748_v54 = vmul.f32 1.442695, %v5585_v23  ;;  %v2509_v35 = vpack.c.bf16 %v2479_v21, %v2478_v32  ;;  %v4248_v44 = vpop.eup %4247  ;;  %v2353_v2 = vadd.f32 1.0, %v2321_v9 }
 0x2d5   : > { %v1586_v42 = vpop.f32.mrf.mxu2  ;;  %v4250_v46 = vpop.eup %4249  ;;  %v5591_v33 = vadd.f32 %v5474_v52, %v2162_v31  ;;  %v2416_v57 = vmul.f32 2.0, %v4248_v44  ;;  %v1942_v32 = vsub.f32 1.0, %v1910_v39 }
 0x2d6   : > { %4255 = vpow2.f32 %v1748_v54  ;;  %3803 = vmatmul.msk.bf16.gmra.mxu1 %vm935_vm2, %v2509_v35  ;;  %v1784_v6 = vadd.f32 1.0, %v4250_v46  ;;  %v1625_v55 = vmul.f32 %v5182_v61, %v1586_v42 }
 0x2d7   : > { %4257 = vrcp.f32 %v2353_v2  ;;  %v4252_v62 = vpop.eup %4251  ;;  %v2234_v43 = vmul.f32 1.442695, %v5591_v33  ;;  %v2448_v31 = vsub.f32 1.0, %v2416_v57  ;;  %v5610_v57 = vmul.f32 %v1942_v32, %v5530_v10 }
 0x2d8   : > { %v1816_v27 = vmul.f32 %v1784_v6, %v1784_v6  ;;  %v2290_v7 = vadd.f32 1.0, %v4252_v62  ;;  %v1658_v24 = vadd.f32 %v5186_v5, %v1625_v55 }
 0x2d9   : > { %v4254_v13 = vpop.eup %4253  ;;  %4259 = vpow2.f32 %v2234_v43 }
 0x2da   : > { %v1911_v28 = vmul.f32 2.0, %v4254_v13  ;;  %v1848_v21 = vadd.f32 1.0, %v1816_v27  ;;  %v2322_v9 = vmul.f32 %v2290_v7, %v2290_v7  ;;  %v5598_v26 = vadd.f32 %v1658_v24, %v5123_v29  ;;  %v2094_v3 = vpop.f32.mrf.mxu3 }
 0x2db   : > { %v2163_v44 = vmul.f32 %v5468_v12, %v2094_v3  ;;  %v2480_v3 = vmul.f32 %v2448_v31, %v5538_v45 }
 0x2dc   : > { %v4256_v54 = vpop.eup %4255  ;;  %v1943_v35 = vsub.f32 1.0, %v1911_v28  ;;  %4261 = vrcp.f32 %v1848_v21  ;;  %v2354_v42 = vadd.f32 1.0, %v2322_v9  ;;  %v1750_v6 = vmul.f32 1.442695, %v5598_v26 }
 0x2dd   : > { %v4258_v2 = vpop.eup %4257  ;;  %v1785_v46 = vadd.f32 1.0, %v4256_v54  ;;  %v1588_v55 = vpop.f32.mrf.mxu2  ;;  %v5606_v29 = vadd.f32 %v5474_v52, %v2163_v44 }
 0x2de   : > { %v5603_v39 = vmul.f32 %v1943_v35, %v5551_v15  ;;  %v2417_v62 = vmul.f32 2.0, %v4258_v2  ;;  %v1626_v43 = vmul.f32 %v5182_v61, %v1588_v55  ;;  %4263 = vrcp.f32 %v2354_v42 }
 0x2df   : > { %v1817_v13 = vmul.f32 %v1785_v46, %v1785_v46  ;;  %v4260_v27 = vpop.eup %4259  ;;  %4265 = vpow2.f32 %v1750_v6  ;;  %v2236_v24 = vmul.f32 1.442695, %v5606_v29 }
 0x2e0   : > { %v2449_v7 = vsub.f32 1.0, %v2417_v62  ;;  %v1659_v28 = vadd.f32 %v5186_v5, %v1626_v43  ;;  %v2291_v21 = vadd.f32 1.0, %v4260_v27  ;;  %v1996_v9 = vpack.c.bf16 %v5603_v39, %v5610_v57 }
 0x2e1   : > { %v1849_v15 = vadd.f32 1.0, %v1817_v13  ;;  %4267 = vpow2.f32 %v2236_v24 }
 0x2e2   : > { %v2481_v54 = vmul.f32 %v2449_v7, %v5557_v60  ;;  %v5619_v10 = vadd.f32 %v1659_v28, %v5126_v16  ;;  %v4262_v32 = vpop.eup %4261  ;;  %v2323_v35 = vmul.f32 %v2291_v21, %v2291_v21  ;;  %v2096_v44 = vpop.f32.mrf.mxu3  ;;  %3786 = vmatmul.msk.bf16.gmra.mxu3 %vm935_vm2, %v1996_v9 }
 0x2e3   : > { %4269 = vrcp.f32 %v1849_v15  ;;  %v2164_v42 = vmul.f32 %v5468_v12, %v2096_v44  ;;  %v1912_v16 = vmul.f32 2.0, %v4262_v32 }
 0x2e4   : > { %v1752_v2 = vmul.f32 1.442695, %v5619_v10  ;;  %v2510_v46 = vpack.c.bf16 %v2481_v54, %v2480_v3  ;;  %v4264_v6 = vpop.eup %4263  ;;  %v2355_v55 = vadd.f32 1.0, %v2323_v35 }
 0x2e5   : > { %v1591_v45 = vpop.f32.mrf.mxu2  ;;  %v4266_v31 = vpop.eup %4265  ;;  %v5625_v60 = vadd.f32 %v5474_v52, %v2164_v42  ;;  %v2418_v27 = vmul.f32 2.0, %v4264_v6  ;;  %v1944_v3 = vsub.f32 1.0, %v1912_v16 }
 0x2e6   : > { %4271 = vpow2.f32 %v1752_v2  ;;  %3804 = vmatmul.msk.bf16.gmra.mxu1 %vm935_vm2, %v2510_v46  ;;  %v1786_v62 = vadd.f32 1.0, %v4266_v31  ;;  %v1627_v43 = vmul.f32 %v5182_v61, %v1591_v45 }
 0x2e7   : > { %4273 = vrcp.f32 %v2355_v55  ;;  %v4268_v13 = vpop.eup %4267  ;;  %v2238_v7 = vmul.f32 1.442695, %v5625_v60  ;;  %v2450_v42 = vsub.f32 1.0, %v2418_v27  ;;  %v5644_v27 = vmul.f32 %v1944_v3, %v5564_v53 }
 0x2e8   : > { %v1818_v28 = vmul.f32 %v1786_v62, %v1786_v62  ;;  %v2292_v15 = vadd.f32 1.0, %v4268_v13  ;;  %v1660_v21 = vadd.f32 %v5186_v5, %v1627_v43 }
 0x2e9   : > { %v4270_v24 = vpop.eup %4269  ;;  %4275 = vpow2.f32 %v2238_v7 }
 0x2ea   : > { %v1913_v9 = vmul.f32 2.0, %v4270_v24  ;;  %v1850_v54 = vadd.f32 1.0, %v1818_v28  ;;  %v2324_v35 = vmul.f32 %v2292_v15, %v2292_v15  ;;  %v5632_v32 = vadd.f32 %v1660_v21, %v5142_v59  ;;  %v2099_v44 = vpop.f32.mrf.mxu3 }
 0x2eb   : > { %v2165_v6 = vmul.f32 %v5468_v12, %v2099_v44  ;;  %v2482_v44 = vmul.f32 %v2450_v42, %v5572_v38 }
 0x2ec   : > { %v4272_v2 = vpop.eup %4271  ;;  %v1945_v46 = vsub.f32 1.0, %v1913_v9  ;;  %4277 = vrcp.f32 %v1850_v54  ;;  %v2356_v45 = vadd.f32 1.0, %v2324_v35  ;;  %v1754_v62 = vmul.f32 1.442695, %v5632_v32 }
 0x2ed   : > { %v4274_v55 = vpop.eup %4273  ;;  %v1787_v31 = vadd.f32 1.0, %v4272_v2  ;;  %v1593_v43 = vpop.f32.mrf.mxu2  ;;  %v5640_v59 = vadd.f32 %v5474_v52, %v2165_v6 }
 0x2ee   : > { %v5637_v16 = vmul.f32 %v1945_v46, %v5585_v23  ;;  %v2419_v13 = vmul.f32 2.0, %v4274_v55  ;;  %v1628_v7 = vmul.f32 %v5182_v61, %v1593_v43  ;;  %4279 = vpow2.f32 %v1754_v62 }
 0x2ef   : > { %v1819_v24 = vmul.f32 %v1787_v31, %v1787_v31  ;;  %v4276_v28 = vpop.eup %4275  ;;  %v2240_v21 = vmul.f32 1.442695, %v5640_v59  ;;  %4281 = vrcp.f32 %v2356_v45 }
 0x2f0   : > { %v2451_v15 = vsub.f32 1.0, %v2419_v13  ;;  %v1661_v9 = vadd.f32 %v5186_v5, %v1628_v7  ;;  %v2293_v54 = vadd.f32 1.0, %v4276_v28  ;;  %v1997_v35 = vpack.c.bf16 %v5637_v16, %v5644_v27 }
 0x2f1   : > { %v1851_v23 = vadd.f32 1.0, %v1819_v24  ;;  %4283 = vpow2.f32 %v2240_v21 }
 0x2f2   : > { %v2483_v61 = vmul.f32 %v2451_v15, %v5591_v33  ;;  %v5653_v53 = vadd.f32 %v1661_v9, %v5145_v8  ;;  %v4278_v3 = vpop.eup %4277  ;;  %v2325_v2 = vmul.f32 %v2293_v54, %v2293_v54  ;;  %v2101_v46 = vpop.f32.mrf.mxu3  ;;  %3787 = vmatmul.msk.bf16.gmra.mxu3 %vm935_vm2, %v1997_v35 }
 0x2f3   : > { %4285 = vrcp.f32 %v1851_v23  ;;  %v2166_v6 = vmul.f32 %v5468_v12, %v2101_v46  ;;  %v1914_v45 = vmul.f32 2.0, %v4278_v3 }
 0x2f4   : > { %v1756_v5 = vmul.f32 1.442695, %v5653_v53  ;;  %v2511_v55 = vpack.c.bf16 %v2483_v61, %v2482_v44  ;;  %v2357_v31 = vadd.f32 1.0, %v2325_v2  ;;  %v4280_v38 = vpop.eup %4279 }
 0x2f5   : > { %v5659_v33 = vadd.f32 %v5474_v52, %v2166_v6  ;;  %v4282_v8 = vpop.eup %4281  ;;  %v1788_v42 = vadd.f32 1.0, %v4280_v38  ;;  %v1946_v7 = vsub.f32 1.0, %v1914_v45 }
 0x2f6   : > { %4287 = vpow2.f32 %v1756_v5  ;;  %3805 = vmatmul.msk.bf16.gmra.mxu1 %vm935_vm2, %v2511_v55  ;;  %v2420_v15 = vmul.f32 2.0, %v4282_v8 }
 0x2f7   : > { %4289 = vrcp.f32 %v2357_v31  ;;  %v4284_v62 = vpop.eup %4283  ;;  %v2242_v43 = vmul.f32 1.442695, %v5659_v33  ;;  %v1820_v24 = vmul.f32 %v1788_v42, %v1788_v42  ;;  %v5665_v2 = vmul.f32 %v1946_v7, %v5598_v26 }
 0x2f8   : > { %v2294_v28 = vadd.f32 1.0, %v4284_v62  ;;  %v2452_v6 = vsub.f32 1.0, %v2420_v15 }
 0x2f9   : > { %v4286_v13 = vpop.eup %4285  ;;  %4291 = vpow2.f32 %v2242_v43  ;;  %v1852_v9 = vadd.f32 1.0, %v1820_v24 }
 0x2fa   : > { %v1915_v21 = vmul.f32 2.0, %v4286_v13  ;;  %v2326_v23 = vmul.f32 %v2294_v28, %v2294_v28  ;;  %v2104_v54 = vpop.f32.mrf.mxu3  ;;  %v2484_v7 = vmul.f32 %v2452_v6, %v5606_v29 }
 0x2fb   : > { %v2167_v61 = vmul.f32 %v5468_v12, %v2104_v54  ;;  %4293 = vrcp.f32 %v1852_v9 }
 0x2fc   : > { %v4288_v35 = vpop.eup %4287  ;;  %v1947_v44 = vsub.f32 1.0, %v1915_v21  ;;  %v2358_v46 = vadd.f32 1.0, %v2326_v23  ;;  %v3855_v23 = vld [vmem:[%s6333_s7 + $0x8] sm:$0xff] }
 0x2fd   : > { %v4290_v3 = vpop.eup %4289  ;;  %v1789_v5 = vadd.f32 1.0, %v4288_v35  ;;  %v5671_v31 = vadd.f32 %v5474_v52, %v2167_v61  ;;  %3509 = vmatpush.bf16.msrb.mxu2 %v3855_v23 }
 0x2fe   : > { %v5668_v55 = vmul.f32 %v1947_v44, %v5619_v10  ;;  %v2421_v45 = vmul.f32 2.0, %v4290_v3  ;;  %4295 = vrcp.f32 %v2358_v46 }
 0x2ff   : > { %v1821_v38 = vmul.f32 %v1789_v5, %v1789_v5  ;;  %v4292_v8 = vpop.eup %4291  ;;  %v2244_v62 = vmul.f32 1.442695, %v5671_v31 }
 0x300   : > { %v2453_v42 = vsub.f32 1.0, %v2421_v45  ;;  %v1998_v26 = vpack.c.bf16 %v5668_v55, %v5665_v2  ;;  %v2295_v13 = vadd.f32 1.0, %v4292_v8 }
 0x301   : > { %v1853_v43 = vadd.f32 1.0, %v1821_v38  ;;  %4297 = vpow2.f32 %v2244_v62  ;;  %v4294_v24 = vpop.eup %4293 }
 0x302   : > { %v2485_v10 = vmul.f32 %v2453_v42, %v5625_v60  ;;  %v2327_v28 = vmul.f32 %v2295_v13, %v2295_v13  ;;  %v2106_v15 = vpop.f32.mrf.mxu3  ;;  %3788 = vmatmul.msk.bf16.gmra.mxu3 %vm935_vm2, %v1998_v26  ;;  %v1916_v35 = vmul.f32 2.0, %v4294_v24 }
 0x303   : > { %4299 = vrcp.f32 %v1853_v43  ;;  %v2168_v9 = vmul.f32 %v5468_v12, %v2106_v15 }
 0x304   : > { %v2512_v21 = vpack.c.bf16 %v2485_v10, %v2484_v7  ;;  %v2359_v54 = vadd.f32 1.0, %v2327_v28  ;;  %v4296_v60 = vpop.eup %4295  ;;  %v1948_v5 = vsub.f32 1.0, %v1916_v35 }
 0x305   : > { %v2201_v29 = vadd.f32 %v5474_v52, %v2168_v9  ;;  %v2422_v6 = vmul.f32 2.0, %v4296_v60 }
 0x306   : > { %3806 = vmatmul.msk.bf16.gmra.mxu1 %vm935_vm2, %v2512_v21  ;;  %4301 = vrcp.f32 %v2359_v54  ;;  %v5686_v26 = vmul.f32 %v1948_v5, %v5632_v32 }
 0x307   : > { %v4298_v44 = vpop.eup %4297  ;;  %v2246_v61 = vmul.f32 1.442695, %v2201_v29  ;;  %v2454_v43 = vsub.f32 1.0, %v2422_v6 }
 0x308   : > { %v2296_v46 = vadd.f32 1.0, %v4298_v44 }
 0x309   : > { %v4300_v3 = vpop.eup %4299  ;;  %4303 = vpow2.f32 %v2246_v61  ;;  %v2486_v23 = vmul.f32 %v2454_v43, %v5640_v59 }
 0x30a   : > { %v1917_v45 = vmul.f32 2.0, %v4300_v3  ;;  %v2328_v38 = vmul.f32 %v2296_v46, %v2296_v46 }
 0x30c   : > { %v1949_v8 = vsub.f32 1.0, %v1917_v45  ;;  %v4302_v42 = vpop.eup %4301  ;;  %v2360_v62 = vadd.f32 1.0, %v2328_v38 }
 0x30d   : > { %v2423_v7 = vmul.f32 2.0, %v4302_v42 }
 0x30e   : > { %v5689_v13 = vmul.f32 %v1949_v8, %v5653_v53  ;;  %4305 = vrcp.f32 %v2360_v62 }
 0x30f   : > { %v2109_v10 = vpop.f32.mrf.mxu3  ;;  %v4304_v24 = vpop.eup %4303  ;;  %v2455_v28 = vsub.f32 1.0, %v2423_v7 }
 0x310   : > { %6337 = vst [vmem:[#allocation2_spill] sm:$0xff] %v5689_v13  ;;  %v2169_v15 = vmul.f32 %v5468_v12, %v2109_v10  ;;  %v1999_v21 = vpack.c.bf16 %v5689_v13, %v5686_v26  ;;  %v2297_v9 = vadd.f32 1.0, %v4304_v24 }
 0x311   : > { %v2487_v32 = vmul.f32 %v2455_v28, %v5659_v33 }
 0x312   : > { %v2202_v54 = vadd.f32 %v5474_v52, %v2169_v15  ;;  %v2329_v35 = vmul.f32 %v2297_v9, %v2297_v9  ;;  %3789 = vmatmul.msk.bf16.gmra.mxu3 %vm935_vm2, %v1999_v21 }
 0x313   : > { %v2513_v53 = vpack.c.bf16 %v2487_v32, %v2486_v23 }
 0x314   : > { %v2248_v60 = vmul.f32 1.442695, %v2202_v54  ;;  %v2361_v44 = vadd.f32 1.0, %v2329_v35  ;;  %v4306_v61 = vpop.eup %4305 }
 0x315   : > { %v2424_v5 = vmul.f32 2.0, %v4306_v61 }
 0x316   : > { %4307 = vpow2.f32 %v2248_v60  ;;  %3807 = vmatmul.msk.bf16.gmra.mxu1 %vm935_vm2, %v2513_v53 }
 0x317   : > { %4309 = vrcp.f32 %v2361_v44  ;;  %v2111_v3 = vpop.f32.mrf.mxu3  ;;  %v2456_v8 = vsub.f32 1.0, %v2424_v5 }
 0x318   : > { %v2170_v46 = vmul.f32 %v5468_v12, %v2111_v3 }
 0x319   : > { %v2488_v28 = vmul.f32 %v2456_v8, %v5671_v31 }
 0x31a   : > { %v2203_v59 = vadd.f32 %v5474_v52, %v2170_v46 }
 0x31c   : > { %v4308_v33 = vpop.eup %4307  ;;  %v2250_v6 = vmul.f32 1.442695, %v2203_v59 }
 0x31d   : > { %v4310_v45 = vpop.eup %4309  ;;  %v2298_v38 = vadd.f32 1.0, %v4308_v33 }
 0x31e   : > { %v2425_v42 = vmul.f32 2.0, %v4310_v45  ;;  %4311 = vpow2.f32 %v2250_v6 }
 0x31f   : > { %v2330_v62 = vmul.f32 %v2298_v38, %v2298_v38  ;;  %v2114_v43 = vpop.f32.mrf.mxu3 }
 0x320   : > { %v2457_v7 = vsub.f32 1.0, %v2425_v42  ;;  %v2171_v10 = vmul.f32 %v5468_v12, %v2114_v43 }
 0x321   : > { %v2362_v24 = vadd.f32 1.0, %v2330_v62 }
 0x322   : > { %v2489_v15 = vmul.f32 %v2457_v7, %v2201_v29  ;;  %v2204_v21 = vadd.f32 %v5474_v52, %v2171_v10 }
 0x323   : > { %4313 = vrcp.f32 %v2362_v24 }
 0x324   : > { %v4312_v9 = vpop.eup %4311  ;;  %v2514_v23 = vpack.c.bf16 %v2489_v15, %v2488_v28  ;;  %v2252_v32 = vmul.f32 1.442695, %v2204_v21 }
 0x325   : > { %v2299_v35 = vadd.f32 1.0, %v4312_v9 }
 0x326   : > { %4315 = vpow2.f32 %v2252_v32  ;;  %3808 = vmatmul.msk.bf16.gmra.mxu1 %vm935_vm2, %v2514_v23 }
 0x327   : > { %v2331_v53 = vmul.f32 %v2299_v35, %v2299_v35  ;;  %v2116_v60 = vpop.f32.mrf.mxu3 }
 0x328   : > { %v2172_v44 = vmul.f32 %v5468_v12, %v2116_v60 }
 0x329   : > { %v2363_v61 = vadd.f32 1.0, %v2331_v53  ;;  %v4314_v46 = vpop.eup %4313 }
 0x32a   : > { %v2205_v3 = vadd.f32 %v5474_v52, %v2172_v44  ;;  %v2426_v33 = vmul.f32 2.0, %v4314_v46  ;;  %v5718_v46 = vperm.slane %v5458_v18, 2 }
 0x32b   : > { %4317 = vrcp.f32 %v2363_v61 }
 0x32c   : > { %v4316_v31 = vpop.eup %4315  ;;  %v2254_v29 = vmul.f32 1.442695, %v2205_v3  ;;  %v2458_v8 = vsub.f32 1.0, %v2426_v33 }
 0x32d   : > { %v2300_v5 = vadd.f32 1.0, %v4316_v31 }
 0x32e   : > { %4319 = vpow2.f32 %v2254_v29  ;;  %v2490_v24 = vmul.f32 %v2458_v8, %v2202_v54 }
 0x32f   : > { %v2332_v6 = vmul.f32 %v2300_v5, %v2300_v5 }
 0x331   : > { %v4318_v45 = vpop.eup %4317  ;;  %v2364_v38 = vadd.f32 1.0, %v2332_v6 }
 0x332   : > { %v2427_v42 = vmul.f32 2.0, %v4318_v45  ;;  %v5722_v45 = vperm.slane %v5458_v18, 3 }
 0x333   : > { %4321 = vrcp.f32 %v2364_v38 }
 0x334   : > { %v4320_v62 = vpop.eup %4319  ;;  %v2459_v43 = vsub.f32 1.0, %v2427_v42 }
 0x335   : > { %v2301_v7 = vadd.f32 1.0, %v4320_v62  ;;  %v2119_v10 = vpop.f32.mrf.mxu3 }
 0x336   : > { %v2491_v28 = vmul.f32 %v2459_v43, %v2203_v59  ;;  %v2173_v15 = vmul.f32 %v5468_v12, %v2119_v10 }
 0x337   : > { %v2333_v9 = vmul.f32 %v2301_v7, %v2301_v7 }
 0x338   : > { %v2515_v23 = vpack.c.bf16 %v2491_v28, %v2490_v24  ;;  %v5709_v32 = vadd.f32 %v5474_v52, %v2173_v15 }
 0x339   : > { %v2365_v35 = vadd.f32 1.0, %v2333_v9  ;;  %v4322_v60 = vpop.eup %4321 }
 0x33a   : > { %v2256_v53 = vmul.f32 1.442695, %v5709_v32  ;;  %3809 = vmatmul.msk.bf16.gmra.mxu1 %vm935_vm2, %v2515_v23  ;;  %v2428_v61 = vmul.f32 2.0, %v4322_v60 }
 0x33b   : > { %4323 = vrcp.f32 %v2365_v35 }
 0x33c   : > { %4325 = vpow2.f32 %v2256_v53  ;;  %v2460_v5 = vsub.f32 1.0, %v2428_v61 }
 0x33d   : > { %v2121_v44 = vpop.f32.mrf.mxu3 }
 0x33e   : > { %v2174_v54 = vmul.f32 %v5468_v12, %v2121_v44  ;;  %v2492_v7 = vmul.f32 %v2460_v5, %v2204_v21 }
 0x340   : > { %v5715_v59 = vadd.f32 %v5474_v52, %v2174_v54 }
 0x341   : > { %v4324_v31 = vpop.eup %4323 }
 0x342   : > { %v4326_v29 = vpop.eup %4325  ;;  %v2429_v33 = vmul.f32 2.0, %v4324_v31  ;;  %v2258_v6 = vmul.f32 1.442695, %v5715_v59 }
 0x343   : > { %v2302_v38 = vadd.f32 1.0, %v4326_v29  ;;  %v2598_v8 = vpop.f32.mrf.mxu1 }
 0x344   : > { %v2461_v42 = vsub.f32 1.0, %v2429_v33  ;;  %4327 = vpow2.f32 %v2258_v6  ;;  %v2679_v62 = vmul.f32 %v5718_v46, %v2598_v8 }
 0x345   : > { %v2334_v43 = vmul.f32 %v2302_v38, %v2302_v38  ;;  %v2124_v28 = vpop.f32.mrf.mxu3 }
 0x346   : > { %v2493_v10 = vmul.f32 %v2461_v42, %v2205_v3  ;;  %v2712_v24 = vadd.f32 %v5722_v45, %v2679_v62  ;;  %v2175_v9 = vmul.f32 %v5468_v12, %v2124_v28 }
 0x347   : > { %v2366_v15 = vadd.f32 1.0, %v2334_v43 }
 0x348   : > { %v2516_v23 = vpack.c.bf16 %v2493_v10, %v2492_v7  ;;  %v5728_v35 = vadd.f32 %v2712_v24, %v5258_v51  ;;  %v5731_v18 = vadd.f32 %v5474_v52, %v2175_v9 }
 0x349   : > { %4329 = vrcp.f32 %v2366_v15 }
 0x34a   : > { %v4328_v53 = vpop.eup %4327  ;;  %v2776_v60 = vmul.f32 1.442695, %v5728_v35  ;;  %3810 = vmatmul.msk.bf16.gmra.mxu1 %vm935_vm2, %v2516_v23  ;;  %v2260_v3 = vmul.f32 1.442695, %v5731_v18 }
 0x34b   : > { %v2303_v21 = vadd.f32 1.0, %v4328_v53  ;;  %v2600_v44 = vpop.f32.mrf.mxu1  ;;  %v3854_v53 = vld [vmem:[%s6333_s7] sm:$0xff] }
 0x34c   : > { %4331 = vpow2.f32 %v2776_v60  ;;  %v2680_v61 = vmul.f32 %v5718_v46, %v2600_v44  ;;  %3510 = vmatpush.bf16.msrb.mxu2 %v3854_v53 }
 0x34d   : > { %v2335_v54 = vmul.f32 %v2303_v21, %v2303_v21  ;;  %4333 = vpow2.f32 %v2260_v3  ;;  %v2126_v31 = vpop.f32.mrf.mxu3 }
 0x34e   : > { %v2713_v51 = vadd.f32 %v5722_v45, %v2680_v61  ;;  %v2176_v5 = vmul.f32 %v5468_v12, %v2126_v31 }
 0x34f   : > { %v2367_v29 = vadd.f32 1.0, %v2335_v54  ;;  %v4330_v33 = vpop.eup %4329 }
 0x350   : > { %v5740_v6 = vadd.f32 %v2713_v51, %v5261_v40  ;;  %v5743_v38 = vadd.f32 %v5474_v52, %v2176_v5  ;;  %v2430_v43 = vmul.f32 2.0, %v4330_v33 }
 0x351   : > { %4335 = vrcp.f32 %v2367_v29 }
 0x352   : > { %v4332_v8 = vpop.eup %4331  ;;  %v2778_v42 = vmul.f32 1.442695, %v5740_v6  ;;  %v2262_v10 = vmul.f32 1.442695, %v5743_v38  ;;  %v2462_v3 = vsub.f32 1.0, %v2430_v43 }
 0x353   : > { %v4334_v62 = vpop.eup %4333  ;;  %v2840_v7 = vadd.f32 1.0, %v4332_v8  ;;  %v2603_v24 = vpop.f32.mrf.mxu1 }
 0x354   : > { %v2304_v28 = vadd.f32 1.0, %v4334_v62  ;;  %4337 = vpow2.f32 %v2778_v42  ;;  %v2681_v15 = vmul.f32 %v5718_v46, %v2603_v24  ;;  %v2494_v62 = vmul.f32 %v2462_v3, %v5709_v32  ;;  %v3064_v32 = vld [vmem:[%s6332_s6] sm:$0x3] }
 0x355   : > { %v2872_v9 = vmul.f32 %v2840_v7, %v2840_v7  ;;  %4339 = vpow2.f32 %v2262_v10  ;;  %v2129_v60 = vpop.f32.mrf.mxu3 }
 0x356   : > { %v2336_v40 = vmul.f32 %v2304_v28, %v2304_v28  ;;  %v2714_v23 = vadd.f32 %v5722_v45, %v2681_v15  ;;  %v2177_v61 = vmul.f32 %v5468_v12, %v2129_v60 }
 0x357   : > { %v4336_v21 = vpop.eup %4335  ;;  %v2904_v44 = vadd.f32 1.0, %v2872_v9 }
 0x358   : > { %v2431_v54 = vmul.f32 2.0, %v4336_v21  ;;  %v2368_v51 = vadd.f32 1.0, %v2336_v40  ;;  %v5754_v31 = vadd.f32 %v2714_v23, %v5293_v4  ;;  %v5757_v29 = vadd.f32 %v5474_v52, %v2177_v61 }
 0x359   : > { %4341 = vrcp.f32 %v2904_v44 }
 0x35a   : > { %v4338_v5 = vpop.eup %4337  ;;  %v2463_v33 = vsub.f32 1.0, %v2431_v54  ;;  %v2780_v8 = vmul.f32 1.442695, %v5754_v31  ;;  %4343 = vrcp.f32 %v2368_v51  ;;  %v2264_v7 = vmul.f32 1.442695, %v5757_v29 }
 0x35b   : > { %v4340_v42 = vpop.eup %4339  ;;  %v2841_v43 = vadd.f32 1.0, %v4338_v5  ;;  %v2605_v10 = vpop.f32.mrf.mxu1 }
 0x35c   : > { %v2495_v4 = vmul.f32 %v2463_v33, %v5715_v59  ;;  %v2305_v24 = vadd.f32 1.0, %v4340_v42  ;;  %4345 = vpow2.f32 %v2780_v8  ;;  %v2682_v28 = vmul.f32 %v5718_v46, %v2605_v10 }
 0x35d   : > { %v2873_v15 = vmul.f32 %v2841_v43, %v2841_v43  ;;  %4347 = vpow2.f32 %v2264_v7  ;;  %v2131_v53 = vpop.f32.mrf.mxu3  ;;  %v5776_v8 = vperm.slane %v3064_v32, 0  ;;  %v5779_v43 = vperm.slane %v3064_v32, 1 }
 0x35e   : > { %v2517_v9 = vpack.c.bf16 %v2495_v4, %v2494_v62  ;;  %v2337_v40 = vmul.f32 %v2305_v24, %v2305_v24  ;;  %v2715_v23 = vadd.f32 %v5722_v45, %v2682_v28  ;;  %v2178_v3 = vmul.f32 %v5468_v12, %v2131_v53 }
 0x35f   : > { %v4342_v60 = vpop.eup %4341  ;;  %v2905_v21 = vadd.f32 1.0, %v2873_v15 }
 0x360   : > { %v2968_v59 = vmul.f32 2.0, %v4342_v60  ;;  %v2369_v44 = vadd.f32 1.0, %v2337_v40  ;;  %v5770_v61 = vadd.f32 %v2715_v23, %v5296_v37  ;;  %3811 = vmatmul.msk.bf16.gmra.mxu1 %vm935_vm2, %v2517_v9  ;;  %v4344_v54 = vpop.eup %4343  ;;  %v5774_v51 = vadd.f32 %v5474_v52, %v2178_v3 }
 0x361   : > { %4349 = vrcp.f32 %v2905_v21  ;;  %v2432_v15 = vmul.f32 2.0, %v4344_v54 }
 0x362   : > { %v4346_v5 = vpop.eup %4345  ;;  %v3000_v33 = vsub.f32 1.0, %v2968_v59  ;;  %4351 = vrcp.f32 %v2369_v44  ;;  %v2782_v42 = vmul.f32 1.442695, %v5770_v61  ;;  %v2266_v37 = vmul.f32 1.442695, %v5774_v51 }
 0x363   : > { %v4348_v62 = vpop.eup %4347  ;;  %v2842_v7 = vadd.f32 1.0, %v4346_v5  ;;  %v2608_v10 = vpop.f32.mrf.mxu1 }
 0x364   : > { %v3032_v4 = vmul.f32 %v3000_v33, %v5728_v35  ;;  %v2306_v24 = vadd.f32 1.0, %v4348_v62  ;;  %4353 = vpow2.f32 %v2782_v42  ;;  %v2683_v28 = vmul.f32 %v5718_v46, %v2608_v10 }
 0x365   : > { %v2874_v9 = vmul.f32 %v2842_v7, %v2842_v7  ;;  %4355 = vpow2.f32 %v2266_v37  ;;  %v2134_v60 = vpop.f32.mrf.mxu3  ;;  %v2464_v33 = vsub.f32 1.0, %v2432_v15 }
 0x366   : > { %v3066_v40 = vmul.f32 %v5776_v8, %v3032_v4  ;;  %v2338_v23 = vmul.f32 %v2306_v24, %v2306_v24  ;;  %v2716_v53 = vadd.f32 %v5722_v45, %v2683_v28  ;;  %v2179_v3 = vmul.f32 %v5468_v12, %v2134_v60 }
 0x367   : > { %v4350_v32 = vpop.eup %4349  ;;  %v2906_v21 = vadd.f32 1.0, %v2874_v9  ;;  %v2496_v60 = vmul.f32 %v2464_v33, %v5731_v18 }
 0x368   : > { %v4352_v59 = vpop.eup %4351  ;;  %v5788_v35 = vadd.f32 %v5779_v43, %v3066_v40  ;;  %v2969_v44 = vmul.f32 2.0, %v4350_v32  ;;  %v2370_v5 = vadd.f32 1.0, %v2338_v23  ;;  %v5791_v54 = vadd.f32 %v2716_v53, %v5327_v1 }
 0x369   : > { %v2433_v42 = vmul.f32 2.0, %v4352_v59  ;;  %4357 = vrcp.f32 %v2906_v21  ;;  %v5794_v62 = vadd.f32 %v5474_v52, %v2179_v3 }
 0x36a   : > { %v4354_v7 = vpop.eup %4353  ;;  %v3131_v37 = vmul.f32 1.442695, %v5788_v35  ;;  %v3001_v10 = vsub.f32 1.0, %v2969_v44  ;;  %4359 = vrcp.f32 %v2370_v5  ;;  %v2784_v4 = vmul.f32 1.442695, %v5791_v54 }
 0x36b   : > { %v4356_v24 = vpop.eup %4355  ;;  %v2465_v28 = vsub.f32 1.0, %v2433_v42  ;;  %v2843_v9 = vadd.f32 1.0, %v4354_v7  ;;  %v2268_v40 = vmul.f32 1.442695, %v5794_v62  ;;  %v2610_v1 = vpop.f32.mrf.mxu1 }
 0x36c   : > { %4361 = vpow2.f32 %v3131_v37  ;;  %v3033_v15 = vmul.f32 %v3001_v10, %v5740_v6  ;;  %v2307_v23 = vadd.f32 1.0, %v4356_v24  ;;  %v2684_v53 = vmul.f32 %v5718_v46, %v2610_v1 }
 0x36d   : > { %v2497_v32 = vmul.f32 %v2465_v28, %v5743_v38  ;;  %v2875_v21 = vmul.f32 %v2843_v9, %v2843_v9  ;;  %4363 = vpow2.f32 %v2784_v4  ;;  %v2136_v5 = vpop.f32.mrf.mxu3 }
 0x36e   : > { %v3067_v3 = vmul.f32 %v5776_v8, %v3033_v15  ;;  %v2339_v59 = vmul.f32 %v2307_v23, %v2307_v23  ;;  %4365 = vpow2.f32 %v2268_v40  ;;  %v2717_v44 = vadd.f32 %v5722_v45, %v2684_v53 }
 0x36f   : > { %v4358_v42 = vpop.eup %4357  ;;  %v2518_v7 = vpack.c.bf16 %v2497_v32, %v2496_v60  ;;  %v2907_v37 = vadd.f32 1.0, %v2875_v21  ;;  %v2180_v6 = vmul.f32 %v5468_v12, %v2136_v5 }
 0x370   : > { %v4360_v10 = vpop.eup %4359  ;;  %v2970_v24 = vmul.f32 2.0, %v4358_v42  ;;  %v2371_v1 = vadd.f32 1.0, %v2339_v59  ;;  %v5807_v18 = vadd.f32 %v2717_v44, %v5330_v41  ;;  %v5810_v38 = vadd.f32 %v5779_v43, %v3067_v3 }
 0x371   : > { %v2434_v33 = vmul.f32 2.0, %v4360_v10  ;;  %4367 = vrcp.f32 %v2907_v37  ;;  %v5813_v4 = vadd.f32 %v5474_v52, %v2180_v6  ;;  %3812 = vmatmul.msk.bf16.gmra.mxu1 %vm935_vm2, %v2518_v7 }
 0x372   : > { %v4362_v28 = vpop.eup %4361  ;;  %v3002_v9 = vsub.f32 1.0, %v2970_v24  ;;  %4369 = vrcp.f32 %v2371_v1  ;;  %v2786_v40 = vmul.f32 1.442695, %v5807_v18  ;;  %v3133_v15 = vmul.f32 1.442695, %v5810_v38 }
 0x373   : > { %v4364_v23 = vpop.eup %4363  ;;  %v3195_v41 = vadd.f32 1.0, %v4362_v28  ;;  %v2466_v53 = vsub.f32 1.0, %v2434_v33  ;;  %v2270_v60 = vmul.f32 1.442695, %v5813_v4  ;;  %v2613_v32 = vpop.f32.mrf.mxu1 }
 0x374   : > { %v4366_v21 = vpop.eup %4365  ;;  %v3034_v3 = vmul.f32 %v3002_v9, %v5754_v31  ;;  %v2844_v59 = vadd.f32 1.0, %v4364_v23  ;;  %4371 = vpow2.f32 %v2786_v40  ;;  %v2685_v44 = vmul.f32 %v5718_v46, %v2613_v32 }
 0x375   : > { %v2308_v5 = vadd.f32 1.0, %v4366_v21  ;;  %4373 = vpow2.f32 %v2270_v60  ;;  %v3227_v42 = vmul.f32 %v3195_v41, %v3195_v41  ;;  %v2139_v10 = vpop.f32.mrf.mxu3  ;;  %v2498_v1 = vmul.f32 %v2466_v53, %v5757_v29 }
 0x376   : > { %v3068_v7 = vmul.f32 %v5776_v8, %v3034_v3  ;;  %v2876_v37 = vmul.f32 %v2844_v59, %v2844_v59  ;;  %v2718_v6 = vadd.f32 %v5722_v45, %v2685_v44  ;;  %4375 = vpow2.f32 %v3133_v15 }
 0x377   : > { %v4368_v24 = vpop.eup %4367  ;;  %v2340_v33 = vmul.f32 %v2308_v5, %v2308_v5  ;;  %v2181_v31 = vmul.f32 %v5468_v12, %v2139_v10  ;;  %v3259_v28 = vadd.f32 1.0, %v3227_v42 }
 0x378   : > { %v4370_v9 = vpop.eup %4369  ;;  %v2971_v40 = vmul.f32 2.0, %v4368_v24  ;;  %v2908_v23 = vadd.f32 1.0, %v2876_v37  ;;  %v5826_v60 = vadd.f32 %v2718_v6, %v5364_v47  ;;  %v5829_v41 = vadd.f32 %v5779_v43, %v3068_v7 }
 0x379   : > { %v2435_v32 = vmul.f32 2.0, %v4370_v9  ;;  %v2372_v21 = vadd.f32 1.0, %v2340_v33  ;;  %v5832_v15 = vadd.f32 %v5474_v52, %v2181_v31  ;;  %4377 = vrcp.f32 %v3259_v28 }
 0x37a   : > { %v4372_v29 = vpop.eup %4371  ;;  %v3003_v53 = vsub.f32 1.0, %v2971_v40  ;;  %4379 = vrcp.f32 %v2908_v23  ;;  %v2788_v3 = vmul.f32 1.442695, %v5826_v60  ;;  %v3135_v59 = vmul.f32 1.442695, %v5829_v41 }
 0x37b   : > { %v4374_v44 = vpop.eup %4373  ;;  %v2467_v5 = vsub.f32 1.0, %v2435_v32  ;;  %4381 = vrcp.f32 %v2372_v21  ;;  %v2845_v47 = vadd.f32 1.0, %v4372_v29  ;;  %v2272_v42 = vmul.f32 1.442695, %v5832_v15  ;;  %v2615_v7 = vpop.f32.mrf.mxu1 }
 0x37c   : > { %v4376_v37 = vpop.eup %4375  ;;  %v3035_v6 = vmul.f32 %v3003_v53, %v5770_v61  ;;  %v2309_v10 = vadd.f32 1.0, %v4374_v44  ;;  %4383 = vpow2.f32 %v2788_v3  ;;  %v2686_v24 = vmul.f32 %v5718_v46, %v2615_v7 }
 0x37d   : > { %v2499_v33 = vmul.f32 %v2467_v5, %v5774_v51  ;;  %v2877_v31 = vmul.f32 %v2845_v47, %v2845_v47  ;;  %4385 = vpow2.f32 %v2272_v42  ;;  %v3196_v28 = vadd.f32 1.0, %v4376_v37  ;;  %v2141_v32 = vpop.f32.mrf.mxu3 }
 0x37e   : > { %v3069_v9 = vmul.f32 %v5776_v8, %v3035_v6  ;;  %v2341_v40 = vmul.f32 %v2309_v10, %v2309_v10  ;;  %v2719_v23 = vadd.f32 %v5722_v45, %v2686_v24  ;;  %4387 = vpow2.f32 %v3135_v59 }
 0x37f   : > { %v4378_v21 = vpop.eup %4377  ;;  %v2519_v29 = vpack.c.bf16 %v2499_v33, %v2498_v1  ;;  %v2909_v13 = vadd.f32 1.0, %v2877_v31  ;;  %v2182_v61 = vmul.f32 %v5468_v12, %v2141_v32  ;;  %v3228_v53 = vmul.f32 %v3196_v28, %v3196_v28 }
 0x380   : > { %v4380_v3 = vpop.eup %4379  ;;  %v2373_v44 = vadd.f32 1.0, %v2341_v40  ;;  %v5844_v51 = vadd.f32 %v2719_v23, %v5367_v30  ;;  %v3323_v5 = vmul.f32 2.0, %v4378_v21  ;;  %v5847_v47 = vadd.f32 %v5779_v43, %v3069_v9 }
 0x381   : > { %v4382_v42 = vpop.eup %4381  ;;  %v2972_v7 = vmul.f32 2.0, %v4380_v3  ;;  %4389 = vrcp.f32 %v2909_v13  ;;  %v5850_v59 = vadd.f32 %v5474_v52, %v2182_v61  ;;  %3813 = vmatmul.msk.bf16.gmra.mxu1 %vm935_vm2, %v2519_v29  ;;  %v3260_v1 = vadd.f32 1.0, %v3228_v53 }
 0x382   : > { %v4384_v37 = vpop.eup %4383  ;;  %v2436_v6 = vmul.f32 2.0, %v4382_v42  ;;  %4391 = vrcp.f32 %v2373_v44  ;;  %v2790_v10 = vmul.f32 1.442695, %v5844_v51  ;;  %v3355_v30 = vsub.f32 1.0, %v3323_v5 }
 0x383   : > { %v4386_v24 = vpop.eup %4385  ;;  %v3004_v33 = vsub.f32 1.0, %v2972_v7  ;;  %v2846_v31 = vadd.f32 1.0, %v4384_v37  ;;  %v2274_v28 = vmul.f32 1.442695, %v5850_v59  ;;  %v2618_v9 = vpop.f32.mrf.mxu1  ;;  %4393 = vrcp.f32 %v3260_v1 }
 0x384   : > { %v4388_v13 = vpop.eup %4387  ;;  %v2468_v40 = vsub.f32 1.0, %v2436_v6  ;;  %v2310_v23 = vadd.f32 1.0, %v4386_v24  ;;  %4395 = vpow2.f32 %v2790_v10  ;;  %v2687_v32 = vmul.f32 %v5718_v46, %v2618_v9 }
 0x385   : > { %v3036_v21 = vmul.f32 %v3004_v33, %v5791_v54  ;;  %v2878_v29 = vmul.f32 %v2846_v31, %v2846_v31  ;;  %4397 = vpow2.f32 %v2274_v28  ;;  %v2144_v3 = vpop.f32.mrf.mxu3  ;;  %v5859_v44 = vmul.f32 %v3355_v30, %v5788_v35 }
 0x386   : > { %v2342_v61 = vmul.f32 %v2310_v23, %v2310_v23  ;;  %v2720_v53 = vadd.f32 %v5722_v45, %v2687_v32  ;;  %v3137_v5 = vmul.f32 1.442695, %v5847_v47  ;;  %v2500_v7 = vmul.f32 %v2468_v40, %v5794_v62 }
 0x387   : > { %v4390_v42 = vpop.eup %4389  ;;  %v2910_v1 = vadd.f32 1.0, %v2878_v29  ;;  %v2183_v37 = vmul.f32 %v5468_v12, %v2144_v3  ;;  %v3197_v6 = vadd.f32 1.0, %v4388_v13  ;;  %v3070_v3 = vmul.f32 %v5776_v8, %v3036_v21 }
 0x388   : > { %v4392_v10 = vpop.eup %4391  ;;  %v2973_v54 = vmul.f32 2.0, %v4390_v42  ;;  %v2374_v24 = vadd.f32 1.0, %v2342_v61  ;;  %v5865_v33 = vadd.f32 %v2720_v53, %v5388_v20  ;;  %4399 = vpow2.f32 %v3137_v5 }
 0x389   : > { %v4394_v31 = vpop.eup %4393  ;;  %v2437_v28 = vmul.f32 2.0, %v4392_v10  ;;  %4401 = vrcp.f32 %v2910_v1  ;;  %v5868_v35 = vadd.f32 %v5474_v52, %v2183_v37  ;;  %v3229_v30 = vmul.f32 %v3197_v6, %v3197_v6 }
 0x38a   : > { %v4396_v9 = vpop.eup %4395  ;;  %v3005_v62 = vsub.f32 1.0, %v2973_v54  ;;  %4403 = vrcp.f32 %v2374_v24  ;;  %v2792_v40 = vmul.f32 1.442695, %v5865_v33  ;;  %v3324_v13 = vmul.f32 2.0, %v4394_v31 }
 0x38b   : > { %v4398_v23 = vpop.eup %4397  ;;  %v2469_v32 = vsub.f32 1.0, %v2437_v28  ;;  %v2847_v29 = vadd.f32 1.0, %v4396_v9  ;;  %v2276_v20 = vmul.f32 1.442695, %v5868_v35  ;;  %v2620_v61 = vpop.f32.mrf.mxu1  ;;  %v3261_v53 = vadd.f32 1.0, %v3229_v30 }
 0x38c   : > { %v2311_v5 = vadd.f32 1.0, %v4398_v23  ;;  %4405 = vpow2.f32 %v2792_v40  ;;  %v2688_v42 = vmul.f32 %v5718_v46, %v2620_v61  ;;  %v3356_v6 = vsub.f32 1.0, %v3324_v13 }
 0x38d   : > { %v2501_v1 = vmul.f32 %v2469_v32, %v5813_v4  ;;  %v2879_v37 = vmul.f32 %v2847_v29, %v2847_v29  ;;  %4407 = vpow2.f32 %v2276_v20  ;;  %v3037_v54 = vmul.f32 %v3005_v62, %v5807_v18  ;;  %v2146_v28 = vpop.f32.mrf.mxu3 }
 0x38e   : > { %v4400_v10 = vpop.eup %4399  ;;  %v2343_v24 = vmul.f32 %v2311_v5, %v2311_v5  ;;  %v2721_v31 = vadd.f32 %v5722_v45, %v2688_v42  ;;  %4409 = vrcp.f32 %v3261_v53  ;;  %v2184_v40 = vmul.f32 %v5468_v12, %v2146_v28 }
 0x38f   : > { %v4402_v30 = vpop.eup %4401  ;;  %v2520_v9 = vpack.c.bf16 %v2501_v1, %v2500_v7  ;;  %v2911_v21 = vadd.f32 1.0, %v2879_v37  ;;  %v3388_v23 = vmul.f32 %v3356_v6, %v5810_v38  ;;  %v3198_v29 = vadd.f32 1.0, %v4400_v10 }
 0x390   : > { %v4404_v61 = vpop.eup %4403  ;;  %v2974_v4 = vmul.f32 2.0, %v4402_v30  ;;  %v2375_v32 = vadd.f32 1.0, %v2343_v24  ;;  %v5880_v13 = vadd.f32 %v2721_v31, %v5391_v58  ;;  %v5883_v62 = vadd.f32 %v5474_v52, %v2184_v40 }
 0x391   : > { %v2438_v18 = vmul.f32 2.0, %v4404_v61  ;;  %4411 = vrcp.f32 %v2911_v21  ;;  %v3419_v20 = vpack.c.bf16 %v3388_v23, %v5859_v44  ;;  %3814 = vmatmul.msk.bf16.gmra.mxu1 %vm935_vm2, %v2520_v9  ;;  %v3230_v5 = vmul.f32 %v3198_v29, %v3198_v29 }
 0x392   : > { %v4406_v7 = vpop.eup %4405  ;;  %v3006_v53 = vsub.f32 1.0, %v2974_v4  ;;  %4413 = vrcp.f32 %v2375_v32  ;;  %v2794_v38 = vmul.f32 1.442695, %v5880_v13  ;;  %v3071_v58 = vmul.f32 %v5776_v8, %v3037_v54 }
 0x393   : > { %v4408_v42 = vpop.eup %4407  ;;  %v2848_v1 = vadd.f32 1.0, %v4406_v7  ;;  %v2278_v37 = vmul.f32 1.442695, %v5883_v62  ;;  %3826 = vmatmul.msk.bf16.vlgmr.msrb.gmra.mxu2 %vm935_vm2, %v3419_v20  ;;  %v2623_v6 = vpop.f32.mrf.mxu1  ;;  %v2470_v28 = vsub.f32 1.0, %v2438_v18  ;;  %v3262_v9 = vadd.f32 1.0, %v3230_v5 }
 0x394   : > { %v4410_v10 = vpop.eup %4409  ;;  %v3038_v44 = vmul.f32 %v3006_v53, %v5826_v60  ;;  %v2312_v24 = vadd.f32 1.0, %v4408_v42  ;;  %4415 = vpow2.f32 %v2794_v38  ;;  %v2689_v31 = vmul.f32 %v5718_v46, %v2623_v6 }
 0x395   : > { %v2880_v30 = vmul.f32 %v2848_v1, %v2848_v1  ;;  %4417 = vpow2.f32 %v2278_v37  ;;  %v2149_v23 = vpop.f32.mrf.mxu3  ;;  %v5896_v61 = vadd.f32 %v5779_v43, %v3070_v3  ;;  %v3325_v29 = vmul.f32 2.0, %v4410_v10 }
 0x396   : > { %v3072_v21 = vmul.f32 %v5776_v8, %v3038_v44  ;;  %v2344_v54 = vmul.f32 %v2312_v24, %v2312_v24  ;;  %v2722_v40 = vadd.f32 %v5722_v45, %v2689_v31  ;;  %v2185_v60 = vmul.f32 %v5468_v12, %v2149_v23 }
 0x397   : > { %v4412_v4 = vpop.eup %4411  ;;  %v2912_v32 = vadd.f32 1.0, %v2880_v30  ;;  %4419 = vrcp.f32 %v3262_v9  ;;  %v2502_v5 = vmul.f32 %v2470_v28, %v5832_v15  ;;  %v5913_v15 = vadd.f32 %v5779_v43, %v3071_v58 }
 0x398   : > { %v4414_v20 = vpop.eup %4413  ;;  %v5900_v18 = vadd.f32 %v5779_v43, %v3072_v21  ;;  %v2975_v7 = vmul.f32 2.0, %v4412_v4  ;;  %v2376_v53 = vadd.f32 1.0, %v2344_v54  ;;  %v5903_v38 = vadd.f32 %v2722_v40, %v5404_v14 }
 0x399   : > { %v2439_v42 = vmul.f32 2.0, %v4414_v20  ;;  %4421 = vrcp.f32 %v2912_v32  ;;  %v5907_v3 = vadd.f32 %v5474_v52, %v2185_v60  ;;  %v3357_v21 = vsub.f32 1.0, %v3325_v29 }
 0x39a   : > { %v4416_v1 = vpop.eup %4415  ;;  %v3143_v37 = vmul.f32 1.442695, %v5900_v18  ;;  %v3007_v6 = vsub.f32 1.0, %v2975_v7  ;;  %4423 = vrcp.f32 %v2376_v53  ;;  %v2796_v10 = vmul.f32 1.442695, %v5903_v38 }
 0x39b   : > { %v4418_v44 = vpop.eup %4417  ;;  %v2471_v24 = vsub.f32 1.0, %v2439_v42  ;;  %v2849_v31 = vadd.f32 1.0, %v4416_v1  ;;  %v2280_v14 = vmul.f32 1.442695, %v5907_v3  ;;  %v2625_v30 = vpop.f32.mrf.mxu1  ;;  %v3139_v4 = vmul.f32 1.442695, %v5896_v61 }
 0x39c   : > { %4425 = vpow2.f32 %v3143_v37  ;;  %v2313_v28 = vadd.f32 1.0, %v4418_v44  ;;  %v2690_v9 = vmul.f32 %v5718_v46, %v2625_v30  ;;  %v3039_v32 = vmul.f32 %v3007_v6, %v5844_v51 }
 0x39d   : > { %v4420_v54 = vpop.eup %4419  ;;  %v2503_v40 = vmul.f32 %v2471_v24, %v5850_v59  ;;  %v2881_v23 = vmul.f32 %v2849_v31, %v2849_v31  ;;  %4427 = vpow2.f32 %v2796_v10  ;;  %v2151_v58 = vpop.f32.mrf.mxu3 }
 0x39e   : > { %v2345_v60 = vmul.f32 %v2313_v28, %v2313_v28  ;;  %4429 = vpow2.f32 %v2280_v14  ;;  %v2723_v20 = vadd.f32 %v5722_v45, %v2690_v9  ;;  %v2186_v1 = vmul.f32 %v5468_v12, %v2151_v58 }
 0x39f   : > { %v4422_v7 = vpop.eup %4421  ;;  %v2521_v53 = vpack.c.bf16 %v2503_v40, %v2502_v5  ;;  %v2913_v42 = vadd.f32 1.0, %v2881_v23  ;;  %v3326_v29 = vmul.f32 2.0, %v4420_v54  ;;  %4431 = vpow2.f32 %v3139_v4 }
 0x3a0   : > { %v4424_v37 = vpop.eup %4423  ;;  %v2976_v44 = vmul.f32 2.0, %v4422_v7  ;;  %v2377_v59 = vadd.f32 1.0, %v2345_v60  ;;  %v5922_v10 = vadd.f32 %v2723_v20, %v5407_v36  ;;  %v5925_v51 = vadd.f32 %v5474_v52, %v2186_v1 }
 0x3a1   : > { %v2440_v24 = vmul.f32 2.0, %v4424_v37  ;;  %4433 = vrcp.f32 %v2913_v42  ;;  %v3358_v6 = vsub.f32 1.0, %v3326_v29  ;;  %3815 = vmatmul.msk.bf16.gmra.mxu1 %vm935_vm2, %v2521_v53  ;;  %v3141_v14 = vmul.f32 1.442695, %v5913_v15 }
 0x3a2   : > { %v4426_v5 = vpop.eup %4425  ;;  %v3008_v31 = vsub.f32 1.0, %v2976_v44  ;;  %4435 = vrcp.f32 %v2377_v59  ;;  %v2798_v12 = vmul.f32 1.442695, %v5922_v10  ;;  %v3073_v36 = vmul.f32 %v5776_v8, %v3039_v32 }
 0x3a3   : > { %v4428_v30 = vpop.eup %4427  ;;  %v2282_v28 = vmul.f32 1.442695, %v5925_v51  ;;  %v3389_v9 = vmul.f32 %v3357_v21, %v5829_v41  ;;  %v3390_v52 = vmul.f32 %v3358_v6, %v5847_v47  ;;  %v2628_v54 = vpop.f32.mrf.mxu1  ;;  %v2472_v20 = vsub.f32 1.0, %v2440_v24 }
 0x3a4   : > { %v4430_v40 = vpop.eup %4429  ;;  %v3040_v23 = vmul.f32 %v3008_v31, %v5865_v33  ;;  %v2850_v4 = vadd.f32 1.0, %v4428_v30  ;;  %4437 = vpow2.f32 %v2798_v12  ;;  %v2691_v60 = vmul.f32 %v5718_v46, %v2628_v54 }
 0x3a5   : > { %v2314_v58 = vadd.f32 1.0, %v4430_v40  ;;  %4439 = vpow2.f32 %v2282_v28  ;;  %v3420_v7 = vpack.c.bf16 %v3390_v52, %v3389_v9  ;;  %v4432_v53 = vpop.eup %4431  ;;  %v3201_v21 = vadd.f32 1.0, %v4426_v5 }
 0x3a6   : > { %v2882_v32 = vmul.f32 %v2850_v4, %v2850_v4  ;;  %v2724_v42 = vadd.f32 %v5722_v45, %v2691_v60  ;;  %4441 = vpow2.f32 %v3141_v14  ;;  %v3199_v1 = vadd.f32 1.0, %v4432_v53 }
 0x3a7   : > { %v4434_v41 = vpop.eup %4433  ;;  %v2346_v47 = vmul.f32 %v2314_v58, %v2314_v58  ;;  %3827 = vmatmul.msk.bf16.gmra.mxu2 %vm935_vm2, %v3420_v7  ;;  %v5939_v33 = vadd.f32 %v5779_v43, %v3073_v36  ;;  %v3074_v37 = vmul.f32 %v5776_v8, %v3040_v23  ;;  %v2504_v6 = vmul.f32 %v2472_v20, %v5868_v35 }
 0x3a8   : > { %v4436_v29 = vpop.eup %4435  ;;  %v2977_v44 = vmul.f32 2.0, %v4434_v41  ;;  %v2914_v59 = vadd.f32 1.0, %v2882_v32  ;;  %v5943_v24 = vadd.f32 %v2724_v42, %v5419_v63  ;;  %v3231_v5 = vmul.f32 %v3199_v1, %v3199_v1 }
 0x3a9   : > { %v2441_v31 = vmul.f32 2.0, %v4436_v29  ;;  %v2378_v12 = vadd.f32 1.0, %v2346_v47  ;;  %v3145_v36 = vmul.f32 1.442695, %v5939_v33  ;;  %v5949_v4 = vadd.f32 %v5779_v43, %v3074_v37 }
 0x3aa   : > { %v4438_v14 = vpop.eup %4437  ;;  %v3009_v30 = vsub.f32 1.0, %v2977_v44  ;;  %4443 = vrcp.f32 %v2914_v59  ;;  %v2800_v28 = vmul.f32 1.442695, %v5943_v24  ;;  %v3263_v23 = vadd.f32 1.0, %v3231_v5 }
 0x3ab   : > { %v4440_v9 = vpop.eup %4439  ;;  %v2473_v52 = vsub.f32 1.0, %v2441_v31  ;;  %4445 = vrcp.f32 %v2378_v12  ;;  %v2851_v54 = vadd.f32 1.0, %v4438_v14  ;;  %v2630_v40 = vpop.f32.mrf.mxu1  ;;  %v3233_v5 = vmul.f32 %v3201_v21, %v3201_v21 }
 0x3ac   : > { %v4442_v63 = vpop.eup %4441  ;;  %v3041_v35 = vmul.f32 %v3009_v30, %v5880_v13  ;;  %v2315_v60 = vadd.f32 1.0, %v4440_v9  ;;  %v2692_v20 = vmul.f32 %v5718_v46, %v2630_v40  ;;  %4447 = vpow2.f32 %v2800_v28 }
 0x3ad   : > { %v2505_v58 = vmul.f32 %v2473_v52, %v5883_v62  ;;  %v2883_v7 = vmul.f32 %v2851_v54, %v2851_v54  ;;  %v3200_v53 = vadd.f32 1.0, %v4442_v63  ;;  %4449 = vrcp.f32 %v3263_v23 }
 0x3ae   : > { %v3075_v32 = vmul.f32 %v5776_v8, %v3041_v35  ;;  %v2347_v42 = vmul.f32 %v2315_v60, %v2315_v60  ;;  %v2725_v41 = vadd.f32 %v5722_v45, %v2692_v20  ;;  %4451 = vpow2.f32 %v3145_v36 }
 0x3af   : > { %v2522_v47 = vpack.c.bf16 %v2505_v58, %v2504_v6  ;;  %v2915_v1 = vadd.f32 1.0, %v2883_v7  ;;  %v3232_v29 = vmul.f32 %v3200_v53, %v3200_v53  ;;  %v3147_v6 = vmul.f32 1.442695, %v5949_v4 }
 0x3b0   : > { %v4444_v37 = vpop.eup %4443  ;;  %v5957_v13 = vadd.f32 %v5779_v43, %v3075_v32  ;;  %v2379_v44 = vadd.f32 1.0, %v2347_v42  ;;  %v5960_v62 = vadd.f32 %v2725_v41, %v5421_v25  ;;  %v3265_v21 = vadd.f32 1.0, %v3233_v5 }
 0x3b1   : > { %v4446_v59 = vpop.eup %4445  ;;  %v2978_v31 = vmul.f32 2.0, %v4444_v37  ;;  %4453 = vrcp.f32 %v2915_v1  ;;  %v3264_v12 = vadd.f32 1.0, %v3232_v29  ;;  %3816 = vmatmul.msk.bf16.gmra.mxu1 %vm935_vm2, %v2522_v47 }
 0x3b2   : > { %v3149_v14 = vmul.f32 1.442695, %v5957_v13  ;;  %4455 = vrcp.f32 %v2379_v44  ;;  %v2802_v30 = vmul.f32 1.442695, %v5960_v62  ;;  %v4448_v28 = vpop.eup %4447  ;;  %v2442_v9 = vmul.f32 2.0, %v4446_v59 }
 0x3b3   : > { %v3010_v36 = vsub.f32 1.0, %v2978_v31  ;;  %4457 = vrcp.f32 %v3264_v12  ;;  %v4450_v25 = vpop.eup %4449  ;;  %v2852_v52 = vadd.f32 1.0, %v4448_v28 }
 0x3b4   : > { %4459 = vpow2.f32 %v3149_v14  ;;  %v4452_v54 = vpop.eup %4451  ;;  %v3327_v23 = vmul.f32 2.0, %v4450_v25  ;;  %v2474_v20 = vsub.f32 1.0, %v2442_v9 }
 0x3b5   : > { %v3042_v40 = vmul.f32 %v3010_v36, %v5903_v38  ;;  %4461 = vpow2.f32 %v2802_v30  ;;  %v2884_v63 = vmul.f32 %v2852_v52, %v2852_v52  ;;  %v3202_v35 = vadd.f32 1.0, %v4452_v54 }
 0x3b6   : > { %4463 = vpow2.f32 %v3147_v6  ;;  %v3359_v38 = vsub.f32 1.0, %v3327_v23  ;;  %v2506_v54 = vmul.f32 %v2474_v20, %v5907_v3 }
 0x3b7   : > { %v4454_v60 = vpop.eup %4453  ;;  %v2633_v58 = vpop.f32.mrf.mxu1  ;;  %v2916_v32 = vadd.f32 1.0, %v2884_v63  ;;  %v3234_v41 = vmul.f32 %v3202_v35, %v3202_v35  ;;  %v3076_v1 = vmul.f32 %v5776_v8, %v3042_v40  ;;  %4465 = vrcp.f32 %v3265_v21 }
 0x3b8   : > { %v4456_v7 = vpop.eup %4455  ;;  %v2979_v53 = vmul.f32 2.0, %v4454_v60  ;;  %v2693_v42 = vmul.f32 %v5718_v46, %v2633_v58  ;;  %v3391_v23 = vmul.f32 %v3359_v38, %v5896_v61 }
 0x3b9   : > { %v4458_v47 = vpop.eup %4457  ;;  %v2443_v29 = vmul.f32 2.0, %v4456_v7  ;;  %4467 = vrcp.f32 %v2916_v32  ;;  %v3266_v14 = vadd.f32 1.0, %v3234_v41  ;;  %v5975_v52 = vadd.f32 %v5779_v43, %v3076_v1 }
 0x3ba   : > { %v4460_v37 = vpop.eup %4459  ;;  %v3011_v44 = vsub.f32 1.0, %v2979_v53  ;;  %v3328_v59 = vmul.f32 2.0, %v4458_v47  ;;  %v2726_v31 = vadd.f32 %v5722_v45, %v2693_v42 }
 0x3bb   : > { %v4462_v12 = vpop.eup %4461  ;;  %v3204_v5 = vadd.f32 1.0, %v4460_v37  ;;  %v2475_v6 = vsub.f32 1.0, %v2443_v29  ;;  %4469 = vrcp.f32 %v3266_v14  ;;  %v3151_v61 = vmul.f32 1.442695, %v5975_v52 }
 0x3bc   : > { %v4464_v30 = vpop.eup %4463  ;;  %v3043_v28 = vmul.f32 %v3011_v44, %v5922_v10  ;;  %v2853_v36 = vadd.f32 1.0, %v4462_v12  ;;  %v3360_v9 = vsub.f32 1.0, %v3328_v59  ;;  %v5972_v25 = vadd.f32 %v2726_v31, %v5437_v22 }
 0x3bd   : > { %v2507_v40 = vmul.f32 %v2475_v6, %v5925_v51  ;;  %v4466_v60 = vpop.eup %4465  ;;  %v3203_v58 = vadd.f32 1.0, %v4464_v30  ;;  %v3236_v53 = vmul.f32 %v3204_v5, %v3204_v5 }
 0x3be   : > { %v3077_v21 = vmul.f32 %v5776_v8, %v3043_v28  ;;  %v2885_v63 = vmul.f32 %v2853_v36, %v2853_v36  ;;  %v3392_v35 = vmul.f32 %v3360_v9, %v5913_v15  ;;  %v2804_v10 = vmul.f32 1.442695, %v5972_v25 }
 0x3bf   : > { %v2523_v22 = vpack.c.bf16 %v2507_v40, %v2506_v54  ;;  %v2635_v7 = vpop.f32.mrf.mxu1  ;;  %v4468_v32 = vpop.eup %4467  ;;  %v3329_v1 = vmul.f32 2.0, %v4466_v60  ;;  %v3235_v38 = vmul.f32 %v3203_v58, %v3203_v58  ;;  %v3268_v37 = vadd.f32 1.0, %v3236_v53 }
 0x3c0   : > { %v5984_v3 = vadd.f32 %v5779_v43, %v3077_v21  ;;  %v2917_v51 = vadd.f32 1.0, %v2885_v63  ;;  %v3421_v20 = vpack.c.bf16 %v3392_v35, %v3391_v23  ;;  %4471 = vpow2.f32 %v2804_v10 }
 0x3c1   : > { %v2980_v42 = vmul.f32 2.0, %v4468_v32  ;;  %v2694_v15 = vmul.f32 %v5718_v46, %v2635_v7  ;;  %3817 = vmatmul.msk.bf16.gmra.mxu1 %vm935_vm2, %v2523_v22  ;;  %v4470_v44 = vpop.eup %4469  ;;  %v3361_v14 = vsub.f32 1.0, %v3329_v1  ;;  %v3267_v36 = vadd.f32 1.0, %v3235_v38 }
 0x3c2   : > { %v3153_v41 = vmul.f32 1.442695, %v5984_v3  ;;  %4473 = vrcp.f32 %v2917_v51  ;;  %3828 = vmatmul.msk.bf16.gmra.mxu2 %vm935_vm2, %v3421_v20  ;;  %v3330_v5 = vmul.f32 2.0, %v4470_v44 }
 0x3c3   : > { %v3012_v47 = vsub.f32 1.0, %v2980_v42  ;;  %v2727_v29 = vadd.f32 %v5722_v45, %v2694_v15  ;;  %v3393_v53 = vmul.f32 %v3361_v14, %v5900_v18 }
 0x3c4   : > { %4475 = vpow2.f32 %v3153_v41  ;;  %v3362_v40 = vsub.f32 1.0, %v3330_v5 }
 0x3c5   : > { %4477 = vpow2.f32 %v3151_v61  ;;  %v3044_v59 = vmul.f32 %v3012_v47, %v5943_v24  ;;  %v5994_v31 = vadd.f32 %v2727_v29, %v5439_v50 }
 0x3c6   : > { %v4472_v12 = vpop.eup %4471  ;;  %4479 = vrcp.f32 %v3268_v37  ;;  %v3394_v63 = vmul.f32 %v3362_v40, %v5939_v33 }
 0x3c7   : > { %v2854_v6 = vadd.f32 1.0, %v4472_v12  ;;  %v2806_v30 = vmul.f32 1.442695, %v5994_v31  ;;  %v2638_v28 = vpop.f32.mrf.mxu1  ;;  %v3078_v54 = vmul.f32 %v5776_v8, %v3044_v59 }
 0x3c8   : > { %v4474_v9 = vpop.eup %4473  ;;  %v2695_v23 = vmul.f32 %v5718_v46, %v2638_v28  ;;  %v3422_v33 = vpack.c.bf16 %v3394_v63, %v3393_v53 }
 0x3c9   : > { %v2981_v21 = vmul.f32 2.0, %v4474_v9  ;;  %v2886_v24 = vmul.f32 %v2854_v6, %v2854_v6  ;;  %4481 = vpow2.f32 %v2806_v30  ;;  %v6002_v7 = vadd.f32 %v5779_v43, %v3078_v54 }
 0x3ca   : > { %v4476_v50 = vpop.eup %4475  ;;  %v2728_v35 = vadd.f32 %v5722_v45, %v2695_v23  ;;  %4483 = vrcp.f32 %v3267_v36 }
 0x3cb   : > { %v4478_v10 = vpop.eup %4477  ;;  %v3206_v60 = vadd.f32 1.0, %v4476_v50  ;;  %v3013_v58 = vsub.f32 1.0, %v2981_v21  ;;  %v2918_v22 = vadd.f32 1.0, %v2886_v24  ;;  %v3155_v29 = vmul.f32 1.442695, %v6002_v7 }
 0x3cc   : > { %v6006_v32 = vadd.f32 %v2728_v35, %v5462_v11  ;;  %v4480_v20 = vpop.eup %4479  ;;  %v3205_v61 = vadd.f32 1.0, %v4478_v10 }
 0x3cd   : > { %v3045_v51 = vmul.f32 %v3013_v58, %v5960_v62  ;;  %4485 = vrcp.f32 %v2918_v22  ;;  %v3238_v1 = vmul.f32 %v3206_v60, %v3206_v60  ;;  %v3332_v44 = vmul.f32 2.0, %v4480_v20 }
 0x3ce   : > { %v2808_v42 = vmul.f32 1.442695, %v6006_v32  ;;  %v3237_v12 = vmul.f32 %v3205_v61, %v3205_v61 }
 0x3cf   : > { %v4482_v15 = vpop.eup %4481  ;;  %v3079_v41 = vmul.f32 %v5776_v8, %v3045_v51  ;;  %v2640_v47 = vpop.f32.mrf.mxu1  ;;  %v3270_v6 = vadd.f32 1.0, %v3238_v1  ;;  %v3364_v40 = vsub.f32 1.0, %v3332_v44 }
 0x3d0   : > { %v2855_v38 = vadd.f32 1.0, %v4482_v15  ;;  %4487 = vpow2.f32 %v2808_v42  ;;  %v2696_v11 = vmul.f32 %v5718_v46, %v2640_v47  ;;  %v4484_v18 = vpop.eup %4483  ;;  %v3269_v21 = vadd.f32 1.0, %v3237_v12 }
 0x3d1   : > { %v6014_v62 = vadd.f32 %v5779_v43, %v3079_v41  ;;  %4489 = vpow2.f32 %v3155_v29  ;;  %v3331_v28 = vmul.f32 2.0, %v4484_v18 }
 0x3d2   : > { %3829 = vmatmul.msk.bf16.gmra.mxu2 %vm935_vm2, %v3422_v33  ;;  %v2887_v37 = vmul.f32 %v2855_v38, %v2855_v38  ;;  %v2729_v59 = vadd.f32 %v5722_v45, %v2696_v11 }
 0x3d3   : > { %v3157_v5 = vmul.f32 1.442695, %v6014_v62  ;;  %v4486_v14 = vpop.eup %4485  ;;  %v3363_v63 = vsub.f32 1.0, %v3331_v28 }
 0x3d4   : > { %v2919_v30 = vadd.f32 1.0, %v2887_v37  ;;  %v6020_v36 = vadd.f32 %v2729_v59, %v5464_v48  ;;  %v2982_v9 = vmul.f32 2.0, %v4486_v14  ;;  %v3396_v48 = vmul.f32 %v3364_v40, %v5957_v13 }
 0x3d5   : > { %4491 = vpow2.f32 %v3157_v5  ;;  %v3395_v61 = vmul.f32 %v3363_v63, %v5949_v4 }
 0x3d6   : > { %v4488_v54 = vpop.eup %4487  ;;  %4493 = vrcp.f32 %v2919_v30  ;;  %v2810_v23 = vmul.f32 1.442695, %v6020_v36  ;;  %v3014_v24 = vsub.f32 1.0, %v2982_v9 }
 0x3d7   : > { %v2856_v50 = vadd.f32 1.0, %v4488_v54  ;;  %4495 = vrcp.f32 %v3270_v6  ;;  %v4490_v60 = vpop.eup %4489  ;;  %v3423_v47 = vpack.c.bf16 %v3396_v48, %v3395_v61 }
 0x3d8   : > { %4497 = vpow2.f32 %v2810_v23  ;;  %v3046_v35 = vmul.f32 %v3014_v24, %v5972_v25  ;;  %v3207_v1 = vadd.f32 1.0, %v4490_v60 }
 0x3d9   : > { %v2888_v10 = vmul.f32 %v2856_v50, %v2856_v50  ;;  %4499 = vrcp.f32 %v3269_v21 }
 0x3da   : > { %v3080_v22 = vmul.f32 %v5776_v8, %v3046_v35  ;;  %v3239_v9 = vmul.f32 %v3207_v1, %v3207_v1 }
 0x3db   : > { %v4492_v58 = vpop.eup %4491  ;;  %v2920_v53 = vadd.f32 1.0, %v2888_v10 }
 0x3dc   : > { %v4494_v51 = vpop.eup %4493  ;;  %v3208_v20 = vadd.f32 1.0, %v4492_v58  ;;  %v6028_v42 = vadd.f32 %v5779_v43, %v3080_v22  ;;  %v3271_v10 = vadd.f32 1.0, %v3239_v9 }
 0x3dd   : > { %v4496_v33 = vpop.eup %4495  ;;  %v2983_v15 = vmul.f32 2.0, %v4494_v51  ;;  %4501 = vrcp.f32 %v2920_v53  ;;  %v2643_v25 = vpop.f32.mrf.mxu1 }
 0x3de   : > { %v4498_v41 = vpop.eup %4497  ;;  %v2697_v13 = vmul.f32 %v5718_v46, %v2643_v25  ;;  %v3159_v18 = vmul.f32 1.442695, %v6028_v42  ;;  %v3240_v4 = vmul.f32 %v3208_v20, %v3208_v20  ;;  %v3334_v12 = vmul.f32 2.0, %v4496_v33 }
 0x3df   : > { %v3015_v29 = vsub.f32 1.0, %v2983_v15  ;;  %v2857_v38 = vadd.f32 1.0, %v4498_v41  ;;  %v4500_v11 = vpop.eup %4499 }
 0x3e0   : > { %v2730_v37 = vadd.f32 %v5722_v45, %v2697_v13  ;;  %v3333_v28 = vmul.f32 2.0, %v4500_v11  ;;  %4503 = vpow2.f32 %v3159_v18  ;;  %v3272_v23 = vadd.f32 1.0, %v3240_v4 }
 0x3e1   : > { %v3047_v44 = vmul.f32 %v3015_v29, %v5994_v31  ;;  %v2889_v59 = vmul.f32 %v2857_v38, %v2857_v38  ;;  %v3366_v21 = vsub.f32 1.0, %v3334_v12 }
 0x3e2   : > { %3830 = vmatmul.msk.bf16.gmra.mxu2 %vm935_vm2, %v3423_v47  ;;  %v6036_v5 = vadd.f32 %v2730_v37, %v5504_v34  ;;  %v3365_v35 = vsub.f32 1.0, %v3333_v28 }
 0x3e3   : > { %v4502_v6 = vpop.eup %4501  ;;  %v3081_v14 = vmul.f32 %v5776_v8, %v3047_v44  ;;  %v2921_v30 = vadd.f32 1.0, %v2889_v59  ;;  %v3398_v58 = vmul.f32 %v3366_v21, %v5984_v3 }
 0x3e4   : > { %v2984_v54 = vmul.f32 2.0, %v4502_v6  ;;  %v2812_v40 = vmul.f32 1.442695, %v6036_v5  ;;  %v3397_v61 = vmul.f32 %v3365_v35, %v5975_v52 }
 0x3e5   : > { %v6041_v31 = vadd.f32 %v5779_v43, %v3081_v14  ;;  %4505 = vrcp.f32 %v2921_v30  ;;  %v2645_v24 = vpop.f32.mrf.mxu1 }
 0x3e6   : > { %v3016_v50 = vsub.f32 1.0, %v2984_v54  ;;  %4507 = vpow2.f32 %v2812_v40  ;;  %v2698_v34 = vmul.f32 %v5718_v46, %v2645_v24  ;;  %v4504_v22 = vpop.eup %4503  ;;  %v3424_v41 = vpack.c.bf16 %v3398_v58, %v3397_v61 }
 0x3e7   : > { %v3161_v63 = vmul.f32 1.442695, %v6041_v31  ;;  %4509 = vrcp.f32 %v3272_v23  ;;  %v3209_v13 = vadd.f32 1.0, %v4504_v22 }
 0x3e8   : > { %v3048_v60 = vmul.f32 %v3016_v50, %v6006_v32  ;;  %v2731_v48 = vadd.f32 %v5722_v45, %v2698_v34 }
 0x3e9   : > { %4511 = vpow2.f32 %v3161_v63  ;;  %v3241_v14 = vmul.f32 %v3209_v13, %v3209_v13 }
 0x3ea   : > { %v3082_v53 = vmul.f32 %v5776_v8, %v3048_v60  ;;  %v6050_v51 = vadd.f32 %v2731_v48, %v5507_v56  ;;  %4513 = vrcp.f32 %v3271_v10 }
 0x3eb   : > { %v4506_v20 = vpop.eup %4505  ;;  %v3273_v63 = vadd.f32 1.0, %v3241_v14 }
 0x3ec   : > { %v4508_v33 = vpop.eup %4507  ;;  %v2985_v15 = vmul.f32 2.0, %v4506_v20  ;;  %v2814_v32 = vmul.f32 1.442695, %v6050_v51  ;;  %v6055_v3 = vadd.f32 %v5779_v43, %v3082_v53 }
 0x3ed   : > { %v2858_v25 = vadd.f32 1.0, %v4508_v33  ;;  %v4510_v47 = vpop.eup %4509 }
 0x3ee   : > { %v3017_v1 = vsub.f32 1.0, %v2985_v15  ;;  %4515 = vpow2.f32 %v2814_v32  ;;  %v2648_v29 = vpop.f32.mrf.mxu1  ;;  %v3336_v59 = vmul.f32 2.0, %v4510_v47  ;;  %v3163_v12 = vmul.f32 1.442695, %v6055_v3 }
 0x3ef   : > { %v4512_v56 = vpop.eup %4511  ;;  %v2890_v38 = vmul.f32 %v2858_v25, %v2858_v25  ;;  %v2699_v11 = vmul.f32 %v5718_v46, %v2648_v29 }
 0x3f0   : > { %v3210_v52 = vadd.f32 1.0, %v4512_v56  ;;  %v3049_v18 = vmul.f32 %v3017_v1, %v6020_v36  ;;  %v4514_v37 = vpop.eup %4513  ;;  %v3368_v50 = vsub.f32 1.0, %v3336_v59 }
 0x3f1   : > { %v2922_v4 = vadd.f32 1.0, %v2890_v38  ;;  %v2732_v44 = vadd.f32 %v5722_v45, %v2699_v11  ;;  %v3335_v54 = vmul.f32 2.0, %v4514_v37 }
 0x3f2   : > { %v3083_v6 = vmul.f32 %v5776_v8, %v3049_v18  ;;  %3831 = vmatmul.msk.bf16.gmra.mxu2 %vm935_vm2, %v3424_v41  ;;  %v3242_v30 = vmul.f32 %v3210_v52, %v3210_v52  ;;  %v3400_v53 = vmul.f32 %v3368_v50, %v6014_v62 }
 0x3f3   : > { %4517 = vrcp.f32 %v2922_v4  ;;  %v6064_v28 = vadd.f32 %v2732_v44, %v5542_v17  ;;  %v3367_v10 = vsub.f32 1.0, %v3335_v54 }
 0x3f4   : > { %v4516_v9 = vpop.eup %4515  ;;  %v6067_v36 = vadd.f32 %v5779_v43, %v3083_v6  ;;  %v3274_v21 = vadd.f32 1.0, %v3242_v30  ;;  %4519 = vpow2.f32 %v3163_v12 }
 0x3f5   : > { %v2859_v40 = vadd.f32 1.0, %v4516_v9  ;;  %v2816_v23 = vmul.f32 1.442695, %v6064_v28  ;;  %v3399_v15 = vmul.f32 %v3367_v10, %v6002_v7 }
 0x3f6   : > { %v3165_v24 = vmul.f32 1.442695, %v6067_v36  ;;  %v2650_v34 = vpop.f32.mrf.mxu1 }
 0x3f7   : > { %v2891_v35 = vmul.f32 %v2859_v40, %v2859_v40  ;;  %4521 = vpow2.f32 %v2816_v23  ;;  %v2700_v17 = vmul.f32 %v5718_v46, %v2650_v34  ;;  %v3425_v1 = vpack.c.bf16 %v3400_v53, %v3399_v15 }
 0x3f8   : > { %4523 = vpow2.f32 %v3165_v24 }
 0x3f9   : > { %v4518_v60 = vpop.eup %4517  ;;  %v2923_v48 = vadd.f32 1.0, %v2891_v35  ;;  %v2733_v58 = vadd.f32 %v5722_v45, %v2700_v17  ;;  %4525 = vrcp.f32 %v3274_v21 }
 0x3fa   : > { %v2986_v22 = vmul.f32 2.0, %v4518_v60  ;;  %4527 = vrcp.f32 %v3273_v63  ;;  %v4520_v61 = vpop.eup %4519 }
 0x3fb   : > { %4529 = vrcp.f32 %v2923_v48  ;;  %v6075_v20 = vadd.f32 %v2733_v58, %v5535_v19  ;;  %v3211_v62 = vadd.f32 1.0, %v4520_v61 }
 0x3fc   : > { %v3018_v33 = vsub.f32 1.0, %v2986_v22 }
 0x3fd   : > { %v4522_v32 = vpop.eup %4521  ;;  %v2818_v25 = vmul.f32 1.442695, %v6075_v20  ;;  %v3243_v14 = vmul.f32 %v3211_v62, %v3211_v62 }
 0x3fe   : > { %v4524_v41 = vpop.eup %4523  ;;  %v3050_v47 = vmul.f32 %v3018_v33, %v6036_v5  ;;  %v2860_v13 = vadd.f32 1.0, %v4522_v32  ;;  %v2653_v29 = vpop.f32.mrf.mxu1 }
 0x3ff   : > { %v4526_v56 = vpop.eup %4525  ;;  %v3212_v38 = vadd.f32 1.0, %v4524_v41  ;;  %4531 = vpow2.f32 %v2818_v25  ;;  %v2701_v19 = vmul.f32 %v5718_v46, %v2653_v29  ;;  %v3275_v35 = vadd.f32 1.0, %v3243_v14 }
 0x400   : > { %v4528_v11 = vpop.eup %4527  ;;  %v3084_v52 = vmul.f32 %v5776_v8, %v3050_v47  ;;  %v2892_v18 = vmul.f32 %v2860_v13, %v2860_v13  ;;  %v3338_v12 = vmul.f32 2.0, %v4526_v56 }
 0x401   : > { %v4530_v7 = vpop.eup %4529  ;;  %v2734_v37 = vadd.f32 %v5722_v45, %v2701_v19  ;;  %v3244_v4 = vmul.f32 %v3212_v38, %v3212_v38  ;;  %v3337_v54 = vmul.f32 2.0, %v4528_v11 }
 0x402   : > { %v6084_v44 = vadd.f32 %v5779_v43, %v3084_v52  ;;  %v2987_v5 = vmul.f32 2.0, %v4530_v7  ;;  %v2924_v59 = vadd.f32 1.0, %v2892_v18  ;;  %3832 = vmatmul.msk.bf16.gmra.mxu2 %vm935_vm2, %v3425_v1  ;;  %v3370_v34 = vsub.f32 1.0, %v3338_v12  ;;  %v6120_v12 = vld [vmem:[%s6334_s8] ss:$0 sm:$0xff] }
 0x403   : > { %v6088_v6 = vadd.f32 %v2734_v37, %v5576_v49  ;;  %v3276_v21 = vadd.f32 1.0, %v3244_v4  ;;  %v3369_v60 = vsub.f32 1.0, %v3337_v54 }
 0x404   : > { %v3167_v30 = vmul.f32 1.442695, %v6084_v44  ;;  %v3019_v9 = vsub.f32 1.0, %v2987_v5  ;;  %4533 = vrcp.f32 %v2924_v59 }
 0x405   : > { %v4532_v40 = vpop.eup %4531  ;;  %v2820_v23 = vmul.f32 1.442695, %v6088_v6  ;;  %v3401_v25 = vmul.f32 %v3369_v60, %v6028_v42 }
 0x406   : > { %4535 = vpow2.f32 %v3167_v30  ;;  %v3051_v24 = vmul.f32 %v3019_v9, %v6050_v51  ;;  %v2861_v50 = vadd.f32 1.0, %v4532_v40  ;;  %v2655_v63 = vpop.f32.mrf.mxu1  ;;  %v3402_v51 = vmul.f32 %v3370_v34, %v6041_v31 }
 0x407   : > { %4537 = vpow2.f32 %v2820_v23  ;;  %v2702_v49 = vmul.f32 %v5718_v46, %v2655_v63 }
 0x408   : > { %v3085_v17 = vmul.f32 %v5776_v8, %v3051_v24  ;;  %v2893_v10 = vmul.f32 %v2861_v50, %v2861_v50  ;;  %4539 = vrcp.f32 %v3276_v21  ;;  %v3426_v56 = vpack.c.bf16 %v3402_v51, %v3401_v25 }
 0x409   : > { %v2735_v48 = vadd.f32 %v5722_v45, %v2702_v49  ;;  %4541 = vrcp.f32 %v3275_v35 }
 0x40a   : > { %v4534_v58 = vpop.eup %4533  ;;  %v6097_v22 = vadd.f32 %v5779_v43, %v3085_v17  ;;  %v2925_v53 = vadd.f32 1.0, %v2893_v10 }
 0x40b   : > { %v2988_v61 = vmul.f32 2.0, %v4534_v58  ;;  %v6101_v33 = vadd.f32 %v2735_v48, %v5569_v0 }
 0x40c   : > { %v4536_v15 = vpop.eup %4535  ;;  %v3169_v32 = vmul.f32 1.442695, %v6097_v22  ;;  %4543 = vrcp.f32 %v2925_v53 }
 0x40d   : > { %v4538_v41 = vpop.eup %4537  ;;  %v3020_v47 = vsub.f32 1.0, %v2988_v61  ;;  %v2822_v13 = vmul.f32 1.442695, %v6101_v33  ;;  %v3213_v1 = vadd.f32 1.0, %v4536_v15 }
 0x40e   : > { %4545 = vpow2.f32 %v3169_v32  ;;  %v2862_v29 = vadd.f32 1.0, %v4538_v41  ;;  %v2658_v31 = vpop.f32.mrf.mxu1  ;;  %v4540_v62 = vpop.eup %4539 }
 0x40f   : > { %v3052_v0 = vmul.f32 %v3020_v47, %v6064_v28  ;;  %4547 = vpow2.f32 %v2822_v13  ;;  %v2703_v38 = vmul.f32 %v5718_v46, %v2658_v31  ;;  %v4542_v11 = vpop.eup %4541  ;;  %v3340_v37 = vmul.f32 2.0, %v4540_v62 }
 0x410   : > { %v2894_v19 = vmul.f32 %v2862_v29, %v2862_v29  ;;  %v3245_v4 = vmul.f32 %v3213_v1, %v3213_v1  ;;  %v3339_v30 = vmul.f32 2.0, %v4542_v11 }
 0x411   : > { %v3086_v52 = vmul.f32 %v5776_v8, %v3052_v0  ;;  %v2736_v42 = vadd.f32 %v5722_v45, %v2703_v38  ;;  %v3372_v50 = vsub.f32 1.0, %v3340_v37 }
 0x412   : > { %v4544_v18 = vpop.eup %4543  ;;  %v2926_v7 = vadd.f32 1.0, %v2894_v19  ;;  %3833 = vmatmul.msk.bf16.gmra.mxu2 %vm935_vm2, %v3426_v56  ;;  %v3277_v63 = vadd.f32 1.0, %v3245_v4  ;;  %v3371_v60 = vsub.f32 1.0, %v3339_v30 }
 0x413   : > { %v6112_v5 = vadd.f32 %v5779_v43, %v3086_v52  ;;  %v2989_v28 = vmul.f32 2.0, %v4544_v18  ;;  %v6115_v59 = vadd.f32 %v2736_v42, %v5610_v57  ;;  %v3404_v15 = vmul.f32 %v3372_v50, %v6067_v36 }
 0x414   : > { %v4546_v14 = vpop.eup %4545  ;;  %4549 = vrcp.f32 %v2926_v7  ;;  %v3403_v47 = vmul.f32 %v3371_v60, %v6055_v3 }
 0x415   : > { %v4548_v9 = vpop.eup %4547  ;;  %v3214_v54 = vadd.f32 1.0, %v4546_v14  ;;  %v3171_v40 = vmul.f32 1.442695, %v6112_v5  ;;  %v3021_v23 = vsub.f32 1.0, %v2989_v28  ;;  %v2824_v21 = vmul.f32 1.442695, %v6115_v59 }
 0x416   : > { %v2863_v24 = vadd.f32 1.0, %v4548_v9  ;;  %v3512_v57 = vpop.f32.mrf.mxu2  ;;  %v2660_v34 = vpop.f32.mrf.mxu1  ;;  %v3427_v62 = vpack.c.bf16 %v3404_v15, %v3403_v47 }
 0x417   : > { %4551 = vpow2.f32 %v3171_v40  ;;  %v3053_v49 = vmul.f32 %v3021_v23, %v6075_v20  ;;  %v3513_v35 = vadd.f32 %v6120_v12, %v3512_v57  ;;  %v2704_v17 = vmul.f32 %v5718_v46, %v2660_v34 }
 0x418   : > { %v2895_v10 = vmul.f32 %v2863_v24, %v2863_v24  ;;  %4553 = vpow2.f32 %v2824_v21  ;;  %v3246_v48 = vmul.f32 %v3214_v54, %v3214_v54 }
 0x419   : > { %v3087_v58 = vmul.f32 %v5776_v8, %v3053_v49  ;;  %3592 = vst [vmem:[%s6129_s18] sm:$0xff] %v3513_v35  ;;  %v2737_v53 = vadd.f32 %v5722_v45, %v2704_v17  ;;  %4555 = vrcp.f32 %v3277_v63 }
 0x41a   : > { %v4550_v51 = vpop.eup %4549  ;;  %v2927_v61 = vadd.f32 1.0, %v2895_v10  ;;  %v3278_v32 = vadd.f32 1.0, %v3246_v48 }
 0x41b   : > { %v6139_v20 = vadd.f32 %v5779_v43, %v3087_v58  ;;  %v2990_v25 = vmul.f32 2.0, %v4550_v51  ;;  %v6142_v41 = vadd.f32 %v2737_v53, %v5603_v39 }
 0x41c   : > { %4557 = vrcp.f32 %v2927_v61 }
 0x41d   : > { %v4552_v13 = vpop.eup %4551  ;;  %v3173_v1 = vmul.f32 1.442695, %v6139_v20  ;;  %v3022_v29 = vsub.f32 1.0, %v2990_v25  ;;  %v2826_v56 = vmul.f32 1.442695, %v6142_v41  ;;  %4559 = vrcp.f32 %v3278_v32 }
 0x41e   : > { %v4554_v36 = vpop.eup %4553  ;;  %v3215_v31 = vadd.f32 1.0, %v4552_v13  ;;  %v3514_v0 = vpop.f32.mrf.mxu2 }
 0x41f   : > { %v2663_v38 = vpop.f32.mrf.mxu1  ;;  %4561 = vpow2.f32 %v3173_v1  ;;  %v3054_v39 = vmul.f32 %v3022_v29, %v6088_v6  ;;  %v2864_v19 = vadd.f32 1.0, %v4554_v36  ;;  %v3515_v11 = vadd.f32 %v6120_v12, %v3514_v0  ;;  %v4556_v52 = vpop.eup %4555 }
 0x420   : > { %4563 = vpow2.f32 %v2826_v56  ;;  %v2705_v3 = vmul.f32 %v5718_v46, %v2663_v38  ;;  %v3247_v4 = vmul.f32 %v3215_v31, %v3215_v31  ;;  %v3341_v54 = vmul.f32 2.0, %v4556_v52 }
 0x421   : > { %v3088_v42 = vmul.f32 %v5776_v8, %v3054_v39  ;;  %v2896_v18 = vmul.f32 %v2864_v19, %v2864_v19  ;;  %3593 = vst [vmem:[%s6129_s18 + $0x8] sm:$0xff] %v3515_v11 }
 0x422   : > { %v4558_v7 = vpop.eup %4557  ;;  %3834 = vmatmul.msk.bf16.gmra.mxu2 %vm935_vm2, %v3427_v62  ;;  %v2738_v37 = vadd.f32 %v5722_v45, %v2705_v3  ;;  %v3279_v35 = vadd.f32 1.0, %v3247_v4  ;;  %v3373_v60 = vsub.f32 1.0, %v3341_v54 }
 0x423   : > { %v4560_v28 = vpop.eup %4559  ;;  %v6155_v6 = vadd.f32 %v5779_v43, %v3088_v42  ;;  %v2991_v14 = vmul.f32 2.0, %v4558_v7  ;;  %v2928_v30 = vadd.f32 1.0, %v2896_v18 }
 0x424   : > { %v6158_v9 = vadd.f32 %v2738_v37, %v5644_v27  ;;  %v3342_v40 = vmul.f32 2.0, %v4560_v28  ;;  %v3405_v56 = vmul.f32 %v3373_v60, %v6084_v44 }
 0x425   : > { %v4562_v23 = vpop.eup %4561  ;;  %v3175_v21 = vmul.f32 1.442695, %v6155_v6  ;;  %v3023_v24 = vsub.f32 1.0, %v2991_v14  ;;  %4565 = vrcp.f32 %v2928_v30 }
 0x426   : > { %v4564_v57 = vpop.eup %4563  ;;  %v3216_v50 = vadd.f32 1.0, %v4562_v23  ;;  %v2828_v34 = vmul.f32 1.442695, %v6158_v9  ;;  %v3374_v49 = vsub.f32 1.0, %v3342_v40 }
 0x427   : > { %v2665_v63 = vpop.f32.mrf.mxu1  ;;  %4567 = vpow2.f32 %v3175_v21  ;;  %v3055_v17 = vmul.f32 %v3023_v24, %v6101_v33  ;;  %v2865_v10 = vadd.f32 1.0, %v4564_v57 }
 0x428   : > { %v2706_v27 = vmul.f32 %v5718_v46, %v2665_v63  ;;  %4569 = vpow2.f32 %v2828_v34  ;;  %v3248_v48 = vmul.f32 %v3216_v50, %v3216_v50  ;;  %v3406_v15 = vmul.f32 %v3374_v49, %v6097_v22 }
 0x429   : > { %v3089_v58 = vmul.f32 %v5776_v8, %v3055_v17  ;;  %v2897_v53 = vmul.f32 %v2865_v10, %v2865_v10  ;;  %4571 = vrcp.f32 %v3279_v35 }
 0x42a   : > { %v2739_v51 = vadd.f32 %v5722_v45, %v2706_v27  ;;  %v3517_v61 = vpop.f32.mrf.mxu2  ;;  %v3280_v32 = vadd.f32 1.0, %v3248_v48  ;;  %v3428_v39 = vpack.c.bf16 %v3406_v15, %v3405_v56 }
 0x42b   : > { %v4566_v25 = vpop.eup %4565  ;;  %v6168_v33 = vadd.f32 %v5779_v43, %v3089_v58  ;;  %v2929_v47 = vadd.f32 1.0, %v2897_v53  ;;  %v3518_v13 = vadd.f32 %v6120_v12, %v3517_v61 }
 0x42c   : > { %v6172_v1 = vadd.f32 %v2739_v51, %v5637_v16  ;;  %v2992_v29 = vmul.f32 2.0, %v4566_v25  ;;  %4573 = vrcp.f32 %v3280_v32 }
 0x42d   : > { %v4568_v36 = vpop.eup %4567  ;;  %v3177_v31 = vmul.f32 1.442695, %v6168_v33  ;;  %4575 = vrcp.f32 %v2929_v47  ;;  %3594 = vst [vmem:[%s6129_s18 + $0x10] sm:$0xff] %v3518_v13 }
 0x42e   : > { %v2830_v22 = vmul.f32 1.442695, %v6172_v1  ;;  %v4570_v62 = vpop.eup %4569  ;;  %v3217_v0 = vadd.f32 1.0, %v4568_v36  ;;  %v3024_v38 = vsub.f32 1.0, %v2992_v29 }
 0x42f   : > { %v2668_v19 = vpop.f32.mrf.mxu1  ;;  %4577 = vpow2.f32 %v3177_v31  ;;  %v2866_v11 = vadd.f32 1.0, %v4570_v62  ;;  %v4572_v3 = vpop.eup %4571 }
 0x430   : > { %v2707_v16 = vmul.f32 %v5718_v46, %v2668_v19  ;;  %v3056_v44 = vmul.f32 %v3024_v38, %v6115_v59  ;;  %4579 = vpow2.f32 %v2830_v22  ;;  %v3249_v4 = vmul.f32 %v3217_v0, %v3217_v0 }
 0x431   : > { %v2898_v52 = vmul.f32 %v2866_v11, %v2866_v11  ;;  %v3343_v21 = vmul.f32 2.0, %v4572_v3 }
 0x432   : > { %v2740_v42 = vadd.f32 %v5722_v45, %v2707_v16  ;;  %v4574_v18 = vpop.eup %4573  ;;  %v3090_v7 = vmul.f32 %v5776_v8, %v3056_v44  ;;  %v3519_v37 = vpop.f32.mrf.mxu2  ;;  %3835 = vmatmul.msk.bf16.gmra.mxu2 %vm935_vm2, %v3428_v39  ;;  %v3281_v27 = vadd.f32 1.0, %v3249_v4 }
 0x433   : > { %v4576_v28 = vpop.eup %4575  ;;  %v2930_v14 = vadd.f32 1.0, %v2898_v52  ;;  %v3520_v30 = vadd.f32 %v6120_v12, %v3519_v37  ;;  %v3344_v59 = vmul.f32 2.0, %v4574_v18  ;;  %v3375_v48 = vsub.f32 1.0, %v3343_v21 }
 0x434   : > { %v6185_v54 = vadd.f32 %v2740_v42, %v5665_v2  ;;  %v6188_v40 = vadd.f32 %v5779_v43, %v3090_v7  ;;  %v2993_v23 = vmul.f32 2.0, %v4576_v28 }
 0x435   : > { %v4578_v24 = vpop.eup %4577  ;;  %4581 = vrcp.f32 %v2930_v14  ;;  %3595 = vst [vmem:[%s6129_s18 + $0x18] sm:$0xff] %v3520_v30  ;;  %v3376_v17 = vsub.f32 1.0, %v3344_v59  ;;  %v3407_v56 = vmul.f32 %v3375_v48, %v6112_v5 }
 0x436   : > { %v2832_v57 = vmul.f32 1.442695, %v6185_v54  ;;  %v4580_v50 = vpop.eup %4579  ;;  %v3218_v34 = vadd.f32 1.0, %v4578_v24  ;;  %v3179_v63 = vmul.f32 1.442695, %v6188_v40  ;;  %v3025_v49 = vsub.f32 1.0, %v2993_v23 }
 0x437   : > { %v2670_v35 = vpop.f32.mrf.mxu1  ;;  %v2867_v2 = vadd.f32 1.0, %v4580_v50  ;;  %v3408_v15 = vmul.f32 %v3376_v17, %v6139_v20 }
 0x438   : > { %4583 = vpow2.f32 %v2832_v57  ;;  %v2708_v10 = vmul.f32 %v5718_v46, %v2670_v35  ;;  %v3057_v60 = vmul.f32 %v3025_v49, %v6142_v41  ;;  %v3250_v58 = vmul.f32 %v3218_v34, %v3218_v34 }
 0x439   : > { %4585 = vpow2.f32 %v3179_v63  ;;  %v2899_v53 = vmul.f32 %v2867_v2, %v2867_v2  ;;  %v3429_v38 = vpack.c.bf16 %v3408_v15, %v3407_v56 }
 0x43a   : > { %v2741_v51 = vadd.f32 %v5722_v45, %v2708_v10  ;;  %v3091_v61 = vmul.f32 %v5776_v8, %v3057_v60  ;;  %v3282_v32 = vadd.f32 1.0, %v3250_v58  ;;  %4587 = vrcp.f32 %v3281_v27 }
 0x43b   : > { %v4582_v25 = vpop.eup %4581  ;;  %v2931_v47 = vadd.f32 1.0, %v2899_v53 }
 0x43c   : > { %v6199_v13 = vadd.f32 %v2741_v51, %v5668_v55  ;;  %v6202_v29 = vadd.f32 %v5779_v43, %v3091_v61  ;;  %v2994_v41 = vmul.f32 2.0, %v4582_v25  ;;  %4589 = vrcp.f32 %v3282_v32  ;;  %v6338_v32 = vld [vmem:[#allocation2_spill] sm:$0xff] }
 0x43d   : > { %4591 = vrcp.f32 %v2931_v47 }
 0x43e   : > { %v4584_v36 = vpop.eup %4583  ;;  %v2834_v31 = vmul.f32 1.442695, %v6199_v13  ;;  %v3181_v20 = vmul.f32 1.442695, %v6202_v29  ;;  %v3026_v62 = vsub.f32 1.0, %v2994_v41 }
 0x43f   : > { %v4586_v22 = vpop.eup %4585  ;;  %v2868_v0 = vadd.f32 1.0, %v4584_v36  ;;  %v2673_v55 = vpop.f32.mrf.mxu1 }
 0x440   : > { %v3219_v39 = vadd.f32 1.0, %v4586_v22  ;;  %4593 = vpow2.f32 %v2834_v31  ;;  %v2709_v19 = vmul.f32 %v5718_v46, %v2673_v55  ;;  %v3058_v11 = vmul.f32 %v3026_v62, %v6158_v9  ;;  %v4588_v16 = vpop.eup %4587 }
 0x441   : > { %4595 = vpow2.f32 %v3181_v20  ;;  %v2900_v5 = vmul.f32 %v2868_v0, %v2868_v0  ;;  %v3345_v14 = vmul.f32 2.0, %v4588_v16 }
 0x442   : > { %v2742_v3 = vadd.f32 %v5722_v45, %v2709_v19  ;;  %v4590_v44 = vpop.eup %4589  ;;  %v3092_v52 = vmul.f32 %v5776_v8, %v3058_v11  ;;  %3836 = vmatmul.msk.bf16.gmra.mxu2 %vm935_vm2, %v3429_v38  ;;  %v3251_v4 = vmul.f32 %v3219_v39, %v3219_v39 }
 0x443   : > { %v2932_v42 = vadd.f32 1.0, %v2900_v5  ;;  %v4592_v18 = vpop.eup %4591  ;;  %v3346_v37 = vmul.f32 2.0, %v4590_v44  ;;  %v3377_v27 = vsub.f32 1.0, %v3345_v14 }
 0x444   : > { %v6213_v7 = vadd.f32 %v2742_v3, %v5686_v26  ;;  %v6216_v28 = vadd.f32 %v5779_v43, %v3092_v52  ;;  %v2995_v9 = vmul.f32 2.0, %v4592_v18  ;;  %v3283_v17 = vadd.f32 1.0, %v3251_v4 }
 0x445   : > { %4597 = vrcp.f32 %v2932_v42  ;;  %v3522_v59 = vpop.f32.mrf.mxu2  ;;  %v3378_v21 = vsub.f32 1.0, %v3346_v37 }
 0x446   : > { %v4594_v30 = vpop.eup %4593  ;;  %v2836_v23 = vmul.f32 1.442695, %v6213_v7  ;;  %v3183_v57 = vmul.f32 1.442695, %v6216_v28  ;;  %v3027_v50 = vsub.f32 1.0, %v2995_v9  ;;  %v3523_v26 = vadd.f32 %v6120_v12, %v3522_v59 }
 0x447   : > { %v4596_v24 = vpop.eup %4595  ;;  %v2869_v34 = vadd.f32 1.0, %v4594_v30  ;;  %v2675_v63 = vpop.f32.mrf.mxu1  ;;  %v3410_v61 = vmul.f32 %v3378_v21, %v6168_v33 }
 0x448   : > { %v3220_v49 = vadd.f32 1.0, %v4596_v24  ;;  %4599 = vpow2.f32 %v2836_v23  ;;  %v2710_v35 = vmul.f32 %v5718_v46, %v2675_v63  ;;  %v3059_v2 = vmul.f32 %v3027_v50, %v6172_v1  ;;  %3596 = vst [vmem:[%s6129_s18 + $0x20] sm:$0xff] %v3523_v26 }
 0x449   : > { %4601 = vpow2.f32 %v3183_v57  ;;  %v2901_v10 = vmul.f32 %v2869_v34, %v2869_v34 }
 0x44a   : > { %v2743_v60 = vadd.f32 %v5722_v45, %v2710_v35  ;;  %v3252_v48 = vmul.f32 %v3220_v49, %v3220_v49  ;;  %v3093_v53 = vmul.f32 %v5776_v8, %v3059_v2  ;;  %4603 = vrcp.f32 %v3283_v17 }
 0x44b   : > { %v4598_v58 = vpop.eup %4597  ;;  %v2933_v51 = vadd.f32 1.0, %v2901_v10  ;;  %v3409_v45 = vmul.f32 %v3377_v27, %v6155_v6 }
 0x44c   : > { %v2996_v15 = vmul.f32 2.0, %v4598_v58  ;;  %v6228_v25 = vadd.f32 %v2743_v60, %v6338_v32  ;;  %v3284_v46 = vadd.f32 1.0, %v3252_v48  ;;  %v6231_v1 = vadd.f32 %v5779_v43, %v3093_v53 }
 0x44d   : > { %4605 = vrcp.f32 %v2933_v51  ;;  %v3524_v56 = vpop.f32.mrf.mxu2  ;;  %v3430_v62 = vpack.c.bf16 %v3410_v61, %v3409_v45 }
 0x44e   : > { %v4600_v47 = vpop.eup %4599  ;;  %v3028_v41 = vsub.f32 1.0, %v2996_v15  ;;  %v2838_v36 = vmul.f32 1.442695, %v6228_v25  ;;  %4607 = vrcp.f32 %v3284_v46  ;;  %v3185_v31 = vmul.f32 1.442695, %v6231_v1 }
 0x44f   : > { %v4602_v33 = vpop.eup %4601  ;;  %v3525_v22 = vadd.f32 %v6120_v12, %v3524_v56  ;;  %v2870_v20 = vadd.f32 1.0, %v4600_v47 }
 0x450   : > { %v3221_v0 = vadd.f32 1.0, %v4602_v33  ;;  %v3060_v38 = vmul.f32 %v3028_v41, %v6185_v54  ;;  %4609 = vpow2.f32 %v2838_v36  ;;  %v4604_v55 = vpop.eup %4603 }
 0x451   : > { %4611 = vpow2.f32 %v3185_v31  ;;  %3597 = vst [vmem:[%s6129_s18 + $0x28] sm:$0xff] %v3525_v22  ;;  %v2902_v6 = vmul.f32 %v2870_v20, %v2870_v20  ;;  %v3347_v54 = vmul.f32 2.0, %v4604_v55 }
 0x452   : > { %v3094_v39 = vmul.f32 %v5776_v8, %v3060_v38  ;;  %3837 = vmatmul.msk.bf16.gmra.mxu2 %vm935_vm2, %v3430_v62  ;;  %v3253_v44 = vmul.f32 %v3221_v0, %v3221_v0 }
 0x453   : > { %v4606_v19 = vpop.eup %4605  ;;  %v2934_v11 = vadd.f32 1.0, %v2902_v6  ;;  %v3379_v50 = vsub.f32 1.0, %v3347_v54 }
 0x454   : > { %v4608_v5 = vpop.eup %4607  ;;  %v6242_v16 = vadd.f32 %v5779_v43, %v3094_v39  ;;  %v2997_v3 = vmul.f32 2.0, %v4606_v19  ;;  %v3285_v24 = vadd.f32 1.0, %v3253_v44 }
 0x455   : > { %4613 = vrcp.f32 %v2934_v11  ;;  %v3348_v52 = vmul.f32 2.0, %v4608_v5  ;;  %v3527_v4 = vpop.f32.mrf.mxu2 }
 0x456   : > { %v4610_v42 = vpop.eup %4609  ;;  %v3187_v18 = vmul.f32 1.442695, %v6242_v16  ;;  %v3029_v37 = vsub.f32 1.0, %v2997_v3  ;;  %v3528_v14 = vadd.f32 %v6120_v12, %v3527_v4 }
 0x457   : > { %v4612_v9 = vpop.eup %4611  ;;  %v2871_v30 = vadd.f32 1.0, %v4610_v42  ;;  %v3380_v59 = vsub.f32 1.0, %v3348_v52 }
 0x458   : > { %v3222_v23 = vadd.f32 1.0, %v4612_v9  ;;  %4615 = vpow2.f32 %v3187_v18  ;;  %v3061_v21 = vmul.f32 %v3029_v37, %v6199_v13  ;;  %3598 = vst [vmem:[%s6129_s18 + $0x30] sm:$0xff] %v3528_v14  ;;  %v3411_v13 = vmul.f32 %v3379_v50, %v6188_v40 }
 0x459   : > { %v2903_v57 = vmul.f32 %v2871_v30, %v2871_v30  ;;  %v3412_v35 = vmul.f32 %v3380_v59, %v6202_v29  ;;  %4617 = vrcp.f32 %v3285_v24 }
 0x45a   : > { %v3095_v26 = vmul.f32 %v5776_v8, %v3061_v21  ;;  %v3254_v34 = vmul.f32 %v3222_v23, %v3222_v23 }
 0x45b   : > { %v4614_v63 = vpop.eup %4613  ;;  %v2935_v49 = vadd.f32 1.0, %v2903_v57  ;;  %v3431_v51 = vpack.c.bf16 %v3412_v35, %v3411_v13 }
 0x45c   : > { %v6251_v17 = vadd.f32 %v5779_v43, %v3095_v26  ;;  %v2998_v2 = vmul.f32 2.0, %v4614_v63  ;;  %v3286_v10 = vadd.f32 1.0, %v3254_v34 }
 0x45d   : > { %4619 = vrcp.f32 %v2935_v49  ;;  %v3529_v58 = vpop.f32.mrf.mxu2 }
 0x45e   : > { %v4616_v27 = vpop.eup %4615  ;;  %v3189_v60 = vmul.f32 1.442695, %v6251_v17  ;;  %v3030_v48 = vsub.f32 1.0, %v2998_v2  ;;  %4621 = vrcp.f32 %v3286_v10  ;;  %v3530_v53 = vadd.f32 %v6120_v12, %v3529_v58 }
 0x45f   : > { %v3223_v29 = vadd.f32 1.0, %v4616_v27  ;;  %v4618_v15 = vpop.eup %4617 }
 0x460   : > { %4623 = vpow2.f32 %v3189_v60  ;;  %v3062_v61 = vmul.f32 %v3030_v48, %v6213_v7  ;;  %3599 = vst [vmem:[%s6129_s18 + $0x38] sm:$0xff] %v3530_v53  ;;  %v3349_v56 = vmul.f32 2.0, %v4618_v15 }
 0x461   : > { %v3255_v41 = vmul.f32 %v3223_v29, %v3223_v29 }
 0x462   : > { %v3096_v32 = vmul.f32 %v5776_v8, %v3062_v61  ;;  %3838 = vmatmul.msk.bf16.gmra.mxu2 %vm935_vm2, %v3431_v51  ;;  %v3381_v55 = vsub.f32 1.0, %v3349_v56 }
 0x463   : > { %v4620_v46 = vpop.eup %4619  ;;  %v3287_v6 = vadd.f32 1.0, %v3255_v41 }
 0x464   : > { %v4622_v40 = vpop.eup %4621  ;;  %v6261_v45 = vadd.f32 %v5779_v43, %v3096_v32  ;;  %v2999_v47 = vmul.f32 2.0, %v4620_v46  ;;  %v3413_v44 = vmul.f32 %v3381_v55, %v6216_v28 }
 0x465   : > { %v3350_v36 = vmul.f32 2.0, %v4622_v40  ;;  %v3532_v22 = vpop.f32.mrf.mxu2 }
 0x466   : > { %v4624_v33 = vpop.eup %4623  ;;  %v3191_v31 = vmul.f32 1.442695, %v6261_v45  ;;  %v3031_v7 = vsub.f32 1.0, %v2999_v47  ;;  %v3533_v62 = vadd.f32 %v6120_v12, %v3532_v22 }
 0x467   : > { %v3224_v20 = vadd.f32 1.0, %v4624_v33  ;;  %v3382_v0 = vsub.f32 1.0, %v3350_v36 }
 0x468   : > { %4625 = vpow2.f32 %v3191_v31  ;;  %v3063_v38 = vmul.f32 %v3031_v7, %v6228_v25  ;;  %3600 = vst [vmem:[%s6129_s18 + $0x40] sm:$0xff] %v3533_v62 }
 0x469   : > { %v3256_v39 = vmul.f32 %v3224_v20, %v3224_v20  ;;  %v3414_v11 = vmul.f32 %v3382_v0, %v6231_v1  ;;  %4627 = vrcp.f32 %v3287_v6 }
 0x46a   : > { %v3097_v19 = vmul.f32 %v5776_v8, %v3063_v38 }
 0x46b   : > { %v3288_v5 = vadd.f32 1.0, %v3256_v39  ;;  %v3432_v18 = vpack.c.bf16 %v3414_v11, %v3413_v44 }
 0x46c   : > { %v3130_v3 = vadd.f32 %v5779_v43, %v3097_v19 }
 0x46d   : > { %4629 = vrcp.f32 %v3288_v5  ;;  %v3534_v42 = vpop.f32.mrf.mxu2 }
 0x46e   : > { %v4626_v54 = vpop.eup %4625  ;;  %v3193_v52 = vmul.f32 1.442695, %v3130_v3  ;;  %v3535_v25 = vadd.f32 %v6120_v12, %v3534_v42 }
 0x46f   : > { %v3225_v37 = vadd.f32 1.0, %v4626_v54  ;;  %v4628_v8 = vpop.eup %4627 }
 0x470   : > { %4631 = vpow2.f32 %v3193_v52  ;;  %3601 = vst [vmem:[%s6129_s18 + $0x48] sm:$0xff] %v3535_v25  ;;  %v3351_v9 = vmul.f32 2.0, %v4628_v8 }
 0x471   : > { %v3257_v43 = vmul.f32 %v3225_v37, %v3225_v37 }
 0x472   : > { %3839 = vmatmul.msk.bf16.gmra.mxu2 %vm935_vm2, %v3432_v18  ;;  %v3383_v24 = vsub.f32 1.0, %v3351_v9 }
 0x473   : > { %v4630_v4 = vpop.eup %4629  ;;  %v3289_v21 = vadd.f32 1.0, %v3257_v43 }
 0x474   : > { %v3352_v1 = vmul.f32 2.0, %v4630_v4  ;;  %v3415_v34 = vmul.f32 %v3383_v24, %v6242_v16 }
 0x475   : > { %v3537_v28 = vpop.f32.mrf.mxu2  ;;  %4633 = vrcp.f32 %v3289_v21 }
 0x476   : > { %v4632_v14 = vpop.eup %4631  ;;  %v3538_v59 = vadd.f32 %v6120_v12, %v3537_v28  ;;  %v3384_v23 = vsub.f32 1.0, %v3352_v1 }
 0x477   : > { %v3226_v30 = vadd.f32 1.0, %v4632_v14 }
 0x478   : > { %3602 = vst [vmem:[%s6129_s18 + $0x50] sm:$0xff] %v3538_v59  ;;  %v3416_v50 = vmul.f32 %v3384_v23, %v6251_v17 }
 0x479   : > { %v3258_v57 = vmul.f32 %v3226_v30, %v3226_v30 }
 0x47a   : > { %v3433_v35 = vpack.c.bf16 %v3416_v50, %v3415_v34 }
 0x47b   : > { %v3290_v26 = vadd.f32 1.0, %v3258_v57  ;;  %v4634_v2 = vpop.eup %4633 }
 0x47c   : > { %v3353_v27 = vmul.f32 2.0, %v4634_v2 }
 0x47d   : > { %4635 = vrcp.f32 %v3290_v26  ;;  %v3539_v63 = vpop.f32.mrf.mxu2 }
 0x47e   : > { %v3540_v49 = vadd.f32 %v6120_v12, %v3539_v63  ;;  %v3385_v16 = vsub.f32 1.0, %v3353_v27 }
 0x480   : > { %3603 = vst [vmem:[%s6129_s18 + $0x58] sm:$0xff] %v3540_v49  ;;  %v3417_v53 = vmul.f32 %v3385_v16, %v6261_v45 }
 0x482   : > { %3840 = vmatmul.msk.bf16.gmra.mxu2 %vm935_vm2, %v3433_v35 }
 0x483   : > { %v4636_v10 = vpop.eup %4635 }
 0x484   : > { %v3354_v13 = vmul.f32 2.0, %v4636_v10 }
 0x485   : > { %v3542_v17 = vpop.f32.mrf.mxu2 }
 0x486   : > { %v3543_v60 = vadd.f32 %v6120_v12, %v3542_v17  ;;  %v3386_v48 = vsub.f32 1.0, %v3354_v13 }
 0x488   : > { %3604 = vst [vmem:[%s6129_s18 + $0x60] sm:$0xff] %v3543_v60  ;;  %v3418_v58 = vmul.f32 %v3386_v48, %v3130_v3 }
 0x48a   : > { %v3434_v61 = vpack.c.bf16 %v3418_v58, %v3417_v53 }
 0x48d   : > { %v3544_v51 = vpop.f32.mrf.mxu2 }
 0x48e   : > { %v3545_v29 = vadd.f32 %v6120_v12, %v3544_v51 }
 0x490   : > { %3605 = vst [vmem:[%s6129_s18 + $0x68] sm:$0xff] %v3545_v29 }
 0x492   : > { %3841 = vmatmul.msk.bf16.gmra.mxu2 %vm935_vm2, %v3434_v61 }
 0x495   : > { %v3547_v15 = vpop.f32.mrf.mxu2 }
 0x496   : > { %v3548_v32 = vadd.f32 %v6120_v12, %v3547_v15 }
 0x498   : > { %3606 = vst [vmem:[%s6129_s18 + $0x70] sm:$0xff] %v3548_v32 }
 0x49d   : > { %v3549_v46 = vpop.f32.mrf.mxu2 }
 0x49e   : > { %v3550_v40 = vadd.f32 %v6120_v12, %v3549_v46 }
 0x4a0   : > { %3607 = vst [vmem:[%s6129_s18 + $0x78] sm:$0xff] %v3550_v40 }
 0x4a5   : > { %v3552_v45 = vpop.f32.mrf.mxu2 }
 0x4a6   : > { %v3553_v47 = vadd.f32 %v6120_v12, %v3552_v45 }
 0x4a8   : > { %3608 = vst [vmem:[%s6129_s18 + $0x80] sm:$0xff] %v3553_v47 }
 0x4ad   : > { %v3554_v41 = vpop.f32.mrf.mxu2 }
 0x4ae   : > { %v3555_v56 = vadd.f32 %v6120_v12, %v3554_v41 }
 0x4b0   : > { %3609 = vst [vmem:[%s6129_s18 + $0x88] sm:$0xff] %v3555_v56 }
 0x4b5   : > { %v3557_v36 = vpop.f32.mrf.mxu2 }
 0x4b6   : > { %v3558_v33 = vadd.f32 %v6120_v12, %v3557_v36 }
 0x4b8   : > { %3610 = vst [vmem:[%s6129_s18 + $0x90] sm:$0xff] %v3558_v33 }
 0x4bd   : > { %v3559_v31 = vpop.f32.mrf.mxu2 }
 0x4be   : > { %v3560_v7 = vadd.f32 %v6120_v12, %v3559_v31 }
 0x4c0   : > { %3611 = vst [vmem:[%s6129_s18 + $0x98] sm:$0xff] %v3560_v7 }
 0x4c5   : > { %v3562_v22 = vpop.f32.mrf.mxu2 }
 0x4c6   : > { %v3563_v20 = vadd.f32 %v6120_v12, %v3562_v22 }
 0x4c8   : > { %3612 = vst [vmem:[%s6129_s18 + $0xa0] sm:$0xff] %v3563_v20 }
 0x4cd   : > { %v3564_v62 = vpop.f32.mrf.mxu2 }
 0x4ce   : > { %v3565_v0 = vadd.f32 %v6120_v12, %v3564_v62 }
 0x4d0   : > { %3613 = vst [vmem:[%s6129_s18 + $0xa8] sm:$0xff] %v3565_v0 }
 0x4d5   : > { %v3567_v38 = vpop.f32.mrf.mxu2 }
 0x4d6   : > { %v3568_v6 = vadd.f32 %v6120_v12, %v3567_v38 }
 0x4d8   : > { %3614 = vst [vmem:[%s6129_s18 + $0xb0] sm:$0xff] %v3568_v6 }
 0x4dd   : > { %v3569_v55 = vpop.f32.mrf.mxu2 }
 0x4de   : > { %v3570_v39 = vadd.f32 %v6120_v12, %v3569_v55 }
 0x4e0   : > { %3615 = vst [vmem:[%s6129_s18 + $0xb8] sm:$0xff] %v3570_v39 }
 0x4e5   : > { %v3572_v19 = vpop.f32.mrf.mxu2 }
 0x4e6   : > { %v3573_v11 = vadd.f32 %v6120_v12, %v3572_v19 }
 0x4e8   : > { %3616 = vst [vmem:[%s6129_s18 + $0xc0] sm:$0xff] %v3573_v11 }
 0x4ed   : > { %v3574_v5 = vpop.f32.mrf.mxu2 }
 0x4ee   : > { %v3575_v3 = vadd.f32 %v6120_v12, %v3574_v5 }
 0x4f0   : > { %3617 = vst [vmem:[%s6129_s18 + $0xc8] sm:$0xff] %v3575_v3 }
 0x4f5   : > { %v3577_v44 = vpop.f32.mrf.mxu2 }
 0x4f6   : > { %v3578_v54 = vadd.f32 %v6120_v12, %v3577_v44 }
 0x4f8   : > { %3618 = vst [vmem:[%s6129_s18 + $0xd0] sm:$0xff] %v3578_v54 }
 0x4fd   : > { %v3579_v52 = vpop.f32.mrf.mxu2 }
 0x4fe   : > { %v3580_v42 = vadd.f32 %v6120_v12, %v3579_v52 }
 0x500   : > { %3619 = vst [vmem:[%s6129_s18 + $0xd8] sm:$0xff] %v3580_v42 }
 0x505   : > { %v3582_v25 = vpop.f32.mrf.mxu2 }
 0x506   : > { %v3583_v18 = vadd.f32 %v6120_v12, %v3582_v25 }
 0x508   : > { %3620 = vst [vmem:[%s6129_s18 + $0xe0] sm:$0xff] %v3583_v18 }
 0x50d   : > { %v3584_v37 = vpop.f32.mrf.mxu2 }
 0x50e   : > { %v3585_v8 = vadd.f32 %v6120_v12, %v3584_v37 }
 0x510   : > { %3621 = vst [vmem:[%s6129_s18 + $0xe8] sm:$0xff] %v3585_v8 }
 0x515   : > { %v3587_v4 = vpop.f32.mrf.mxu2 }
 0x516   : > { %v3588_v1 = vadd.f32 %v6120_v12, %v3587_v4 }
 0x518   : > { %3622 = vst [vmem:[%s6129_s18 + $0xf0] sm:$0xff] %v3588_v1 }
 0x51d   : > { %v3589_v43 = vpop.f32.mrf.mxu2 }
 0x51e   : > { %v3590_v9 = vadd.f32 %v6120_v12, %v3589_v43 }
 0x520   : > { %3623 = vst [vmem:[%s6129_s18 + $0xf8] sm:$0xff] %v3590_v9 }
 0x521 PF: > { %s19_s30 = sadd.s32 1, %s4643_s30  }
 0x522   : > { %p16_p4 = scmp.ge.s32.totalorder %s19_s30, 4  }
 0x524   :  { %18 = sbr.rel (!%p16_p4) target bundleno = 1 (0x1), region = 89 }

</bundles_post_ra>
